<compile_context>
chip_gen: v7x
topology: tpu7x:2x2x1
jax: 0.10.0
libtpu: 0.0.40
codegen_flags: <defaults>
</compile_context>

<pallas_src>
import numpy as np
import jax
import jax.numpy as jnp
from jax.experimental import pallas as pl
from jax.experimental.pallas import tpu as pltpu

LN_EPS = 1e-5    # torch.nn.LayerNorm default eps
GEN_EPS = 1e-7   # GENConv message eps

VMEM = pl.BlockSpec(memory_space=pltpu.MemorySpace.VMEM)
SMEM = pl.BlockSpec(memory_space=pltpu.MemorySpace.SMEM)


# --------------------------------------------------------------------------- fused kernel

def _patchgcn_fused_kernel(
    x_ref, adj_ref, fc_w_ref, fc_b_ref,
    w1_ref, w2_ref, vec2_ref, vec1_ref, t_ref,
    phi_w_ref, phi_b_ref,
    att_wab_ref, att_bab_ref, att_wc_ref, att_bc_ref,
    out_w_ref, out_b_ref,
    o_ref,
):
    f32, bf16 = jnp.float32, jnp.bfloat16
    n = x_ref.shape[0]
    dh = fc_w_ref.shape[1]
    num_layers = w1_ref.shape[0]

    adj = adj_ref[...]          # [N, N] bf16 edge counts, VMEM-resident for all layers

    def dotb(a, b_bf16):
        # single-pass bf16 x bf16 MXU matmul, f32 accumulation
        return jnp.dot(a.astype(bf16), b_bf16, preferred_element_type=f32)

    def layer_norm(h, g, b):
        mu = jnp.mean(h, axis=-1, keepdims=True)
        var = jnp.mean((h - mu) ** 2, axis=-1, keepdims=True)
        return (h - mu) * jax.lax.rsqrt(var + LN_EPS) * g + b

    def genconv(h, l, h_nonneg):
        # message: m_j = relu(x_j) + eps   (edge_attr is None); layer 0's input is
        # already ReLU'd, so the relu is skipped statically there.
        t = t_ref[l]
        m = (h if h_nonneg else jnp.maximum(h, 0.0)) + GEN_EPS
        # sign-safe stabilizer: global per-channel max of t*m (cancels in num/den)
        tm = t * m
        tm_max = jnp.max(tm, axis=0, keepdims=True)
        e = jnp.exp(tm - tm_max)
        # single adjacency matmul computes numerator and denominator together;
        # packed operand built directly in bf16 (no f32 [N,2*dh] temporary)
        packed = jnp.concatenate([(e * m).astype(bf16), e.astype(bf16)], axis=1)
        agg = jnp.dot(adj, packed, preferred_element_type=f32)         # [N, 2*dh]
        num, den = agg[:, :dh], agg[:, dh:]
        # EUP reciprocal; isolated nodes (den==0 -> also num==0) yield exactly 0
        den_safe = jnp.where(den > 0.0, den, 1.0)
        aggr = jnp.where(den > 0.0, num * pl.reciprocal(den_safe, approx=True), 0.0)
        hh = h + aggr                                                  # aggr + x_dst
        # GENConv MLP: Linear(dh, 2dh) -> LayerNorm -> ReLU -> Linear(2dh, dh)
        v2 = vec2_ref[l]                                               # [3, 2*dh]: b1, g1, be1
        h1 = dotb(hh, w1_ref[l]) + v2[0:1]
        h1 = jnp.maximum(layer_norm(h1, v2[1:2], v2[2:3]), 0.0)
        return dotb(h1, w2_ref[l]) + vec1_ref[l][0:1]                  # [3, dh]: b2, ln_g, ln_b

    # fc: Linear + ReLU  (Dropout = identity in eval)
    h0 = jnp.maximum(dotb(x_ref[...], fc_w_ref[...]) + fc_b_ref[...], 0.0)

    # path_phi on the implicit concat, accumulated incrementally (no feats list)
    hp = dotb(h0, phi_w_ref[0:dh, :])

    # layer 0: conv only (as in the reference forward)
    h = genconv(h0, 0, h_nonneg=True)
    hp = hp + dotb(h, phi_w_ref[dh:2 * dh, :])

    for l in range(1, num_layers):           # DeepGCNLayer 'res': x + relu(LN(conv(x)))
        conv_out = genconv(h, l, h_nonneg=False)
        v1 = vec1_ref[l]
        h = h + jnp.maximum(layer_norm(conv_out, v1[1:2], v1[2:3]), 0.0)
        hp = hp + dotb(h, phi_w_ref[(l + 1) * dh:(l + 2) * dh, :])

    hp = jnp.maximum(hp + phi_b_ref[...], 0.0)
    hp_b = hp.astype(bf16)                   # single bf16 cast, reused twice below

    # gated attention pooling: both branches share one dot against [wa | wb]
    ab = jnp.dot(hp_b, att_wab_ref[...], preferred_element_type=f32) + att_bab_ref[...]
    gate = jnp.tanh(ab[:, :dh]) * jax.nn.sigmoid(ab[:, dh:])
    # attention score: VPU multiply + lane reduce (no 1-lane MXU dot)
    s = jnp.sum(gate * att_wc_ref[...], axis=-1, keepdims=True) + att_bc_ref[...]
    s = s - jnp.max(s)
    e = jnp.exp(s)
    denom = jnp.sum(e)
    # weighted node-sum as a lane-dense MXU dot: [1,N] @ [N,dh]
    hsum = jnp.dot(jnp.ones((1, n), bf16), e.astype(bf16) * hp_b,
                   preferred_element_type=f32)
    pooled = hsum / denom
    o_ref[...] = dotb(pooled, out_w_ref[...]) + out_b_ref[...]


# --------------------------------------------------------------------------- wrapper

def patchgcn_forward(params, x, adj_bf16):
    layers = params["layers"]
    n, dim_in = x.shape
    dh = params["fc_w"].shape[1]
    num_cls = params["out_w"].shape[1]
    L = len(layers)
    bf16 = jnp.bfloat16

    # host-side parameter consolidation (glue): stacked bf16 MXU weights, two packed
    # per-layer vector tables and a small SMEM table for the learnable t's.
    w1s = jnp.stack([lp["mlp_w1"] for lp in layers]).astype(bf16)          # [L, dh, 2dh]
    w2s = jnp.stack([lp["mlp_w2"] for lp in layers]).astype(bf16)          # [L, 2dh, dh]
    vec2 = jnp.stack([jnp.concatenate([lp["mlp_b1"], lp["mlp_g1"], lp["mlp_be1"]], 0)
                      for lp in layers])                                   # [L, 3, 2dh]
    vec1 = jnp.stack([jnp.concatenate([lp["mlp_b2"], lp["ln_g"], lp["ln_b"]], 0)
                      for lp in layers])                                   # [L, 3, dh]
    t_all = jnp.concatenate([lp["t"] for lp in layers])                    # [L]
    att_wab = jnp.concatenate([params["att_wa"], params["att_wb"]], 1).astype(bf16)
    att_bab = jnp.concatenate([params["att_ba"], params["att_bb"]], 1)
    att_wc_row = params["att_wc"].T                                        # [1, dh] f32 (VPU path)

    args = (x, adj_bf16,
            params["fc_w"].astype(bf16), params["fc_b"],
            w1s, w2s, vec2, vec1, t_all,
            params["phi_w"].astype(bf16), params["phi_b"],
            att_wab, att_bab,
            att_wc_row, params["att_bc"],
            params["out_w"].astype(bf16), params["out_b"])

    # advisory cost estimate so XLA schedules the glue around the custom call
    flops = int(
        2 * n * dim_in * dh
        + L * (2 * n * n * (2 * dh) + 2 * n * dh * (2 * dh) + 2 * n * (2 * dh) * dh)
        + (L + 1) * 2 * n * dh * dh
        + 2 * n * dh * (2 * dh) + 4 * n * dh
        + 2 * dh * num_cls)
    transcendentals = int(L * n * dh + 3 * n * dh + n)
    bytes_accessed = int(sum(int(a.size) * a.dtype.itemsize for a in args)
                         + 4 * num_cls)

    return pl.pallas_call(
        _patchgcn_fused_kernel,
        out_shape=jax.ShapeDtypeStruct((1, num_cls), jnp.float32),
        in_specs=[VMEM] * 8 + [SMEM] + [VMEM] * 8,
        out_specs=VMEM,
        cost_estimate=pl.CostEstimate(flops=flops,
                                      transcendentals=transcendentals,
                                      bytes_accessed=bytes_accessed),
    )(*args)


# --------------------------------------------------------------------------- pure-JAX reference
# Mirrors the kernel math (same bf16 casts at every dot, same stabilizer and
# accumulation order) so the self-test is tight; the only unmirrored op is the
# approximate EUP reciprocal (error << tolerance).

def patchgcn_forward_ref(params, x, adj_bf16):
    bf16, f32 = jnp.bfloat16, jnp.float32
    dh = params["fc_w"].shape[1]
    n = x.shape[0]

    def dotb(a, b):
        return jnp.dot(a.astype(bf16), b.astype(bf16), preferred_element_type=f32)

    def ln(h, g, b):
        mu = jnp.mean(h, -1, keepdims=True)
        var = jnp.mean((h - mu) ** 2, -1, keepdims=True)
        return (h - mu) * jax.lax.rsqrt(var + LN_EPS) * g + b

    def genconv(h, lp):
        m = jnp.maximum(h, 0.0) + GEN_EPS
        tm = lp["t"][0] * m
        tm_max = jnp.max(tm, axis=0, keepdims=True)
        e = jnp.exp(tm - tm_max)
        packed = jnp.concatenate([(e * m).astype(bf16), e.astype(bf16)], axis=1)
        agg = jnp.dot(adj_bf16, packed, preferred_element_type=f32)
        num, den = agg[:, :dh], agg[:, dh:]
        den_safe = jnp.where(den > 0.0, den, 1.0)
        aggr = jnp.where(den > 0.0, num / den_safe, 0.0)
        hh = h + aggr
        h1 = jnp.maximum(ln(dotb(hh, lp["mlp_w1"]) + lp["mlp_b1"],
                            lp["mlp_g1"], lp["mlp_be1"]), 0.0)
        return dotb(h1, lp["mlp_w2"]) + lp["mlp_b2"]

    h0 = jnp.maximum(dotb(x, params["fc_w"]) + params["fc_b"], 0.0)
    hp = dotb(h0, params["phi_w"][0:dh, :])

    h = genconv(h0, params["layers"][0])
    hp = hp + dotb(h, params["phi_w"][dh:2 * dh, :])

    for i, lp in enumerate(params["layers"][1:], start=1):
        h = h + jnp.maximum(ln(genconv(h, lp), lp["ln_g"], lp["ln_b"]), 0.0)
        hp = hp + dotb(h, params["phi_w"][(i + 1) * dh:(i + 2) * dh, :])

    hp = jnp.maximum(hp + params["phi_b"], 0.0)
    hp_b = hp.astype(bf16)

    att_wab = jnp.concatenate([params["att_wa"], params["att_wb"]], 1)
    att_bab = jnp.concatenate([params["att_ba"], params["att_bb"]], 1)
    ab = dotb(hp_b, att_wab) + att_bab
    gate = jnp.tanh(ab[:, :dh]) * jax.nn.sigmoid(ab[:, dh:])
    s = jnp.sum(gate * params["att_wc"].T, axis=-1, keepdims=True) + params["att_bc"]
    s = s - jnp.max(s)
    e = jnp.exp(s)
    denom = jnp.sum(e)
    hsum = jnp.dot(jnp.ones((1, n), bf16), e.astype(bf16) * hp_b,
                   preferred_element_type=f32)
    pooled = hsum / denom
    return dotb(pooled, params["out_w"]) + params["out_b"]


# --------------------------------------------------------------------------- params / data

def _dense(key, fan_in, fan_out):
    k1, k2 = jax.random.split(key)
    lim = 1.0 / np.sqrt(fan_in)
    w = jax.random.uniform(k1, (fan_in, fan_out), jnp.float32, -lim, lim)
    b = jax.random.uniform(k2, (1, fan_out), jnp.float32, -lim, lim)
    return w, b


def init_params(key, dim_in, dim_hid, num_cls, num_layers=3):
    keys = jax.random.split(key, 8 + num_layers)
    p = {}
    p["fc_w"], p["fc_b"] = _dense(keys[0], dim_in, dim_hid)
    layers = []
    for i in range(num_layers):
        k1, k2 = jax.random.split(keys[1 + i])
        w1, b1 = _dense(k1, dim_hid, 2 * dim_hid)
        w2, b2 = _dense(k2, 2 * dim_hid, dim_hid)
        layers.append(dict(
            t=jnp.ones((1,), jnp.float32),
            mlp_w1=w1, mlp_b1=b1,
            mlp_g1=jnp.ones((1, 2 * dim_hid), jnp.float32),
            mlp_be1=jnp.zeros((1, 2 * dim_hid), jnp.float32),
            mlp_w2=w2, mlp_b2=b2,
            ln_g=jnp.ones((1, dim_hid), jnp.float32),
            ln_b=jnp.zeros((1, dim_hid), jnp.float32),
        ))
    p["layers"] = layers
    dim_sum = dim_hid * (1 + num_layers)
    p["phi_w"], p["phi_b"] = _dense(keys[num_layers + 1], dim_sum, dim_hid)
    p["att_wa"], p["att_ba"] = _dense(keys[num_layers + 2], dim_hid, dim_hid)
    p["att_wb"], p["att_bb"] = _dense(keys[num_layers + 3], dim_hid, dim_hid)
    p["att_wc"], p["att_bc"] = _dense(keys[num_layers + 4], dim_hid, 1)
    p["out_w"], p["out_b"] = _dense(keys[num_layers + 5], dim_hid, num_cls)
    return p


def make_graph(key, n_nodes, n_rand_edges):
    ids = jnp.arange(n_nodes)
    src_ring = jnp.concatenate([ids, ids])
    dst_ring = jnp.concatenate([(ids + 1) % n_nodes, (ids - 1) % n_nodes])
    k1, k2 = jax.random.split(key)
    rsrc = jax.random.randint(k1, (n_rand_edges,), 0, n_nodes)
    rdst = jax.random.randint(k2, (n_rand_edges,), 0, n_nodes)
    edge_index = jnp.stack([jnp.concatenate([src_ring, rsrc]),
                            jnp.concatenate([dst_ring, rdst])]).astype(jnp.int32)
    # dense adjacency counts: adj[dst, src] += 1  (glue, plain JAX)
    adj = jnp.zeros((n_nodes, n_nodes), jnp.float32).at[edge_index[1], edge_index[0]].add(1.0)
    return edge_index, adj


if __name__ == "__main__":
    # Demo sizes: sublane-aligned node count, lane-dense channel widths (128 lanes).
    N, DIM_IN, DIM_HID, NUM_CLS, NUM_LAYERS = 64, 64, 128, 4, 3

    root = jax.random.PRNGKey(0)
    k_param, k_x, k_graph = jax.random.split(root, 3)

    params = init_params(k_param, DIM_IN, DIM_HID, NUM_CLS, NUM_LAYERS)
    x = jax.random.normal(k_x, (N, DIM_IN), jnp.float32)          # data.x
    edge_index, adj = make_graph(k_graph, N, n_rand_edges=64)     # data.edge_index
    # adjacency holds small integer edge counts -> exact in bf16 (exact up to 256)
    assert float(jnp.max(adj)) < 256.0
    adj_bf16 = adj.astype(jnp.bfloat16)

    out = jax.block_until_ready(patchgcn_forward(params, x, adj_bf16))
    ref = jax.block_until_ready(patchgcn_forward_ref(params, x, adj_bf16))
    np.testing.assert_allclose(np.asarray(out), np.asarray(ref), rtol=1e-2, atol=1e-2)
    assert out.shape == (1, NUM_CLS)

    print("KERNEL_OK")
</pallas_src>

<mosaic_0001>
module attributes {stable_mosaic.version = 11 : i64} {
  func.func @_patchgcn_fused_kernel(%arg0: memref<64x64xf32, #tpu.memory_space<vmem>>, %arg1: memref<64x64xbf16, #tpu.memory_space<vmem>>, %arg2: memref<64x128xbf16, #tpu.memory_space<vmem>>, %arg3: memref<1x128xf32, #tpu.memory_space<vmem>>, %arg4: memref<3x128x256xbf16, #tpu.memory_space<vmem>>, %arg5: memref<3x256x128xbf16, #tpu.memory_space<vmem>>, %arg6: memref<3x3x256xf32, #tpu.memory_space<vmem>>, %arg7: memref<3x3x128xf32, #tpu.memory_space<vmem>>, %arg8: memref<3xf32, #tpu.memory_space<smem>>, %arg9: memref<512x128xbf16, #tpu.memory_space<vmem>>, %arg10: memref<1x128xf32, #tpu.memory_space<vmem>>, %arg11: memref<128x256xbf16, #tpu.memory_space<vmem>>, %arg12: memref<1x256xf32, #tpu.memory_space<vmem>>, %arg13: memref<1x128xf32, #tpu.memory_space<vmem>>, %arg14: memref<1x1xf32, #tpu.memory_space<vmem>>, %arg15: memref<128x4xbf16, #tpu.memory_space<vmem>>, %arg16: memref<1x4xf32, #tpu.memory_space<vmem>>, %arg17: memref<1x4xf32, #tpu.memory_space<vmem>>) attributes {dimension_semantics = [], scalar_prefetch = 0 : i64, scratch_operands = 0 : i64, tpu.core_type = #tpu.core_type<tc>} {
    %c0 = arith.constant 0 : index
    %c0_0 = arith.constant 0 : index
    %0 = vector.load %arg1[%c0, %c0_0] : memref<64x64xbf16, #tpu.memory_space<vmem>>, vector<64x64xbf16>
    %c0_1 = arith.constant 0 : index
    %c0_2 = arith.constant 0 : index
    %1 = vector.load %arg0[%c0_1, %c0_2] : memref<64x64xf32, #tpu.memory_space<vmem>>, vector<64x64xf32>
    %c0_3 = arith.constant 0 : index
    %c0_4 = arith.constant 0 : index
    %2 = vector.load %arg2[%c0_3, %c0_4] : memref<64x128xbf16, #tpu.memory_space<vmem>>, vector<64x128xbf16>
    %3 = arith.truncf %1 : vector<64x64xf32> to vector<64x64xbf16>
    %cst = arith.constant dense<0.000000e+00> : vector<64x128xf32>
    %4 = tpu.matmul %3, %2, %cst {dimension_numbers = #tpu.dot_dimension_numbers<[1], [0], [0], [1], [0, 0, 1, 1], [], []>} : vector<64x64xbf16>, vector<64x128xbf16>, vector<64x128xf32> -> vector<64x128xf32>
    %c0_5 = arith.constant 0 : index
    %c0_6 = arith.constant 0 : index
    %5 = vector.load %arg3[%c0_5, %c0_6] : memref<1x128xf32, #tpu.memory_space<vmem>>, vector<1x128xf32>
    %6 = vector.broadcast %5 : vector<1x128xf32> to vector<64x128xf32>
    %7 = arith.addf %4, %6 : vector<64x128xf32>
    %cst_7 = arith.constant 0.000000e+00 : f32
    %8 = vector.broadcast %cst_7 : f32 to vector<64x128xf32>
    %9 = arith.maximumf %7, %8 : vector<64x128xf32>
    %c0_8 = arith.constant 0 : index
    %c0_9 = arith.constant 0 : index
    %10 = vector.load %arg9[%c0_8, %c0_9] : memref<512x128xbf16, #tpu.memory_space<vmem>>, vector<128x128xbf16>
    %11 = arith.truncf %9 : vector<64x128xf32> to vector<64x128xbf16>
    %cst_10 = arith.constant dense<0.000000e+00> : vector<64x128xf32>
    %12 = tpu.matmul %11, %10, %cst_10 {dimension_numbers = #tpu.dot_dimension_numbers<[1], [0], [0], [1], [0, 0, 1, 1], [], []>} : vector<64x128xbf16>, vector<128x128xbf16>, vector<64x128xf32> -> vector<64x128xf32>
    %c0_11 = arith.constant 0 : index
    %13 = memref.load %arg8[%c0_11] : memref<3xf32, #tpu.memory_space<smem>>
    %cst_12 = arith.constant 1.000000e-07 : f32
    %14 = vector.broadcast %cst_12 : f32 to vector<64x128xf32>
    %15 = arith.addf %9, %14 : vector<64x128xf32>
    %16 = vector.broadcast %13 : f32 to vector<64x128xf32>
    %17 = arith.mulf %16, %15 : vector<64x128xf32>
    %cst_13 = arith.constant dense<0xFF800000> : vector<128xf32>
    %18 = vector.multi_reduction <maximumf>, %17, %cst_13 [0] : vector<64x128xf32> to vector<128xf32>
    %19 = vector.shape_cast %18 : vector<128xf32> to vector<1x128xf32>
    %20 = vector.broadcast %19 : vector<1x128xf32> to vector<64x128xf32>
    %21 = arith.subf %17, %20 : vector<64x128xf32>
    %22 = math.exp %21 : vector<64x128xf32>
    %23 = arith.mulf %22, %15 : vector<64x128xf32>
    %24 = arith.truncf %23 : vector<64x128xf32> to vector<64x128xbf16>
    %25 = arith.truncf %22 : vector<64x128xf32> to vector<64x128xbf16>
    %26 = tpu.concatenate %24, %25 in 1 : vector<64x128xbf16>, vector<64x128xbf16> -> vector<64x256xbf16>
    %cst_14 = arith.constant dense<0.000000e+00> : vector<64x256xf32>
    %27 = tpu.matmul %0, %26, %cst_14 {dimension_numbers = #tpu.dot_dimension_numbers<[1], [0], [0], [1], [0, 0, 1, 1], [], []>} : vector<64x64xbf16>, vector<64x256xbf16>, vector<64x256xf32> -> vector<64x256xf32>
    %28 = vector.extract_strided_slice %27 {offsets = [0, 0], sizes = [64, 128], strides = [1, 1]} : vector<64x256xf32> to vector<64x128xf32>
    %29 = vector.extract_strided_slice %27 {offsets = [0, 128], sizes = [64, 128], strides = [1, 1]} : vector<64x256xf32> to vector<64x128xf32>
    %cst_15 = arith.constant 0.000000e+00 : f32
    %30 = vector.broadcast %cst_15 : f32 to vector<64x128xf32>
    %31 = arith.cmpf ogt, %29, %30 : vector<64x128xf32>
    %cst_16 = arith.constant 1.000000e+00 : f32
    %32 = vector.broadcast %cst_16 : f32 to vector<64x128xf32>
    %33 = arith.select %31, %29, %32 : vector<64x128xi1>, vector<64x128xf32>
    %cst_17 = arith.constant 0.000000e+00 : f32
    %34 = vector.broadcast %cst_17 : f32 to vector<64x128xf32>
    %35 = arith.cmpf ogt, %29, %34 : vector<64x128xf32>
    %36 = tpu.reciprocal %33 {approx = true} : vector<64x128xf32> -> vector<64x128xf32>
    %37 = arith.mulf %28, %36 : vector<64x128xf32>
    %cst_18 = arith.constant 0.000000e+00 : f32
    %38 = vector.broadcast %cst_18 : f32 to vector<64x128xf32>
    %39 = arith.select %35, %37, %38 : vector<64x128xi1>, vector<64x128xf32>
    %40 = arith.addf %9, %39 : vector<64x128xf32>
    %c0_19 = arith.constant 0 : index
    %c0_20 = arith.constant 0 : index
    %c0_21 = arith.constant 0 : index
    %41 = vector.load %arg6[%c0_19, %c0_20, %c0_21] : memref<3x3x256xf32, #tpu.memory_space<vmem>>, vector<1x3x256xf32>
    %42 = vector.shape_cast %41 : vector<1x3x256xf32> to vector<3x256xf32>
    %c0_22 = arith.constant 0 : index
    %c0_23 = arith.constant 0 : index
    %c0_24 = arith.constant 0 : index
    %43 = vector.load %arg4[%c0_22, %c0_23, %c0_24] : memref<3x128x256xbf16, #tpu.memory_space<vmem>>, vector<1x128x256xbf16>
    %44 = vector.shape_cast %43 : vector<1x128x256xbf16> to vector<128x256xbf16>
    %45 = arith.truncf %40 : vector<64x128xf32> to vector<64x128xbf16>
    %cst_25 = arith.constant dense<0.000000e+00> : vector<64x256xf32>
    %46 = tpu.matmul %45, %44, %cst_25 {dimension_numbers = #tpu.dot_dimension_numbers<[1], [0], [0], [1], [0, 0, 1, 1], [], []>} : vector<64x128xbf16>, vector<128x256xbf16>, vector<64x256xf32> -> vector<64x256xf32>
    %47 = vector.extract_strided_slice %42 {offsets = [0, 0], sizes = [1, 256], strides = [1, 1]} : vector<3x256xf32> to vector<1x256xf32>
    %48 = vector.broadcast %47 : vector<1x256xf32> to vector<64x256xf32>
    %49 = arith.addf %46, %48 : vector<64x256xf32>
    %50 = vector.extract_strided_slice %42 {offsets = [1, 0], sizes = [1, 256], strides = [1, 1]} : vector<3x256xf32> to vector<1x256xf32>
    %51 = vector.extract_strided_slice %42 {offsets = [2, 0], sizes = [1, 256], strides = [1, 1]} : vector<3x256xf32> to vector<1x256xf32>
    %cst_26 = arith.constant dense<0.000000e+00> : vector<64xf32>
    %52 = vector.multi_reduction <add>, %49, %cst_26 [1] : vector<64x256xf32> to vector<64xf32>
    %53 = vector.shape_cast %52 : vector<64xf32> to vector<64x1xf32>
    %cst_27 = arith.constant 2.560000e+02 : f32
    %54 = vector.broadcast %cst_27 : f32 to vector<64x1xf32>
    %55 = arith.divf %53, %54 : vector<64x1xf32>
    %56 = vector.broadcast %55 : vector<64x1xf32> to vector<64x256xf32>
    %57 = arith.subf %49, %56 : vector<64x256xf32>
    %58 = arith.mulf %57, %57 : vector<64x256xf32>
    %cst_28 = arith.constant dense<0.000000e+00> : vector<64xf32>
    %59 = vector.multi_reduction <add>, %58, %cst_28 [1] : vector<64x256xf32> to vector<64xf32>
    %60 = vector.shape_cast %59 : vector<64xf32> to vector<64x1xf32>
    %cst_29 = arith.constant 2.560000e+02 : f32
    %61 = vector.broadcast %cst_29 : f32 to vector<64x1xf32>
    %62 = arith.divf %60, %61 : vector<64x1xf32>
    %63 = vector.broadcast %55 : vector<64x1xf32> to vector<64x256xf32>
    %64 = arith.subf %49, %63 : vector<64x256xf32>
    %cst_30 = arith.constant 9.99999974E-6 : f32
    %65 = vector.broadcast %cst_30 : f32 to vector<64x1xf32>
    %66 = arith.addf %62, %65 : vector<64x1xf32>
    %67 = math.rsqrt %66 : vector<64x1xf32>
    %68 = vector.broadcast %67 : vector<64x1xf32> to vector<64x256xf32>
    %69 = arith.mulf %64, %68 : vector<64x256xf32>
    %70 = vector.broadcast %50 : vector<1x256xf32> to vector<64x256xf32>
    %71 = arith.mulf %69, %70 : vector<64x256xf32>
    %72 = vector.broadcast %51 : vector<1x256xf32> to vector<64x256xf32>
    %73 = arith.addf %71, %72 : vector<64x256xf32>
    %cst_31 = arith.constant 0.000000e+00 : f32
    %74 = vector.broadcast %cst_31 : f32 to vector<64x256xf32>
    %75 = arith.maximumf %73, %74 : vector<64x256xf32>
    %c0_32 = arith.constant 0 : index
    %c0_33 = arith.constant 0 : index
    %c0_34 = arith.constant 0 : index
    %76 = vector.load %arg5[%c0_32, %c0_33, %c0_34] : memref<3x256x128xbf16, #tpu.memory_space<vmem>>, vector<1x256x128xbf16>
    %77 = vector.shape_cast %76 : vector<1x256x128xbf16> to vector<256x128xbf16>
    %78 = arith.truncf %75 : vector<64x256xf32> to vector<64x256xbf16>
    %cst_35 = arith.constant dense<0.000000e+00> : vector<64x128xf32>
    %79 = tpu.matmul %78, %77, %cst_35 {dimension_numbers = #tpu.dot_dimension_numbers<[1], [0], [0], [1], [0, 0, 1, 1], [], []>} : vector<64x256xbf16>, vector<256x128xbf16>, vector<64x128xf32> -> vector<64x128xf32>
    %c0_36 = arith.constant 0 : index
    %c0_37 = arith.constant 0 : index
    %c0_38 = arith.constant 0 : index
    %80 = vector.load %arg7[%c0_36, %c0_37, %c0_38] : memref<3x3x128xf32, #tpu.memory_space<vmem>>, vector<1x3x128xf32>
    %81 = vector.shape_cast %80 : vector<1x3x128xf32> to vector<3x128xf32>
    %82 = vector.extract_strided_slice %81 {offsets = [0, 0], sizes = [1, 128], strides = [1, 1]} : vector<3x128xf32> to vector<1x128xf32>
    %83 = vector.broadcast %82 : vector<1x128xf32> to vector<64x128xf32>
    %84 = arith.addf %79, %83 : vector<64x128xf32>
    %c128 = arith.constant 128 : index
    %c0_39 = arith.constant 0 : index
    %85 = vector.load %arg9[%c128, %c0_39] : memref<512x128xbf16, #tpu.memory_space<vmem>>, vector<128x128xbf16>
    %86 = arith.truncf %84 : vector<64x128xf32> to vector<64x128xbf16>
    %cst_40 = arith.constant dense<0.000000e+00> : vector<64x128xf32>
    %87 = tpu.matmul %86, %85, %cst_40 {dimension_numbers = #tpu.dot_dimension_numbers<[1], [0], [0], [1], [0, 0, 1, 1], [], []>} : vector<64x128xbf16>, vector<128x128xbf16>, vector<64x128xf32> -> vector<64x128xf32>
    %88 = arith.addf %12, %87 : vector<64x128xf32>
    %c1 = arith.constant 1 : index
    %89 = memref.load %arg8[%c1] : memref<3xf32, #tpu.memory_space<smem>>
    %cst_41 = arith.constant 0.000000e+00 : f32
    %90 = vector.broadcast %cst_41 : f32 to vector<64x128xf32>
    %91 = arith.maximumf %84, %90 : vector<64x128xf32>
    %cst_42 = arith.constant 1.000000e-07 : f32
    %92 = vector.broadcast %cst_42 : f32 to vector<64x128xf32>
    %93 = arith.addf %91, %92 : vector<64x128xf32>
    %94 = vector.broadcast %89 : f32 to vector<64x128xf32>
    %95 = arith.mulf %94, %93 : vector<64x128xf32>
    %cst_43 = arith.constant dense<0xFF800000> : vector<128xf32>
    %96 = vector.multi_reduction <maximumf>, %95, %cst_43 [0] : vector<64x128xf32> to vector<128xf32>
    %97 = vector.shape_cast %96 : vector<128xf32> to vector<1x128xf32>
    %98 = vector.broadcast %97 : vector<1x128xf32> to vector<64x128xf32>
    %99 = arith.subf %95, %98 : vector<64x128xf32>
    %100 = math.exp %99 : vector<64x128xf32>
    %101 = arith.mulf %100, %93 : vector<64x128xf32>
    %102 = arith.truncf %101 : vector<64x128xf32> to vector<64x128xbf16>
    %103 = arith.truncf %100 : vector<64x128xf32> to vector<64x128xbf16>
    %104 = tpu.concatenate %102, %103 in 1 : vector<64x128xbf16>, vector<64x128xbf16> -> vector<64x256xbf16>
    %cst_44 = arith.constant dense<0.000000e+00> : vector<64x256xf32>
    %105 = tpu.matmul %0, %104, %cst_44 {dimension_numbers = #tpu.dot_dimension_numbers<[1], [0], [0], [1], [0, 0, 1, 1], [], []>} : vector<64x64xbf16>, vector<64x256xbf16>, vector<64x256xf32> -> vector<64x256xf32>
    %106 = vector.extract_strided_slice %105 {offsets = [0, 0], sizes = [64, 128], strides = [1, 1]} : vector<64x256xf32> to vector<64x128xf32>
    %107 = vector.extract_strided_slice %105 {offsets = [0, 128], sizes = [64, 128], strides = [1, 1]} : vector<64x256xf32> to vector<64x128xf32>
    %cst_45 = arith.constant 0.000000e+00 : f32
    %108 = vector.broadcast %cst_45 : f32 to vector<64x128xf32>
    %109 = arith.cmpf ogt, %107, %108 : vector<64x128xf32>
    %cst_46 = arith.constant 1.000000e+00 : f32
    %110 = vector.broadcast %cst_46 : f32 to vector<64x128xf32>
    %111 = arith.select %109, %107, %110 : vector<64x128xi1>, vector<64x128xf32>
    %cst_47 = arith.constant 0.000000e+00 : f32
    %112 = vector.broadcast %cst_47 : f32 to vector<64x128xf32>
    %113 = arith.cmpf ogt, %107, %112 : vector<64x128xf32>
    %114 = tpu.reciprocal %111 {approx = true} : vector<64x128xf32> -> vector<64x128xf32>
    %115 = arith.mulf %106, %114 : vector<64x128xf32>
    %cst_48 = arith.constant 0.000000e+00 : f32
    %116 = vector.broadcast %cst_48 : f32 to vector<64x128xf32>
    %117 = arith.select %113, %115, %116 : vector<64x128xi1>, vector<64x128xf32>
    %118 = arith.addf %84, %117 : vector<64x128xf32>
    %c1_49 = arith.constant 1 : index
    %c0_50 = arith.constant 0 : index
    %c0_51 = arith.constant 0 : index
    %119 = vector.load %arg6[%c1_49, %c0_50, %c0_51] : memref<3x3x256xf32, #tpu.memory_space<vmem>>, vector<1x3x256xf32>
    %120 = vector.shape_cast %119 : vector<1x3x256xf32> to vector<3x256xf32>
    %c1_52 = arith.constant 1 : index
    %c0_53 = arith.constant 0 : index
    %c0_54 = arith.constant 0 : index
    %121 = vector.load %arg4[%c1_52, %c0_53, %c0_54] : memref<3x128x256xbf16, #tpu.memory_space<vmem>>, vector<1x128x256xbf16>
    %122 = vector.shape_cast %121 : vector<1x128x256xbf16> to vector<128x256xbf16>
    %123 = arith.truncf %118 : vector<64x128xf32> to vector<64x128xbf16>
    %cst_55 = arith.constant dense<0.000000e+00> : vector<64x256xf32>
    %124 = tpu.matmul %123, %122, %cst_55 {dimension_numbers = #tpu.dot_dimension_numbers<[1], [0], [0], [1], [0, 0, 1, 1], [], []>} : vector<64x128xbf16>, vector<128x256xbf16>, vector<64x256xf32> -> vector<64x256xf32>
    %125 = vector.extract_strided_slice %120 {offsets = [0, 0], sizes = [1, 256], strides = [1, 1]} : vector<3x256xf32> to vector<1x256xf32>
    %126 = vector.broadcast %125 : vector<1x256xf32> to vector<64x256xf32>
    %127 = arith.addf %124, %126 : vector<64x256xf32>
    %128 = vector.extract_strided_slice %120 {offsets = [1, 0], sizes = [1, 256], strides = [1, 1]} : vector<3x256xf32> to vector<1x256xf32>
    %129 = vector.extract_strided_slice %120 {offsets = [2, 0], sizes = [1, 256], strides = [1, 1]} : vector<3x256xf32> to vector<1x256xf32>
    %cst_56 = arith.constant dense<0.000000e+00> : vector<64xf32>
    %130 = vector.multi_reduction <add>, %127, %cst_56 [1] : vector<64x256xf32> to vector<64xf32>
    %131 = vector.shape_cast %130 : vector<64xf32> to vector<64x1xf32>
    %cst_57 = arith.constant 2.560000e+02 : f32
    %132 = vector.broadcast %cst_57 : f32 to vector<64x1xf32>
    %133 = arith.divf %131, %132 : vector<64x1xf32>
    %134 = vector.broadcast %133 : vector<64x1xf32> to vector<64x256xf32>
    %135 = arith.subf %127, %134 : vector<64x256xf32>
    %136 = arith.mulf %135, %135 : vector<64x256xf32>
    %cst_58 = arith.constant dense<0.000000e+00> : vector<64xf32>
    %137 = vector.multi_reduction <add>, %136, %cst_58 [1] : vector<64x256xf32> to vector<64xf32>
    %138 = vector.shape_cast %137 : vector<64xf32> to vector<64x1xf32>
    %cst_59 = arith.constant 2.560000e+02 : f32
    %139 = vector.broadcast %cst_59 : f32 to vector<64x1xf32>
    %140 = arith.divf %138, %139 : vector<64x1xf32>
    %141 = vector.broadcast %133 : vector<64x1xf32> to vector<64x256xf32>
    %142 = arith.subf %127, %141 : vector<64x256xf32>
    %cst_60 = arith.constant 9.99999974E-6 : f32
    %143 = vector.broadcast %cst_60 : f32 to vector<64x1xf32>
    %144 = arith.addf %140, %143 : vector<64x1xf32>
    %145 = math.rsqrt %144 : vector<64x1xf32>
    %146 = vector.broadcast %145 : vector<64x1xf32> to vector<64x256xf32>
    %147 = arith.mulf %142, %146 : vector<64x256xf32>
    %148 = vector.broadcast %128 : vector<1x256xf32> to vector<64x256xf32>
    %149 = arith.mulf %147, %148 : vector<64x256xf32>
    %150 = vector.broadcast %129 : vector<1x256xf32> to vector<64x256xf32>
    %151 = arith.addf %149, %150 : vector<64x256xf32>
    %cst_61 = arith.constant 0.000000e+00 : f32
    %152 = vector.broadcast %cst_61 : f32 to vector<64x256xf32>
    %153 = arith.maximumf %151, %152 : vector<64x256xf32>
    %c1_62 = arith.constant 1 : index
    %c0_63 = arith.constant 0 : index
    %c0_64 = arith.constant 0 : index
    %154 = vector.load %arg5[%c1_62, %c0_63, %c0_64] : memref<3x256x128xbf16, #tpu.memory_space<vmem>>, vector<1x256x128xbf16>
    %155 = vector.shape_cast %154 : vector<1x256x128xbf16> to vector<256x128xbf16>
    %156 = arith.truncf %153 : vector<64x256xf32> to vector<64x256xbf16>
    %cst_65 = arith.constant dense<0.000000e+00> : vector<64x128xf32>
    %157 = tpu.matmul %156, %155, %cst_65 {dimension_numbers = #tpu.dot_dimension_numbers<[1], [0], [0], [1], [0, 0, 1, 1], [], []>} : vector<64x256xbf16>, vector<256x128xbf16>, vector<64x128xf32> -> vector<64x128xf32>
    %c1_66 = arith.constant 1 : index
    %c0_67 = arith.constant 0 : index
    %c0_68 = arith.constant 0 : index
    %158 = vector.load %arg7[%c1_66, %c0_67, %c0_68] : memref<3x3x128xf32, #tpu.memory_space<vmem>>, vector<1x3x128xf32>
    %159 = vector.shape_cast %158 : vector<1x3x128xf32> to vector<3x128xf32>
    %160 = vector.extract_strided_slice %159 {offsets = [0, 0], sizes = [1, 128], strides = [1, 1]} : vector<3x128xf32> to vector<1x128xf32>
    %161 = vector.broadcast %160 : vector<1x128xf32> to vector<64x128xf32>
    %162 = arith.addf %157, %161 : vector<64x128xf32>
    %c1_69 = arith.constant 1 : index
    %c0_70 = arith.constant 0 : index
    %c0_71 = arith.constant 0 : index
    %163 = vector.load %arg7[%c1_69, %c0_70, %c0_71] : memref<3x3x128xf32, #tpu.memory_space<vmem>>, vector<1x3x128xf32>
    %164 = vector.shape_cast %163 : vector<1x3x128xf32> to vector<3x128xf32>
    %165 = vector.extract_strided_slice %164 {offsets = [1, 0], sizes = [1, 128], strides = [1, 1]} : vector<3x128xf32> to vector<1x128xf32>
    %166 = vector.extract_strided_slice %164 {offsets = [2, 0], sizes = [1, 128], strides = [1, 1]} : vector<3x128xf32> to vector<1x128xf32>
    %cst_72 = arith.constant dense<0.000000e+00> : vector<64xf32>
    %167 = vector.multi_reduction <add>, %162, %cst_72 [1] : vector<64x128xf32> to vector<64xf32>
    %168 = vector.shape_cast %167 : vector<64xf32> to vector<64x1xf32>
    %cst_73 = arith.constant 1.280000e+02 : f32
    %169 = vector.broadcast %cst_73 : f32 to vector<64x1xf32>
    %170 = arith.divf %168, %169 : vector<64x1xf32>
    %171 = vector.broadcast %170 : vector<64x1xf32> to vector<64x128xf32>
    %172 = arith.subf %162, %171 : vector<64x128xf32>
    %173 = arith.mulf %172, %172 : vector<64x128xf32>
    %cst_74 = arith.constant dense<0.000000e+00> : vector<64xf32>
    %174 = vector.multi_reduction <add>, %173, %cst_74 [1] : vector<64x128xf32> to vector<64xf32>
    %175 = vector.shape_cast %174 : vector<64xf32> to vector<64x1xf32>
    %cst_75 = arith.constant 1.280000e+02 : f32
    %176 = vector.broadcast %cst_75 : f32 to vector<64x1xf32>
    %177 = arith.divf %175, %176 : vector<64x1xf32>
    %178 = vector.broadcast %170 : vector<64x1xf32> to vector<64x128xf32>
    %179 = arith.subf %162, %178 : vector<64x128xf32>
    %cst_76 = arith.constant 9.99999974E-6 : f32
    %180 = vector.broadcast %cst_76 : f32 to vector<64x1xf32>
    %181 = arith.addf %177, %180 : vector<64x1xf32>
    %182 = math.rsqrt %181 : vector<64x1xf32>
    %183 = vector.broadcast %182 : vector<64x1xf32> to vector<64x128xf32>
    %184 = arith.mulf %179, %183 : vector<64x128xf32>
    %185 = vector.broadcast %165 : vector<1x128xf32> to vector<64x128xf32>
    %186 = arith.mulf %184, %185 : vector<64x128xf32>
    %187 = vector.broadcast %166 : vector<1x128xf32> to vector<64x128xf32>
    %188 = arith.addf %186, %187 : vector<64x128xf32>
    %cst_77 = arith.constant 0.000000e+00 : f32
    %189 = vector.broadcast %cst_77 : f32 to vector<64x128xf32>
    %190 = arith.maximumf %188, %189 : vector<64x128xf32>
    %191 = arith.addf %84, %190 : vector<64x128xf32>
    %c256 = arith.constant 256 : index
    %c0_78 = arith.constant 0 : index
    %192 = vector.load %arg9[%c256, %c0_78] : memref<512x128xbf16, #tpu.memory_space<vmem>>, vector<128x128xbf16>
    %193 = arith.truncf %191 : vector<64x128xf32> to vector<64x128xbf16>
    %cst_79 = arith.constant dense<0.000000e+00> : vector<64x128xf32>
    %194 = tpu.matmul %193, %192, %cst_79 {dimension_numbers = #tpu.dot_dimension_numbers<[1], [0], [0], [1], [0, 0, 1, 1], [], []>} : vector<64x128xbf16>, vector<128x128xbf16>, vector<64x128xf32> -> vector<64x128xf32>
    %195 = arith.addf %88, %194 : vector<64x128xf32>
    %c2 = arith.constant 2 : index
    %196 = memref.load %arg8[%c2] : memref<3xf32, #tpu.memory_space<smem>>
    %cst_80 = arith.constant 0.000000e+00 : f32
    %197 = vector.broadcast %cst_80 : f32 to vector<64x128xf32>
    %198 = arith.maximumf %191, %197 : vector<64x128xf32>
    %cst_81 = arith.constant 1.000000e-07 : f32
    %199 = vector.broadcast %cst_81 : f32 to vector<64x128xf32>
    %200 = arith.addf %198, %199 : vector<64x128xf32>
    %201 = vector.broadcast %196 : f32 to vector<64x128xf32>
    %202 = arith.mulf %201, %200 : vector<64x128xf32>
    %cst_82 = arith.constant dense<0xFF800000> : vector<128xf32>
    %203 = vector.multi_reduction <maximumf>, %202, %cst_82 [0] : vector<64x128xf32> to vector<128xf32>
    %204 = vector.shape_cast %203 : vector<128xf32> to vector<1x128xf32>
    %205 = vector.broadcast %204 : vector<1x128xf32> to vector<64x128xf32>
    %206 = arith.subf %202, %205 : vector<64x128xf32>
    %207 = math.exp %206 : vector<64x128xf32>
    %208 = arith.mulf %207, %200 : vector<64x128xf32>
    %209 = arith.truncf %208 : vector<64x128xf32> to vector<64x128xbf16>
    %210 = arith.truncf %207 : vector<64x128xf32> to vector<64x128xbf16>
    %211 = tpu.concatenate %209, %210 in 1 : vector<64x128xbf16>, vector<64x128xbf16> -> vector<64x256xbf16>
    %cst_83 = arith.constant dense<0.000000e+00> : vector<64x256xf32>
    %212 = tpu.matmul %0, %211, %cst_83 {dimension_numbers = #tpu.dot_dimension_numbers<[1], [0], [0], [1], [0, 0, 1, 1], [], []>} : vector<64x64xbf16>, vector<64x256xbf16>, vector<64x256xf32> -> vector<64x256xf32>
    %213 = vector.extract_strided_slice %212 {offsets = [0, 0], sizes = [64, 128], strides = [1, 1]} : vector<64x256xf32> to vector<64x128xf32>
    %214 = vector.extract_strided_slice %212 {offsets = [0, 128], sizes = [64, 128], strides = [1, 1]} : vector<64x256xf32> to vector<64x128xf32>
    %cst_84 = arith.constant 0.000000e+00 : f32
    %215 = vector.broadcast %cst_84 : f32 to vector<64x128xf32>
    %216 = arith.cmpf ogt, %214, %215 : vector<64x128xf32>
    %cst_85 = arith.constant 1.000000e+00 : f32
    %217 = vector.broadcast %cst_85 : f32 to vector<64x128xf32>
    %218 = arith.select %216, %214, %217 : vector<64x128xi1>, vector<64x128xf32>
    %cst_86 = arith.constant 0.000000e+00 : f32
    %219 = vector.broadcast %cst_86 : f32 to vector<64x128xf32>
    %220 = arith.cmpf ogt, %214, %219 : vector<64x128xf32>
    %221 = tpu.reciprocal %218 {approx = true} : vector<64x128xf32> -> vector<64x128xf32>
    %222 = arith.mulf %213, %221 : vector<64x128xf32>
    %cst_87 = arith.constant 0.000000e+00 : f32
    %223 = vector.broadcast %cst_87 : f32 to vector<64x128xf32>
    %224 = arith.select %220, %222, %223 : vector<64x128xi1>, vector<64x128xf32>
    %225 = arith.addf %191, %224 : vector<64x128xf32>
    %c2_88 = arith.constant 2 : index
    %c0_89 = arith.constant 0 : index
    %c0_90 = arith.constant 0 : index
    %226 = vector.load %arg6[%c2_88, %c0_89, %c0_90] : memref<3x3x256xf32, #tpu.memory_space<vmem>>, vector<1x3x256xf32>
    %227 = vector.shape_cast %226 : vector<1x3x256xf32> to vector<3x256xf32>
    %c2_91 = arith.constant 2 : index
    %c0_92 = arith.constant 0 : index
    %c0_93 = arith.constant 0 : index
    %228 = vector.load %arg4[%c2_91, %c0_92, %c0_93] : memref<3x128x256xbf16, #tpu.memory_space<vmem>>, vector<1x128x256xbf16>
    %229 = vector.shape_cast %228 : vector<1x128x256xbf16> to vector<128x256xbf16>
    %230 = arith.truncf %225 : vector<64x128xf32> to vector<64x128xbf16>
    %cst_94 = arith.constant dense<0.000000e+00> : vector<64x256xf32>
    %231 = tpu.matmul %230, %229, %cst_94 {dimension_numbers = #tpu.dot_dimension_numbers<[1], [0], [0], [1], [0, 0, 1, 1], [], []>} : vector<64x128xbf16>, vector<128x256xbf16>, vector<64x256xf32> -> vector<64x256xf32>
    %232 = vector.extract_strided_slice %227 {offsets = [0, 0], sizes = [1, 256], strides = [1, 1]} : vector<3x256xf32> to vector<1x256xf32>
    %233 = vector.broadcast %232 : vector<1x256xf32> to vector<64x256xf32>
    %234 = arith.addf %231, %233 : vector<64x256xf32>
    %235 = vector.extract_strided_slice %227 {offsets = [1, 0], sizes = [1, 256], strides = [1, 1]} : vector<3x256xf32> to vector<1x256xf32>
    %236 = vector.extract_strided_slice %227 {offsets = [2, 0], sizes = [1, 256], strides = [1, 1]} : vector<3x256xf32> to vector<1x256xf32>
    %cst_95 = arith.constant dense<0.000000e+00> : vector<64xf32>
    %237 = vector.multi_reduction <add>, %234, %cst_95 [1] : vector<64x256xf32> to vector<64xf32>
    %238 = vector.shape_cast %237 : vector<64xf32> to vector<64x1xf32>
    %cst_96 = arith.constant 2.560000e+02 : f32
    %239 = vector.broadcast %cst_96 : f32 to vector<64x1xf32>
    %240 = arith.divf %238, %239 : vector<64x1xf32>
    %241 = vector.broadcast %240 : vector<64x1xf32> to vector<64x256xf32>
    %242 = arith.subf %234, %241 : vector<64x256xf32>
    %243 = arith.mulf %242, %242 : vector<64x256xf32>
    %cst_97 = arith.constant dense<0.000000e+00> : vector<64xf32>
    %244 = vector.multi_reduction <add>, %243, %cst_97 [1] : vector<64x256xf32> to vector<64xf32>
    %245 = vector.shape_cast %244 : vector<64xf32> to vector<64x1xf32>
    %cst_98 = arith.constant 2.560000e+02 : f32
    %246 = vector.broadcast %cst_98 : f32 to vector<64x1xf32>
    %247 = arith.divf %245, %246 : vector<64x1xf32>
    %248 = vector.broadcast %240 : vector<64x1xf32> to vector<64x256xf32>
    %249 = arith.subf %234, %248 : vector<64x256xf32>
    %cst_99 = arith.constant 9.99999974E-6 : f32
    %250 = vector.broadcast %cst_99 : f32 to vector<64x1xf32>
    %251 = arith.addf %247, %250 : vector<64x1xf32>
    %252 = math.rsqrt %251 : vector<64x1xf32>
    %253 = vector.broadcast %252 : vector<64x1xf32> to vector<64x256xf32>
    %254 = arith.mulf %249, %253 : vector<64x256xf32>
    %255 = vector.broadcast %235 : vector<1x256xf32> to vector<64x256xf32>
    %256 = arith.mulf %254, %255 : vector<64x256xf32>
    %257 = vector.broadcast %236 : vector<1x256xf32> to vector<64x256xf32>
    %258 = arith.addf %256, %257 : vector<64x256xf32>
    %cst_100 = arith.constant 0.000000e+00 : f32
    %259 = vector.broadcast %cst_100 : f32 to vector<64x256xf32>
    %260 = arith.maximumf %258, %259 : vector<64x256xf32>
    %c2_101 = arith.constant 2 : index
    %c0_102 = arith.constant 0 : index
    %c0_103 = arith.constant 0 : index
    %261 = vector.load %arg5[%c2_101, %c0_102, %c0_103] : memref<3x256x128xbf16, #tpu.memory_space<vmem>>, vector<1x256x128xbf16>
    %262 = vector.shape_cast %261 : vector<1x256x128xbf16> to vector<256x128xbf16>
    %263 = arith.truncf %260 : vector<64x256xf32> to vector<64x256xbf16>
    %cst_104 = arith.constant dense<0.000000e+00> : vector<64x128xf32>
    %264 = tpu.matmul %263, %262, %cst_104 {dimension_numbers = #tpu.dot_dimension_numbers<[1], [0], [0], [1], [0, 0, 1, 1], [], []>} : vector<64x256xbf16>, vector<256x128xbf16>, vector<64x128xf32> -> vector<64x128xf32>
    %c2_105 = arith.constant 2 : index
    %c0_106 = arith.constant 0 : index
    %c0_107 = arith.constant 0 : index
    %265 = vector.load %arg7[%c2_105, %c0_106, %c0_107] : memref<3x3x128xf32, #tpu.memory_space<vmem>>, vector<1x3x128xf32>
    %266 = vector.shape_cast %265 : vector<1x3x128xf32> to vector<3x128xf32>
    %267 = vector.extract_strided_slice %266 {offsets = [0, 0], sizes = [1, 128], strides = [1, 1]} : vector<3x128xf32> to vector<1x128xf32>
    %268 = vector.broadcast %267 : vector<1x128xf32> to vector<64x128xf32>
    %269 = arith.addf %264, %268 : vector<64x128xf32>
    %c2_108 = arith.constant 2 : index
    %c0_109 = arith.constant 0 : index
    %c0_110 = arith.constant 0 : index
    %270 = vector.load %arg7[%c2_108, %c0_109, %c0_110] : memref<3x3x128xf32, #tpu.memory_space<vmem>>, vector<1x3x128xf32>
    %271 = vector.shape_cast %270 : vector<1x3x128xf32> to vector<3x128xf32>
    %272 = vector.extract_strided_slice %271 {offsets = [1, 0], sizes = [1, 128], strides = [1, 1]} : vector<3x128xf32> to vector<1x128xf32>
    %273 = vector.extract_strided_slice %271 {offsets = [2, 0], sizes = [1, 128], strides = [1, 1]} : vector<3x128xf32> to vector<1x128xf32>
    %cst_111 = arith.constant dense<0.000000e+00> : vector<64xf32>
    %274 = vector.multi_reduction <add>, %269, %cst_111 [1] : vector<64x128xf32> to vector<64xf32>
    %275 = vector.shape_cast %274 : vector<64xf32> to vector<64x1xf32>
    %cst_112 = arith.constant 1.280000e+02 : f32
    %276 = vector.broadcast %cst_112 : f32 to vector<64x1xf32>
    %277 = arith.divf %275, %276 : vector<64x1xf32>
    %278 = vector.broadcast %277 : vector<64x1xf32> to vector<64x128xf32>
    %279 = arith.subf %269, %278 : vector<64x128xf32>
    %280 = arith.mulf %279, %279 : vector<64x128xf32>
    %cst_113 = arith.constant dense<0.000000e+00> : vector<64xf32>
    %281 = vector.multi_reduction <add>, %280, %cst_113 [1] : vector<64x128xf32> to vector<64xf32>
    %282 = vector.shape_cast %281 : vector<64xf32> to vector<64x1xf32>
    %cst_114 = arith.constant 1.280000e+02 : f32
    %283 = vector.broadcast %cst_114 : f32 to vector<64x1xf32>
    %284 = arith.divf %282, %283 : vector<64x1xf32>
    %285 = vector.broadcast %277 : vector<64x1xf32> to vector<64x128xf32>
    %286 = arith.subf %269, %285 : vector<64x128xf32>
    %cst_115 = arith.constant 9.99999974E-6 : f32
    %287 = vector.broadcast %cst_115 : f32 to vector<64x1xf32>
    %288 = arith.addf %284, %287 : vector<64x1xf32>
    %289 = math.rsqrt %288 : vector<64x1xf32>
    %290 = vector.broadcast %289 : vector<64x1xf32> to vector<64x128xf32>
    %291 = arith.mulf %286, %290 : vector<64x128xf32>
    %292 = vector.broadcast %272 : vector<1x128xf32> to vector<64x128xf32>
    %293 = arith.mulf %291, %292 : vector<64x128xf32>
    %294 = vector.broadcast %273 : vector<1x128xf32> to vector<64x128xf32>
    %295 = arith.addf %293, %294 : vector<64x128xf32>
    %cst_116 = arith.constant 0.000000e+00 : f32
    %296 = vector.broadcast %cst_116 : f32 to vector<64x128xf32>
    %297 = arith.maximumf %295, %296 : vector<64x128xf32>
    %298 = arith.addf %191, %297 : vector<64x128xf32>
    %c384 = arith.constant 384 : index
    %c0_117 = arith.constant 0 : index
    %299 = vector.load %arg9[%c384, %c0_117] : memref<512x128xbf16, #tpu.memory_space<vmem>>, vector<128x128xbf16>
    %300 = arith.truncf %298 : vector<64x128xf32> to vector<64x128xbf16>
    %cst_118 = arith.constant dense<0.000000e+00> : vector<64x128xf32>
    %301 = tpu.matmul %300, %299, %cst_118 {dimension_numbers = #tpu.dot_dimension_numbers<[1], [0], [0], [1], [0, 0, 1, 1], [], []>} : vector<64x128xbf16>, vector<128x128xbf16>, vector<64x128xf32> -> vector<64x128xf32>
    %302 = arith.addf %195, %301 : vector<64x128xf32>
    %c0_119 = arith.constant 0 : index
    %c0_120 = arith.constant 0 : index
    %303 = vector.load %arg10[%c0_119, %c0_120] : memref<1x128xf32, #tpu.memory_space<vmem>>, vector<1x128xf32>
    %304 = vector.broadcast %303 : vector<1x128xf32> to vector<64x128xf32>
    %305 = arith.addf %302, %304 : vector<64x128xf32>
    %cst_121 = arith.constant 0.000000e+00 : f32
    %306 = vector.broadcast %cst_121 : f32 to vector<64x128xf32>
    %307 = arith.maximumf %305, %306 : vector<64x128xf32>
    %308 = arith.truncf %307 : vector<64x128xf32> to vector<64x128xbf16>
    %c0_122 = arith.constant 0 : index
    %c0_123 = arith.constant 0 : index
    %309 = vector.load %arg11[%c0_122, %c0_123] : memref<128x256xbf16, #tpu.memory_space<vmem>>, vector<128x256xbf16>
    %cst_124 = arith.constant dense<0.000000e+00> : vector<64x256xf32>
    %310 = tpu.matmul %308, %309, %cst_124 {dimension_numbers = #tpu.dot_dimension_numbers<[1], [0], [0], [1], [0, 0, 1, 1], [], []>} : vector<64x128xbf16>, vector<128x256xbf16>, vector<64x256xf32> -> vector<64x256xf32>
    %c0_125 = arith.constant 0 : index
    %c0_126 = arith.constant 0 : index
    %311 = vector.load %arg12[%c0_125, %c0_126] : memref<1x256xf32, #tpu.memory_space<vmem>>, vector<1x256xf32>
    %312 = vector.broadcast %311 : vector<1x256xf32> to vector<64x256xf32>
    %313 = arith.addf %310, %312 : vector<64x256xf32>
    %314 = vector.extract_strided_slice %313 {offsets = [0, 0], sizes = [64, 128], strides = [1, 1]} : vector<64x256xf32> to vector<64x128xf32>
    %315 = math.tanh %314 : vector<64x128xf32>
    %316 = vector.extract_strided_slice %313 {offsets = [0, 128], sizes = [64, 128], strides = [1, 1]} : vector<64x256xf32> to vector<64x128xf32>
    %317 = arith.negf %316 : vector<64x128xf32>
    %318 = math.exp %317 : vector<64x128xf32>
    %cst_127 = arith.constant 1.000000e+00 : f32
    %319 = vector.broadcast %cst_127 : f32 to vector<64x128xf32>
    %320 = arith.addf %319, %318 : vector<64x128xf32>
    %321 = arith.divf %319, %320 : vector<64x128xf32>
    %322 = arith.mulf %315, %321 : vector<64x128xf32>
    %c0_128 = arith.constant 0 : index
    %c0_129 = arith.constant 0 : index
    %323 = vector.load %arg13[%c0_128, %c0_129] : memref<1x128xf32, #tpu.memory_space<vmem>>, vector<1x128xf32>
    %324 = vector.broadcast %323 : vector<1x128xf32> to vector<64x128xf32>
    %325 = arith.mulf %322, %324 : vector<64x128xf32>
    %cst_130 = arith.constant dense<0.000000e+00> : vector<64xf32>
    %326 = vector.multi_reduction <add>, %325, %cst_130 [1] : vector<64x128xf32> to vector<64xf32>
    %327 = vector.shape_cast %326 : vector<64xf32> to vector<64x1xf32>
    %c0_131 = arith.constant 0 : index
    %c0_132 = arith.constant 0 : index
    %328 = vector.load %arg14[%c0_131, %c0_132] : memref<1x1xf32, #tpu.memory_space<vmem>>, vector<1x1xf32>
    %329 = vector.broadcast %328 : vector<1x1xf32> to vector<64x1xf32>
    %330 = arith.addf %327, %329 : vector<64x1xf32>
    %331 = vector.shape_cast %330 : vector<64x1xf32> to vector<1x64x1xf32>
    %cst_133 = arith.constant dense<0xFF800000> : vector<1xf32>
    %332 = vector.multi_reduction <maximumf>, %331, %cst_133 [1, 2] : vector<1x64x1xf32> to vector<1xf32>
    %333 = vector.shape_cast %332 : vector<1xf32> to vector<1x1x1xf32>
    %334 = vector.extract %333[0, 0, 0] : f32 from vector<1x1x1xf32>
    %335 = vector.broadcast %334 : f32 to vector<64x1xf32>
    %336 = arith.subf %330, %335 : vector<64x1xf32>
    %337 = math.exp %336 : vector<64x1xf32>
    %338 = vector.shape_cast %337 : vector<64x1xf32> to vector<1x64x1xf32>
    %cst_134 = arith.constant dense<0.000000e+00> : vector<1xf32>
    %339 = vector.multi_reduction <add>, %338, %cst_134 [1, 2] : vector<1x64x1xf32> to vector<1xf32>
    %340 = vector.shape_cast %339 : vector<1xf32> to vector<1x1x1xf32>
    %341 = vector.extract %340[0, 0, 0] : f32 from vector<1x1x1xf32>
    %cst_135 = arith.constant 1.000000e+00 : bf16
    %342 = vector.broadcast %cst_135 : bf16 to vector<1x64xbf16>
    %343 = arith.truncf %337 : vector<64x1xf32> to vector<64x1xbf16>
    %344 = vector.broadcast %343 : vector<64x1xbf16> to vector<64x128xbf16>
    %345 = arith.mulf %344, %308 : vector<64x128xbf16>
    %cst_136 = arith.constant dense<0.000000e+00> : vector<1x128xf32>
    %346 = tpu.matmul %342, %345, %cst_136 {dimension_numbers = #tpu.dot_dimension_numbers<[1], [0], [0], [1], [0, 0, 1, 1], [], []>} : vector<1x64xbf16>, vector<64x128xbf16>, vector<1x128xf32> -> vector<1x128xf32>
    %347 = vector.broadcast %341 : f32 to vector<1x128xf32>
    %348 = arith.divf %346, %347 : vector<1x128xf32>
    %c0_137 = arith.constant 0 : index
    %c0_138 = arith.constant 0 : index
    %349 = vector.load %arg15[%c0_137, %c0_138] : memref<128x4xbf16, #tpu.memory_space<vmem>>, vector<128x4xbf16>
    %350 = arith.truncf %348 : vector<1x128xf32> to vector<1x128xbf16>
    %cst_139 = arith.constant dense<0.000000e+00> : vector<1x4xf32>
    %351 = tpu.matmul %350, %349, %cst_139 {dimension_numbers = #tpu.dot_dimension_numbers<[1], [0], [0], [1], [0, 0, 1, 1], [], []>} : vector<1x128xbf16>, vector<128x4xbf16>, vector<1x4xf32> -> vector<1x4xf32>
    %c0_140 = arith.constant 0 : index
    %c0_141 = arith.constant 0 : index
    %352 = vector.load %arg16[%c0_140, %c0_141] : memref<1x4xf32, #tpu.memory_space<vmem>>, vector<1x4xf32>
    %353 = arith.addf %351, %352 : vector<1x4xf32>
    %c0_142 = arith.constant 0 : index
    %c0_143 = arith.constant 0 : index
    %354 = vector.load %arg17[%c0_142, %c0_143] : memref<1x4xf32, #tpu.memory_space<vmem>>, vector<1x4xf32>
    tpu.vector_store %arg17[%c0_142, %c0_143], %353 {strides = array<i32>} : memref<1x4xf32, #tpu.memory_space<vmem>>, vector<1x4xf32>,
    return
  }
}

</mosaic_0001>

<bundles_post_ra>
// kernel: tpu_custom_call.1
= control target key start
LH: loop header
LB: loop body
LE: loop exit
PB: predicated region body
PF: predicated region fallthrough
CT: control target
= control target key end

     0   :  { %s6757_s0 = inlined_call_operand.vmem [shape: f32[64,64], index: 0, kind: input, shape index: {}]   ;;  %s6758_s1 = inlined_call_operand.hbm [shape: bf16[64,64], index: 1, kind: input, shape index: {}]   ;;  %s6759_s2 = inlined_call_operand.hbm [shape: bf16[64,128], index: 2, kind: input, shape index: {}]   ;;  %s6760_s3 = inlined_call_operand.hbm [shape: f32[1,128], index: 3, kind: input, shape index: {}]   ;;  %s6761_s4 = inlined_call_operand.hbm [shape: bf16[3,128,256], index: 4, kind: input, shape index: {}]   ;;  %s6762_s5 = inlined_call_operand.hbm [shape: bf16[3,256,128], index: 5, kind: input, shape index: {}]   ;;  %s6763_s6 = inlined_call_operand.vmem [shape: f32[3,3,256], index: 6, kind: input, shape index: {}]   ;;  %s6764_s7 = inlined_call_operand.hbm [shape: f32[3,3,128], index: 7, kind: input, shape index: {}]   ;;  %s6765_s8 = inlined_call_operand.vmem [shape: f32[3], index: 8, kind: input, shape index: {}]   ;;  %s6766_s9 = inlined_call_operand.hbm [shape: bf16[512,128], index: 9, kind: input, shape index: {}]   ;;  %s6767_s10 = inlined_call_operand.vmem [shape: f32[1,128], index: 10, kind: input, shape index: {}]   ;;  %s6768_s11 = inlined_call_operand.hbm [shape: bf16[128,256], index: 11, kind: input, shape index: {}]   ;;  %s6769_s12 = inlined_call_operand.vmem [shape: f32[1,256], index: 12, kind: input, shape index: {}]   ;;  %s6770_s13 = inlined_call_operand.vmem [shape: f32[1,128], index: 13, kind: input, shape index: {}]   ;;  %s6771_s14 = inlined_call_operand.<no memory space> [shape: f32[1,1], index: 14, kind: input, shape index: {}]   ;;  %s6772_s15 = inlined_call_operand.vmem [shape: bf16[128,4], index: 15, kind: input, shape index: {}]   ;;  %s6773_s16 = inlined_call_operand.vmem [shape: f32[1,4], index: 16, kind: input, shape index: {}]   ;;  %s6774_s17 = inlined_call_operand.hbm [shape: f32[1,4], index: 17, kind: output, shape index: {}]  }
   0x1   :  { %6779 = sst [smem:[#allocation28_spill]] %s6757_s0  ;;  %v22_v0 = vstv %s6771_s14 }
   0x2   :  { %6780 = sst [smem:[#allocation29_spill]] %s6758_s1  ;;  %23 = vst [vmem:[#allocation2] sm:$0x1] %v22_v0 }
   0x3   :  { %24 = vsyncpa [#allocation4], 0 }
   0x4   :  { %25 = vsyncpa [#allocation8], 0 }
   0x5   :  { %26 = vsyncpa [#allocation11], 0 }
   0x6   :  { %27 = vsyncpa [#allocation14], 0 }
   0x7   :  { %28 = vsyncpa [#allocation6], 0 }
   0x8   :  { %29 = vsyncpa [#allocation18], 0 }
   0x9   :  { %30 = vsyncpa [#allocation5], 0  ;;  %s5434_s26 = smov [#allocation7]   ;;  %s5435_s28 = smov [#allocation10]  }
   0xa   :  { %s50_s27 = sshll.u32 %s5434_s26, 4  ;;  %s72_s29 = sshll.u32 %s5435_s28, 4  ;;  %s51_s27 = int_to_ptr.vmem [resolvable:$true] %s50_s27  ;;  %s5545_s29 = int_to_ptr.vmem [resolvable:$true] %s72_s29 }
   0xb   :  { %s5208_s18 = scalar_lea.hbm %s6759_s2, 512 }
   0xc   :  { %p5209_p0 = scmp.ne.s32.totalorder %s6759_s2, %s5208_s18  ;;  %p5212_p1 = scmp.lt.u32.totalorder %s5208_s18, %s6759_s2 }
   0xe   :  { %p5214_p2 = pnand %p5212_p1, %p5209_p0 }
  0x10   :  { %5217 = shalt.err (!%p5214_p2)
}
  0x11   :  { %s5218_s21 = scalar_lea.vmem %s51_s27, 512  ;;  %p5223_p4 = scmp.lt.s32.totalorder %s51_s27, %s51_s27 }
  0x12   :  { %p5219_p3 = scmp.ne.s32.totalorder %s51_s27, %s5218_s21  ;;  %p5224_p5 = scmp.lt.s32.totalorder %s5218_s21, %s5218_s21 }
  0x14   :  { %p5225_p6 = por %p5224_p5, %p5223_p4 }
  0x16   :  { %p5226_p7 = pnand %p5225_p6, %p5219_p3 }
  0x18   :  { %5229 = shalt.err (!%p5226_p7)
}
  0x19   :  { %s6777_s22 = smov 64   ;;  %s5437_s23 = smov 4  }
  0x1a   :  { %56 = dma.hbm_to_vmem [thread:$0]  %s6759_s2, 512, %s51_s27, [#allocation8], %s6777_s22, %s6777_s22, %s5437_s23  }
  0x1b   :  { %s5230_s0 = scalar_lea.hbm %s6761_s4, 6144 }
  0x1c   :  { %p5231_p8 = scmp.ne.s32.totalorder %s6761_s4, %s5230_s0  ;;  %p5234_p9 = scmp.lt.u32.totalorder %s5230_s0, %s6761_s4 }
  0x1e   :  { %p5236_p10 = pnand %p5234_p9, %p5231_p8 }
  0x20   :  { %5239 = shalt.err (!%p5236_p10)
}
  0x21   :  { %s5240_s1 = scalar_lea.vmem %s5545_s29, 6144  ;;  %p5245_p12 = scmp.lt.s32.totalorder %s5545_s29, %s5545_s29 }
  0x22   :  { %p5241_p11 = scmp.ne.s32.totalorder %s5545_s29, %s5240_s1  ;;  %p5246_p13 = scmp.lt.s32.totalorder %s5240_s1, %s5240_s1 }
  0x24   :  { %p5247_p0 = por %p5246_p13, %p5245_p12 }
  0x26   :  { %p5248_p1 = pnand %p5247_p0, %p5241_p11 }
  0x28   :  { %5251 = shalt.err (!%p5248_p1)
}
  0x29   :  { %s5438_s2 = smov 128   ;;  %s5439_s27 = smov 8  }
  0x2a   :  { %78 = dma.hbm_to_vmem [thread:$0]  %s6761_s4, 6144, %s5545_s29, [#allocation11], %s5438_s2, %s5438_s2, %s5439_s27  }
  0x2b   :  { %s5440_s24 = smov [#allocation13]   ;;  %s5441_s26 = smov [#allocation3]  }
  0x2c   :  { %s98_s25 = sshll.u32 %s5440_s24, 4  ;;  %s38_s28 = sshll.u32 %s5441_s26, 4  ;;  %s99_s25 = int_to_ptr.vmem [resolvable:$true] %s98_s25  ;;  %s5582_s28 = int_to_ptr.vmem [resolvable:$true] %s38_s28 }
  0x2d   :  { %s5252_s18 = scalar_lea.hbm %s6764_s7, 192 }
  0x2e   :  { %p5253_p2 = scmp.ne.s32.totalorder %s6764_s7, %s5252_s18  ;;  %p5256_p3 = scmp.lt.u32.totalorder %s5252_s18, %s6764_s7 }
  0x30   :  { %p5258_p4 = pnand %p5256_p3, %p5253_p2 }
  0x32   :  { %5261 = shalt.err (!%p5258_p4)
}
  0x33   :  { %s5262_s4 = scalar_lea.vmem %s99_s25, 192  ;;  %p5267_p6 = scmp.lt.s32.totalorder %s99_s25, %s99_s25 }
  0x34   :  { %p5263_p5 = scmp.ne.s32.totalorder %s99_s25, %s5262_s4  ;;  %p5268_p7 = scmp.lt.s32.totalorder %s5262_s4, %s5262_s4 }
  0x36   :  { %p5269_p8 = por %p5268_p7, %p5267_p6 }
  0x38   :  { %p5270_p9 = pnand %p5269_p8, %p5263_p5 }
  0x3a   :  { %5273 = shalt.err (!%p5270_p9)
}
  0x3b   :  { %s6781_s29 = smov 64   ;;  %s6782_s22 = sld [smem:[#allocation29_spill]] }
  0x3c   :  { %104 = dma.hbm_to_vmem [thread:$0]  %s6764_s7, 192, %s99_s25, [#allocation14], %s6781_s29, %s6781_s29, %s5437_s23  }
  0x41   :  { %s5274_s0 = scalar_lea.hbm %s6782_s22, 512 }
  0x42   :  { %p5275_p10 = scmp.ne.s32.totalorder %s6782_s22, %s5274_s0  ;;  %p5278_p11 = scmp.lt.u32.totalorder %s5274_s0, %s6782_s22 }
  0x44   :  { %p5280_p12 = pnand %p5278_p11, %p5275_p10 }
  0x46   :  { %5283 = shalt.err (!%p5280_p12)
}
  0x47   :  { %s5284_s1 = scalar_lea.vmem %s5582_s28, 512  ;;  %p5289_p0 = scmp.lt.s32.totalorder %s5582_s28, %s5582_s28 }
  0x48   :  { %p5285_p13 = scmp.ne.s32.totalorder %s5582_s28, %s5284_s1  ;;  %p5290_p1 = scmp.lt.s32.totalorder %s5284_s1, %s5284_s1 }
  0x4a   :  { %p5291_p2 = por %p5290_p1, %p5289_p0 }
  0x4c   :  { %p5292_p3 = pnand %p5291_p2, %p5285_p13 }
  0x4e   :  { %5295 = shalt.err (!%p5292_p3)
}
  0x4f   :  { %44 = dma.hbm_to_vmem [thread:$0]  %s6782_s22, 512, %s5582_s28, [#allocation4], %s6781_s29, %s6781_s29, %s5437_s23  }
  0x50   :  { %s5442_s4 = smov [#allocation9]   ;;  %s5443_s21 = smov [#allocation12]  }
  0x51   :  { %s63_s20 = sshll.u32 %s5442_s4, 4  ;;  %s84_s24 = sshll.u32 %s5443_s21, 4  ;;  %s64_s20 = int_to_ptr.vmem [resolvable:$true] %s63_s20  ;;  %s5619_s24 = int_to_ptr.vmem [resolvable:$true] %s84_s24 }
  0x52   :  { %s5296_s30 = scalar_lea.hbm %s6760_s3, 16 }
  0x53   :  { %p5297_p4 = scmp.ne.s32.totalorder %s6760_s3, %s5296_s30  ;;  %p5300_p5 = scmp.lt.u32.totalorder %s5296_s30, %s6760_s3 }
  0x55   :  { %p5302_p6 = pnand %p5300_p5, %p5297_p4 }
  0x57   :  { %5305 = shalt.err (!%p5302_p6)
}
  0x58   :  { %s5306_s28 = scalar_lea.vmem %s64_s20, 16  ;;  %s5310_s22 = scalar_lea.vmem %s64_s20, 32 }
  0x59   :  { %p5307_p7 = scmp.ne.s32.totalorder %s64_s20, %s5306_s28  ;;  %p5311_p8 = scmp.lt.s32.totalorder %s64_s20, %s64_s20 }
  0x5a   :  { %p5312_p9 = scmp.lt.s32.totalorder %s5310_s22, %s5306_s28 }
  0x5c   :  { %p5313_p10 = por %p5312_p9, %p5311_p8 }
  0x5e   :  { %p5314_p11 = pnand %p5313_p10, %p5307_p7 }
  0x60   :  { %5317 = shalt.err (!%p5314_p11)
}
  0x61   :  { %66 = dma.hbm_to_vmem [thread:$0]  %s6760_s3, 16, %s64_s20, [#allocation8]  }
  0x62   :  { %s5318_s26 = scalar_lea.hbm %s6762_s5, 6144 }
  0x63   :  { %p5319_p12 = scmp.ne.s32.totalorder %s6762_s5, %s5318_s26  ;;  %p5322_p13 = scmp.lt.u32.totalorder %s5318_s26, %s6762_s5 }
  0x65   :  { %p5324_p0 = pnand %p5322_p13, %p5319_p12 }
  0x67   :  { %5327 = shalt.err (!%p5324_p0)
}
  0x68   :  { %s5328_s19 = scalar_lea.vmem %s5619_s24, 6144  ;;  %p5333_p2 = scmp.lt.s32.totalorder %s5619_s24, %s5619_s24 }
  0x69   :  { %p5329_p1 = scmp.ne.s32.totalorder %s5619_s24, %s5328_s19  ;;  %p5334_p3 = scmp.lt.s32.totalorder %s5328_s19, %s5328_s19 }
  0x6b   :  { %p5335_p4 = por %p5334_p3, %p5333_p2 }
  0x6d   :  { %p5336_p5 = pnand %p5335_p4, %p5329_p1 }
  0x6f   :  { %5339 = shalt.err (!%p5336_p5)
}
  0x70   :  { %90 = dma.hbm_to_vmem [thread:$0]  %s6762_s5, 6144, %s5619_s24, [#allocation11], %s6781_s29, %s6781_s29, %s5437_s23  }
  0x71   :  { %s111_s22 = sshll.u32 %s6765_s8, 4  ;;  %s112_s22 = int_to_ptr.vmem [resolvable:$true] %s111_s22 }
  0x72   :  { %s5340_s7 = scalar_lea.vmem %s112_s22, 16  ;;  %p5345_p7 = scmp.lt.s32.totalorder %s112_s22, %s112_s22 }
  0x73   :  { %p5341_p6 = scmp.ne.s32.totalorder %s112_s22, %s5340_s7  ;;  %p5346_p8 = scmp.lt.s32.totalorder %s5340_s7, %s5340_s7 }
  0x75   :  { %p5347_p9 = por %p5346_p8, %p5345_p7 }
  0x77   :  { %p5348_p10 = pnand %p5347_p9, %p5341_p6 }
  0x79   :  { %5351 = shalt.err (!%p5348_p10)
}
  0x7a   :  { %s5444_s25 = smov [#allocation15]   ;;  %s5445_s4 = smov [#allocation16]  }
  0x7b   :  { %114 = dma.vmem_to_smem %s112_s22, 16, %s5444_s25, [#allocation6]  }
  0x7c   :  { %s120_s21 = sshll.u32 %s5445_s4, 4  ;;  %s5446_s26 = smov [#allocation17]   ;;  %s121_s21 = int_to_ptr.vmem [resolvable:$true] %s120_s21 }
  0x7d   :  { %s134_s0 = sshll.u32 %s5446_s26, 4  ;;  %s5352_s30 = scalar_lea.hbm %s6766_s9, 4096  ;;  %s135_s0 = int_to_ptr.vmem [resolvable:$true] %s134_s0 }
  0x7e   :  { %p5353_p11 = scmp.ne.s32.totalorder %s6766_s9, %s5352_s30  ;;  %p5356_p12 = scmp.lt.u32.totalorder %s5352_s30, %s6766_s9 }
  0x80   :  { %p5358_p13 = pnand %p5356_p12, %p5353_p11 }
  0x82   :  { %5361 = shalt.err (!%p5358_p13)
}
  0x83   :  { %s5362_s3 = scalar_lea.vmem %s121_s21, 4096  ;;  %p5367_p1 = scmp.lt.s32.totalorder %s121_s21, %s121_s21 }
  0x84   :  { %p5363_p0 = scmp.ne.s32.totalorder %s121_s21, %s5362_s3  ;;  %p5368_p2 = scmp.lt.s32.totalorder %s5362_s3, %s5362_s3 }
  0x86   :  { %p5369_p3 = por %p5368_p2, %p5367_p1 }
  0x88   :  { %p5370_p4 = pnand %p5369_p3, %p5363_p0 }
  0x8a   :  { %5373 = shalt.err (!%p5370_p4)
}
  0x8b   :  { %126 = dma.hbm_to_vmem [thread:$0]  %s6766_s9, 4096, %s121_s21, [#allocation14], %s6781_s29, %s6781_s29, %s5437_s23  }
  0x8c   :  { %s5374_s7 = scalar_lea.hbm %s6768_s11, 2048 }
  0x8d   :  { %p5375_p5 = scmp.ne.s32.totalorder %s6768_s11, %s5374_s7  ;;  %p5378_p6 = scmp.lt.u32.totalorder %s5374_s7, %s6768_s11 }
  0x8f   :  { %p5380_p7 = pnand %p5378_p6, %p5375_p5 }
  0x91   :  { %5383 = shalt.err (!%p5380_p7)
}
  0x92   :  { %s5384_s24 = scalar_lea.vmem %s135_s0, 2048  ;;  %p5389_p9 = scmp.lt.s32.totalorder %s135_s0, %s135_s0 }
  0x93   :  { %p5385_p8 = scmp.ne.s32.totalorder %s135_s0, %s5384_s24  ;;  %p5390_p10 = scmp.lt.s32.totalorder %s5384_s24, %s5384_s24 }
  0x95   :  { %p5391_p11 = por %p5390_p10, %p5389_p9 }
  0x97   :  { %p5392_p12 = pnand %p5391_p11, %p5385_p8 }
  0x99   :  { %5395 = shalt.err (!%p5392_p12)
}
  0x9a   :  { %140 = dma.hbm_to_vmem [thread:$0]  %s6768_s11, 2048, %s135_s0, [#allocation18], %s5438_s2, %s5438_s2, %s5439_s27  }
  0x9b   :  { %5418 = dma.done.wait [#allocation4], 512  }
  0x9c   :  { %5419 = vsyncadd [#allocation4], 4294966784 }
  0x9d   :  { %5420 = dma.done.wait [#allocation8], 528  }
  0x9e   :  { %5421 = vsyncadd [#allocation8], 4294966768 }
  0x9f   :  { %5422 = dma.done.wait [#allocation11], 12288  }
  0xa0   :  { %5423 = vsyncadd [#allocation11], 4294955008 }
  0xa1   :  { %5424 = dma.done.wait [#allocation14], 192  }
  0xa2   :  { %5425 = vsyncadd [#allocation14], 4294967104 }
  0xa3   :  { %5426 = dma.done.wait [#allocation6], 16  }
  0xa4   :  { %5427 = vsyncadd [#allocation6], 4294967280 }
  0xa5   :  { %5428 = dma.done.wait [#allocation14], 4096  }
  0xa6   :  { %5429 = vsyncadd [#allocation14], 4294963200 }
  0xa7   :  { %5430 = dma.done.wait [#allocation18], 2048  }
  0xa8   :  { %5431 = vsyncadd [#allocation18], 4294965248 }
  0xa9   :  { %178 = sfence }
  0xaa   :  { %v4766_v1 = vld [vmem:[#allocation7] sm:$0xff]   ;;  %v4767_v2 = vld [vmem:[#allocation7 + $0x8] sm:$0xff]   ;;  %v4768_v3 = vld [vmem:[#allocation7 + $0x10] sm:$0xff]   ;;  %s6783_s27 = sld [smem:[#allocation28_spill]]  ;;  %vm240_vm0 = vcmask 523264   ;;  %v5447_v17 = vmov 0  }
  0xab   :  { %4574 = vmatprep.subr.bf16.mxu1 %v4766_v1  ;;  %v4769_v7 = vld [vmem:[#allocation7 + $0x18] sm:$0xff]   ;;  %722 = vmatprep.mubr.bf16.mxu0 %v5447_v17  ;;  %v4774_v18 = vld [vmem:[#allocation10 + $0x4] ss:$8 sps:$4 sm:$0xff]   ;;  %v4776_v19 = vld [vmem:[#allocation10] ss:$8 sps:$4 sm:$0xff]   ;;  %s346_s25 = sld [smem:[#allocation15]] }
  0xac   :  { %4575 = vmatpush3.bf16.msra.mxu1 %v4766_v1  ;;  %4765 = vset.pattern.permute.xlu0 %v5447_v17  ;;  %v4777_v20 = vld [vmem:[#allocation10 + $0x14] ss:$8 sps:$4 sm:$0xff]   ;;  %v4779_v21 = vld [vmem:[#allocation10 + $0x10] ss:$8 sps:$4 sm:$0xff]   ;;  %s4256_s5 = sld [smem:[#allocation15 + $0x1]]  ;;  %s4302_s23 = sld [smem:[#allocation15 + $0x2]] }
  0xad   :  { %4576 = vmatprep.subr.bf16.mxu1 %v4767_v2  ;;  %4764 = vset.pattern.permute.xlu1 %v5447_v17  ;;  %v4191_v23 = vld [vmem:[#allocation9] ss:$0 sm:$0xff]  ;;  %s5451_s11 = smov [#allocation19]  }
  0xae   :  { %690 = vmatprep.subr.bf16.mxu0 %v4774_v18  ;;  %s4177_s2 = sshll.u32 %s5451_s11, 4  ;;  %s4178_s2 = int_to_ptr.vmem [resolvable:$true] %s4177_s2 }
  0xaf   :  { %691 = vmatpush1.bf16.msra.mxu0 %v4776_v19  ;;  %p5401_p0 = scmp.lt.s32.totalorder %s4178_s2, %s4178_s2 }
  0xb0   :  { %v189_v4 = vld [vmem:[%s6783_s27] sm:$0xff]  ;;  %v190_v5 = vld [vmem:[%s6783_s27 + $0x8] sm:$0xff]  ;;  %4577 = vmatpush3.bf16.msra.mxu1 %v4767_v2  ;;  %v191_v8 = vld [vmem:[%s6783_s27 + $0x10] sm:$0xff]  ;;  %692 = vmatprep.subr.bf16.mxu0 %v4777_v20 }
  0xb1   :  { %v205_v6 = vpack.c.bf16 %v190_v5, %v189_v4  ;;  %4578 = vmatprep.subr.bf16.mxu1 %v4768_v3  ;;  %v192_v9 = vld [vmem:[%s6783_s27 + $0x18] sm:$0xff]  ;;  %v193_v10 = vld [vmem:[%s6783_s27 + $0x20] sm:$0xff]  ;;  %v194_v11 = vld [vmem:[%s6783_s27 + $0x28] sm:$0xff]  ;;  %v355_v50 = vstv %s346_s25 }
  0xb2   :  { %v206_v12 = vpack.c.bf16 %v192_v9, %v191_v8  ;;  %v207_v13 = vpack.c.bf16 %v194_v11, %v193_v10  ;;  %v195_v14 = vld [vmem:[%s6783_s27 + $0x30] sm:$0xff]  ;;  %v196_v15 = vld [vmem:[%s6783_s27 + $0x38] sm:$0xff] }
  0xb3   :  { %4582 = vmatprep.mubr.msk.bf16.mxu1 %vm240_vm0, %v205_v6  ;;  %v208_v16 = vpack.c.bf16 %v196_v15, %v195_v14  ;;  %693 = vmatpush1.bf16.msra.mxu0 %v4779_v21 }
  0xb4   :  { %4579 = vmatpush3.bf16.msra.mxu1 %v4768_v3 }
  0xb5   :  { %4580 = vmatprep.subr.bf16.mxu1 %v4769_v7 }
  0xb8   :  { %4581 = vmatpush3.bf16.msra.mxu1 %v4769_v7 }
  0xbb   :  { %4583 = vmatmul.mubr.msk.bf16.vlgmr.msra.gmra.mrb[0].mxu1 %vm240_vm0, %v206_v12 }
  0xbc   :  { %4586 = vmatprep.mubr.msk.bf16.mxu1 %vm240_vm0, %v207_v13 }
  0xc3   :  { %4587 = vmatmul.mubr.msk.bf16.gmra.mrb[4].mxu1 %vm240_vm0, %v208_v16 }
  0xc4   :  { %481 = vmatprep.mubr.bf16.mxu1 %v5447_v17 }
 0x18e   :  { %v4584_v22 = vpop.f32.mrb[0].mxu1 }
 0x18f   :  { %v287_v24 = vpop.f32.mrb[1].mxu1  ;;  %v296_v27 = vadd.f32 %v4584_v22, %v4191_v23 }
 0x190   :  { %v4585_v25 = vpop.f32.mrb[2].mxu1  ;;  %v288_v28 = vadd.f32 %v4191_v23, %v287_v24 }
 0x191   :  { %v290_v26 = vpop.f32.mrb[3].mxu1  ;;  %v299_v29 = vadd.f32 %v4585_v25, %v4191_v23  ;;  %v5718_v31 = vmax.f32 %v296_v27, 0.0 }
 0x192   :  { %v291_v30 = vadd.f32 %v4191_v23, %v290_v26  ;;  %v5720_v32 = vmax.f32 %v288_v28, 0.0 }
 0x193   :  { %v5722_v34 = vmax.f32 %v299_v29, 0.0  ;;  %v5729_v43 = vadd.f32 1e-07, %v5718_v31 }
 0x194   :  { %v5724_v37 = vmax.f32 %v291_v30, 0.0  ;;  %v347_v44 = vadd.f32 1e-07, %v5720_v32 }
 0x195   :  { %v5735_v47 = vadd.f32 1e-07, %v5722_v34  ;;  %v358_v58 = vmul.f32 %v355_v50, %v5729_v43 }
 0x196   :  { %v4588_v33 = vpop.f32.mrb[4].mxu1  ;;  %v348_v51 = vadd.f32 1e-07, %v5724_v37  ;;  %v356_v61 = vmul.f32 %v355_v50, %v347_v44 }
 0x197   :  { %v312_v35 = vadd.f32 %v4588_v33, %v4191_v23  ;;  %v303_v36 = vpop.f32.mrb[5].mxu1  ;;  %v359_v59 = vmul.f32 %v355_v50, %v5735_v47 }
 0x198   :  { %v304_v38 = vadd.f32 %v4191_v23, %v303_v36  ;;  %v4589_v39 = vpop.f32.mrb[6].mxu1  ;;  %v357_v62 = vmul.f32 %v355_v50, %v348_v51 }
 0x199   :  { %v5726_v40 = vmax.f32 %v312_v35, 0.0  ;;  %v315_v41 = vadd.f32 %v4589_v39, %v4191_v23  ;;  %v306_v42 = vpop.f32.mrb[7].mxu1 }
 0x19a   :  { %v5732_v45 = vmax.f32 %v304_v38, 0.0  ;;  %v307_v46 = vadd.f32 %v4191_v23, %v306_v42 }
 0x19b   :  { %v5738_v48 = vadd.f32 1e-07, %v5726_v40  ;;  %v5740_v49 = vmax.f32 %v315_v41, 0.0 }
 0x19c   :  { %v5744_v52 = vadd.f32 1e-07, %v5732_v45  ;;  %v5746_v53 = vmax.f32 %v307_v46, 0.0 }
 0x19d   :  { %v362_v54 = vmul.f32 %v355_v50, %v5738_v48  ;;  %v5750_v55 = vadd.f32 1e-07, %v5740_v49 }
 0x19e   :  { %v360_v56 = vmul.f32 %v355_v50, %v5744_v52  ;;  %v352_v57 = vadd.f32 1e-07, %v5746_v53 }
 0x19f   :  { %v363_v60 = vmul.f32 %v355_v50, %v5750_v55  ;;  %v366_v0 = vmax.f32 %v358_v58, %v362_v54 }
 0x1a0   :  { %v361_v63 = vmul.f32 %v355_v50, %v352_v57  ;;  %v364_v2 = vmax.f32 %v356_v61, %v360_v56 }
 0x1a1   :  { %v367_v1 = vmax.f32 %v359_v59, %v363_v60 }
 0x1a2   :  { %v365_v3 = vmax.f32 %v357_v62, %v361_v63 }
 0x1a3   :  { %v369_v4 = vmax.f32 %v366_v0, %v367_v1 }
 0x1a4   :  { %v368_v5 = vmax.f32 %v364_v2, %v365_v3  ;;  %v4770_v2 = vld [vmem:[#allocation3] sm:$0xff]  }
 0x1a5   :  { %v4782_v3 = vld [vmem:[#allocation10 + $0x20] ss:$8 sps:$4 sm:$0xff]  }
 0x1a6   :  { %v370_v6 = vmax.f32 %v368_v5, %v369_v4  ;;  %v4783_v4 = vld [vmem:[#allocation10 + $0x34] ss:$8 sps:$4 sm:$0xff]   ;;  %v4785_v5 = vld [vmem:[#allocation10 + $0x30] ss:$8 sps:$4 sm:$0xff]  }
 0x1a8   :  { %v371_v7 = vrot.slane %v370_v6, 4 }
 0x1aa   :  { %v372_v8 = vmax.f32 %v370_v6, %v371_v7  ;;  %v4786_v6 = vld [vmem:[#allocation10 + $0x44] ss:$8 sps:$4 sm:$0xff]   ;;  %v4788_v7 = vld [vmem:[#allocation10 + $0x40] ss:$8 sps:$4 sm:$0xff]  }
 0x1ac   :  { %v373_v9 = vrot.slane %v372_v8, 2 }
 0x1ae   :  { %v374_v10 = vmax.f32 %v372_v8, %v373_v9  ;;  %v4789_v8 = vld [vmem:[#allocation10 + $0x54] ss:$8 sps:$4 sm:$0xff]   ;;  %v4791_v9 = vld [vmem:[#allocation10 + $0x50] ss:$8 sps:$4 sm:$0xff]  }
 0x1b0   :  { %v375_v11 = vrot.slane %v374_v10, 1 }
 0x1b2   :  { %v376_v12 = vmax.f32 %v374_v10, %v375_v11  ;;  %v4792_v10 = vld [vmem:[#allocation10 + $0x64] ss:$8 sps:$4 sm:$0xff]   ;;  %v4794_v11 = vld [vmem:[#allocation10 + $0x60] ss:$8 sps:$4 sm:$0xff]  }
 0x1b4   :  { %v377_v13 = vsub.f32 %v356_v61, %v376_v12  ;;  %v378_v14 = vsub.f32 %v357_v62, %v376_v12  ;;  %v379_v15 = vsub.f32 %v358_v58, %v376_v12  ;;  %v382_v16 = vsub.f32 %v361_v63, %v376_v12 }
 0x1b5   :  { %v380_v18 = vsub.f32 %v359_v59, %v376_v12  ;;  %v381_v21 = vsub.f32 %v360_v56, %v376_v12  ;;  %v383_v25 = vsub.f32 %v362_v54, %v376_v12  ;;  %v384_v27 = vsub.f32 %v363_v60, %v376_v12  ;;  %v4795_v12 = vld [vmem:[#allocation10 + $0x74] ss:$8 sps:$4 sm:$0xff]  }
 0x1b6   :  { %v385_v19 = vmul.f32 1.442695, %v377_v13  ;;  %v387_v20 = vmul.f32 1.442695, %v378_v14  ;;  %v389_v22 = vmul.f32 1.442695, %v379_v15 }
 0x1b7   :  { %v391_v23 = vmul.f32 1.442695, %v380_v18  ;;  %v395_v24 = vmul.f32 1.442695, %v382_v16  ;;  %v393_v26 = vmul.f32 1.442695, %v381_v21 }
 0x1b8   :  { %4958 = vpow2.f32 %v385_v19  ;;  %v397_v28 = vmul.f32 1.442695, %v383_v25  ;;  %v399_v29 = vmul.f32 1.442695, %v384_v27  ;;  %v4797_v13 = vld [vmem:[#allocation10 + $0x70] ss:$8 sps:$4 sm:$0xff]  }
 0x1b9   :  { %4960 = vpow2.f32 %v387_v20 }
 0x1ba   :  { %4962 = vpow2.f32 %v389_v22 }
 0x1bb   :  { %4964 = vpow2.f32 %v391_v23 }
 0x1bc   :  { %4966 = vpow2.f32 %v395_v24 }
 0x1bd   :  { %4968 = vpow2.f32 %v393_v26 }
 0x1be   :  { %4970 = vpow2.f32 %v397_v28 }
 0x1bf   :  { %4972 = vpow2.f32 %v399_v29 }
 0x1c2   :  { %v4959_v30 = vpop.eup %4958 }
 0x1c3   :  { %v4961_v33 = vpop.eup %4960  ;;  %v401_v35 = vmul.f32 %v4959_v30, %v347_v44 }
 0x1c4   :  { %v4963_v36 = vpop.eup %4962  ;;  %v413_v38 = vpack.c.bf16 %v4961_v33, %v4959_v30  ;;  %v402_v39 = vmul.f32 %v4961_v33, %v348_v51 }
 0x1c5   :  { %v4965_v41 = vpop.eup %4964  ;;  %v403_v50 = vmul.f32 %v4963_v36, %v5729_v43 }
 0x1c6   :  { %v4967_v42 = vpop.eup %4966  ;;  %449 = vmatprep.subr.bf16.mxu1 %v413_v38  ;;  %v409_v46 = vpack.c.bf16 %v402_v39, %v401_v35  ;;  %v404_v54 = vmul.f32 %v4965_v41, %v5735_v47  ;;  %v414_v58 = vpack.c.bf16 %v4965_v41, %v4963_v36 }
 0x1c7   :  { %v4969_v56 = vpop.eup %4968  ;;  %v406_v60 = vmul.f32 %v4967_v42, %v352_v57  ;;  %v4772_v57 = vld [vmem:[#allocation3 + $0x10] sm:$0xff]  }
 0x1c8   :  { %450 = vmatpush1.bf16.msra.mxu1 %v409_v46  ;;  %v4971_v59 = vpop.eup %4970  ;;  %v410_v61 = vpack.c.bf16 %v404_v54, %v403_v50  ;;  %v405_v44 = vmul.f32 %v4969_v56, %v5744_v52  ;;  %v415_v63 = vpack.c.bf16 %v4967_v42, %v4969_v56  ;;  %v4771_v52 = vld [vmem:[#allocation3 + $0x8] sm:$0xff]  }
 0x1c9   :  { %451 = vmatprep.subr.bf16.mxu1 %v414_v58  ;;  %v4973_v62 = vpop.eup %4972  ;;  %v407_v0 = vmul.f32 %v4971_v59, %v5738_v48  ;;  %v4773_v48 = vld [vmem:[#allocation3 + $0x18] sm:$0xff]  }
 0x1ca   :  { %v411_v51 = vpack.c.bf16 %v406_v60, %v405_v44  ;;  %v408_v43 = vmul.f32 %v4973_v62, %v5750_v55  ;;  %v416_v1 = vpack.c.bf16 %v4973_v62, %v4971_v59  ;;  %v4780_v55 = vld [vmem:[#allocation10 + $0x24] ss:$8 sps:$4 sm:$0xff]  }
 0x1cb   :  { %694 = vmatprep.subr.bf16.mxu0 %v4780_v55 }
 0x1cc   :  { %452 = vmatpush1.bf16.msra.mxu1 %v410_v61  ;;  %v412_v47 = vpack.c.bf16 %v408_v43, %v407_v0  ;;  %695 = vmatpush1.bf16.msra.mxu0 %v4782_v3 }
 0x1cd   :  { %453 = vmatprep.subr.bf16.mxu1 %v415_v63  ;;  %696 = vmatprep.subr.bf16.mxu0 %v4783_v4 }
 0x1d0   :  { %454 = vmatpush1.bf16.msra.mxu1 %v411_v51  ;;  %697 = vmatpush1.bf16.msra.mxu0 %v4785_v5 }
 0x1d1   :  { %455 = vmatprep.subr.bf16.mxu1 %v416_v1  ;;  %698 = vmatprep.subr.bf16.mxu0 %v4786_v6 }
 0x1d4   :  { %456 = vmatpush1.bf16.msra.mxu1 %v412_v47  ;;  %699 = vmatpush1.bf16.msra.mxu0 %v4788_v7 }
 0x1d5   :  { %700 = vmatprep.subr.bf16.mxu0 %v4789_v8 }
 0x1d7   :  { %4204 = vmatmul.mubr.msk.bf16.vlgmr.msra.gmra.mrb[8].mxu1 %vm240_vm0, %v4770_v2 }
 0x1d8   :  { %491 = vmatprep.mubr.bf16.mxu1 %v5447_v17  ;;  %701 = vmatpush1.bf16.msra.mxu0 %v4791_v9 }
 0x1d9   :  { %702 = vmatprep.subr.bf16.mxu0 %v4792_v10 }
 0x1dc   :  { %703 = vmatpush1.bf16.msra.mxu0 %v4794_v11 }
 0x1dd   :  { %704 = vmatprep.subr.bf16.mxu0 %v4795_v12 }
 0x1df   :  { %4205 = vmatmul.mubr.msk.bf16.gmra.mrb[12].mxu1 %vm240_vm0, %v4771_v52 }
 0x1e0   :  { %501 = vmatprep.mubr.bf16.mxu1 %v5447_v17  ;;  %705 = vmatpush1.bf16.msra.mxu0 %v4797_v13 }
 0x1e7   :  { %4206 = vmatmul.mubr.msk.bf16.gmra.mrb[16].mxu1 %vm240_vm0, %v4772_v57 }
 0x1e8   :  { %511 = vmatprep.mubr.bf16.mxu1 %v5447_v17 }
 0x1ef   :  { %4207 = vmatmul.mubr.msk.bf16.gmra.mrb[20].mxu1 %vm240_vm0, %v4773_v48 }
 0x2aa   :  { %v483_v14 = vpop.f32.mrb[8].mxu1 }
 0x2ab   :  { %v485_v15 = vpop.f32.mrb[9].mxu1 }
 0x2ac   :  { %vm522_vm1 = vcmp.gt.f32.partialorder %v485_v15, 0.0  ;;  %v487_v16 = vpop.f32.mrb[10].mxu1 }
 0x2ad   :  { %v530_v18 = vsel %vm522_vm1, %v485_v15, 1.0  ;;  %v489_v19 = vpop.f32.mrb[11].mxu1 }
 0x2ae   :  { %4974 = vrcp.f32 %v530_v18  ;;  %vm523_vm2 = vcmp.gt.f32.partialorder %v489_v19, 0.0 }
 0x2af   :  { %v531_v20 = vsel %vm523_vm2, %v489_v19, 1.0 }
 0x2b0   :  { %4976 = vrcp.f32 %v531_v20  ;;  %v592_v20 = vlaneseq }
 0x2b2   :  { %v493_v21 = vpop.f32.mrb[12].mxu1 }
 0x2b3   :  { %v495_v22 = vpop.f32.mrb[13].mxu1 }
 0x2b4   :  { %vm524_vm3 = vcmp.gt.f32.partialorder %v495_v22, 0.0  ;;  %v497_v23 = vpop.f32.mrb[14].mxu1 }
 0x2b5   :  { %v532_v24 = vsel %vm524_vm3, %v495_v22, 1.0  ;;  %v499_v25 = vpop.f32.mrb[15].mxu1 }
 0x2b6   :  { %4978 = vrcp.f32 %v532_v24  ;;  %vm525_vm4 = vcmp.gt.f32.partialorder %v499_v25, 0.0 }
 0x2b7   :  { %v533_v26 = vsel %vm525_vm4, %v499_v25, 1.0 }
 0x2b8   :  { %v4975_v27 = vpop.eup %4974  ;;  %4980 = vrcp.f32 %v533_v26 }
 0x2b9   :  { %v546_v28 = vmul.f32 %v4975_v27, %v483_v14 }
 0x2ba   :  { %v4977_v29 = vpop.eup %4976  ;;  %v503_v30 = vpop.f32.mrb[16].mxu1 }
 0x2bb   :  { %v554_v33 = vsel %vm522_vm1, %v546_v28, 0.0  ;;  %v547_v35 = vmul.f32 %v4977_v29, %v487_v16  ;;  %v505_v36 = vpop.f32.mrb[17].mxu1 }
 0x2bc   :  { %vm526_vm5 = vcmp.gt.f32.partialorder %v505_v36, 0.0  ;;  %v507_v38 = vpop.f32.mrb[18].mxu1  ;;  %v562_v46 = vadd.f32 %v554_v33, %v5720_v32 }
 0x2bd   :  { %v555_v39 = vsel %vm523_vm2, %v547_v35, 0.0  ;;  %v534_v41 = vsel %vm526_vm5, %v505_v36, 1.0  ;;  %v509_v42 = vpop.f32.mrb[19].mxu1 }
 0x2be   :  { %v563_v50 = vadd.f32 %v555_v39, %v5724_v37  ;;  %4982 = vrcp.f32 %v534_v41  ;;  %vm527_vm6 = vcmp.gt.f32.partialorder %v509_v42, 0.0 }
 0x2bf   :  { %v535_v54 = vsel %vm527_vm6, %v509_v42, 1.0 }
 0x2c0   :  { %v4979_v56 = vpop.eup %4978  ;;  %4984 = vrcp.f32 %v535_v54  ;;  %v587_v58 = vpack.c.bf16 %v563_v50, %v562_v46 }
 0x2c1   :  { %v548_v59 = vmul.f32 %v4979_v56, %v493_v21  ;;  %v5796_v21 = vshrl.u32 %v592_v20, 7 }
 0x2c2   :  { %v4981_v60 = vpop.eup %4980  ;;  %v513_v61 = vpop.f32.mrb[20].mxu1  ;;  %723 = vmatmul.mubr.bf16.vlgmr.msra.gmra.mrb[0].mxu0 %v587_v58 }
 0x2c3   :  { %v556_v44 = vsel %vm524_vm3, %v548_v59, 0.0  ;;  %v549_v62 = vmul.f32 %v4981_v60, %v497_v23  ;;  %v515_v63 = vpop.f32.mrb[21].mxu1  ;;  %732 = vmatprep.mubr.bf16.mxu0 %v5447_v17  ;;  %v5799_v22 = vsub.s32 0, %v5796_v21  ;;  %v5804_v23 = vld [vmem:[%s6763_s6] sm:$0x77]  ;;  %v5807_v24 = vsub.s32 4, %v5796_v21 }
 0x2c4   :  { %vm528_vm7 = vcmp.gt.f32.partialorder %v515_v63, 0.0  ;;  %v517_v51 = vpop.f32.mrb[22].mxu1  ;;  %v564_v47 = vadd.f32 %v556_v44, %v5718_v31 }
 0x2c5   :  { %v557_v0 = vsel %vm525_vm4, %v549_v62, 0.0  ;;  %v536_v43 = vsel %vm528_vm7, %v515_v63, 1.0  ;;  %v519_v1 = vpop.f32.mrb[23].mxu1  ;;  %v595_v25 = vrot.slane %v5804_v23, %v5799_v22  ;;  %v599_v26 = vrot.slane %v5804_v23, %v5807_v24 }
 0x2c6   :  { %v565_v2 = vadd.f32 %v557_v0, %v5722_v34  ;;  %4986 = vrcp.f32 %v536_v43  ;;  %vm529_vm8 = vcmp.gt.f32.partialorder %v519_v1, 0.0 }
 0x2c7   :  { %v537_v52 = vsel %vm529_vm8, %v519_v1, 1.0  ;;  %v605_v27 = vrot.slane %v595_v25, %v5799_v22  ;;  %v609_v28 = vrot.slane %v599_v26, %v5799_v22 }
 0x2c8   :  { %v4983_v57 = vpop.eup %4982  ;;  %4988 = vrcp.f32 %v537_v52  ;;  %v588_v48 = vpack.c.bf16 %v565_v2, %v564_v47 }
 0x2c9   :  { %v550_v55 = vmul.f32 %v4983_v57, %v503_v30 }
 0x2ca   :  { %v4985_v3 = vpop.eup %4984  ;;  %733 = vmatmul.mubr.bf16.gmra.mrb[4].mxu0 %v588_v48 }
 0x2cb   :  { %v558_v4 = vsel %vm526_vm5, %v550_v55, 0.0  ;;  %v551_v5 = vmul.f32 %v4985_v3, %v507_v38  ;;  %742 = vmatprep.mubr.bf16.mxu0 %v5447_v17 }
 0x2cc   :  { %v566_v7 = vadd.f32 %v558_v4, %v5732_v45 }
 0x2cd   :  { %v559_v6 = vsel %vm527_vm6, %v551_v5, 0.0 }
 0x2ce   :  { %v567_v8 = vadd.f32 %v559_v6, %v5746_v53 }
 0x2d0   :  { %v4987_v9 = vpop.eup %4986  ;;  %v589_v10 = vpack.c.bf16 %v567_v8, %v566_v7 }
 0x2d1   :  { %v552_v11 = vmul.f32 %v4987_v9, %v513_v61 }
 0x2d2   :  { %v4989_v12 = vpop.eup %4988  ;;  %743 = vmatmul.mubr.bf16.gmra.mrb[8].mxu0 %v589_v10 }
 0x2d3   :  { %v560_v13 = vsel %vm528_vm7, %v552_v11, 0.0  ;;  %v553_v14 = vmul.f32 %v4989_v12, %v517_v51  ;;  %752 = vmatprep.mubr.bf16.mxu0 %v5447_v17 }
 0x2d4   :  { %v568_v16 = vadd.f32 %v560_v13, %v5726_v40  ;;  %v4798_v13 = vld [vmem:[#allocation12 + $0x40] sm:$0xff]  }
 0x2d5   :  { %v561_v15 = vsel %vm529_vm8, %v553_v14, 0.0  ;;  %v4799_v14 = vld [vmem:[#allocation12] sm:$0xff]   ;;  %4392 = vmatprep.subr.bf16.mxu1 %v4798_v13 }
 0x2d6   :  { %v569_v18 = vadd.f32 %v561_v15, %v5740_v49  ;;  %4393 = vmatpush3.bf16.msra.mxu1 %v4799_v14 }
 0x2d8   :  { %v590_v19 = vpack.c.bf16 %v569_v18, %v568_v16 }
 0x2da   :  { %753 = vmatmul.mubr.bf16.gmra.mrb[12].mxu0 %v590_v19 }
 0x395   :  { %v724_v29 = vpop.f32.mrb[0].mxu0 }
 0x396   :  { %v725_v30 = vadd.f32 %v724_v29, %v605_v27  ;;  %v726_v33 = vpop.f32.mrb[1].mxu0 }
 0x397   :  { %v727_v35 = vadd.f32 %v726_v33, %v609_v28  ;;  %v728_v36 = vpop.f32.mrb[2].mxu0 }
 0x398   :  { %v730_v38 = vpop.f32.mrb[3].mxu0  ;;  %v729_v39 = vadd.f32 %v728_v36, %v605_v27 }
 0x399   :  { %v731_v41 = vadd.f32 %v730_v38, %v609_v28  ;;  %v763_v42 = vadd.f32 %v727_v35, %v725_v30 }
 0x39b   :  { %764 = vadd.xlane.f32.xlu0 %v763_v42  ;;  %v766_v50 = vadd.f32 %v731_v41, %v729_v39 }
 0x39d   :  { %v734_v46 = vpop.f32.mrb[4].mxu0 }
 0x39e   :  { %v735_v54 = vadd.f32 %v734_v46, %v605_v27  ;;  %v736_v56 = vpop.f32.mrb[5].mxu0 }
 0x39f   :  { %v737_v58 = vadd.f32 %v736_v56, %v609_v28  ;;  %767 = vadd.xlane.f32.xlu0 %v766_v50  ;;  %v738_v59 = vpop.f32.mrb[6].mxu0 }
 0x3a0   :  { %v740_v60 = vpop.f32.mrb[7].mxu0  ;;  %v739_v61 = vadd.f32 %v738_v59, %v605_v27 }
 0x3a1   :  { %v741_v44 = vadd.f32 %v740_v60, %v609_v28  ;;  %v769_v62 = vadd.f32 %v737_v58, %v735_v54 }
 0x3a3   :  { %770 = vadd.xlane.f32.xlu1 %v769_v62  ;;  %v772_v51 = vadd.f32 %v741_v44, %v739_v61 }
 0x3a5   :  { %v744_v63 = vpop.f32.mrb[8].mxu0 }
 0x3a6   :  { %v745_v0 = vadd.f32 %v744_v63, %v605_v27  ;;  %v746_v43 = vpop.f32.mrb[9].mxu0 }
 0x3a7   :  { %v747_v1 = vadd.f32 %v746_v43, %v609_v28  ;;  %773 = vadd.xlane.f32.xlu1 %v772_v51  ;;  %v748_v47 = vpop.f32.mrb[10].mxu0 }
 0x3a8   :  { %v749_v2 = vadd.f32 %v748_v47, %v605_v27  ;;  %v750_v52 = vpop.f32.mrb[11].mxu0 }
 0x3a9   :  { %v751_v57 = vadd.f32 %v750_v52, %v609_v28  ;;  %v775_v48 = vadd.f32 %v747_v1, %v745_v0 }
 0x3ab   :  { %776 = vadd.xlane.f32.xlu0 %v775_v48  ;;  %v778_v55 = vadd.f32 %v751_v57, %v749_v2 }
 0x3ad   :  { %779 = vadd.xlane.f32.xlu1 %v778_v55  ;;  %v754_v3 = vpop.f32.mrb[12].mxu0 }
 0x3ae   :  { %v5815_v4 = vadd.f32 %v754_v3, %v605_v27  ;;  %v756_v5 = vpop.f32.mrb[13].mxu0 }
 0x3af   :  { %v5817_v6 = vadd.f32 %v756_v5, %v609_v28  ;;  %v758_v7 = vpop.f32.mrb[14].mxu0 }
 0x3b0   :  { %v5819_v8 = vadd.f32 %v758_v7, %v605_v27  ;;  %v760_v9 = vpop.f32.mrb[15].mxu0 }
 0x3b1   :  { %v5821_v10 = vadd.f32 %v760_v9, %v609_v28  ;;  %v781_v11 = vadd.f32 %v5817_v6, %v5815_v4 }
 0x3b3   :  { %782 = vadd.xlane.f32.xlu0 %v781_v11  ;;  %v784_v12 = vadd.f32 %v5821_v10, %v5819_v8 }
 0x3b5   :  { %785 = vadd.xlane.f32.xlu1 %v784_v12 }
 0x428   :  { %v765_v15 = vpop.xlane.xlu0 %764 }
 0x429   :  { %v788_v16 = vmul.f32 0.00390625, %v765_v15 }
 0x42b   :  { %v5827_v18 = vsub.f32 %v725_v30, %v788_v16  ;;  %v5829_v19 = vsub.f32 %v727_v35, %v788_v16  ;;  %v4800_v16 = vld [vmem:[#allocation12 + $0x48] sm:$0xff]  }
 0x42c   :  { %v768_v20 = vpop.xlane.xlu0 %767  ;;  %4394 = vmatprep.subr.bf16.mxu1 %v4800_v16  ;;  %v5905_v16 = vsub.s32 2, %v5796_v21 }
 0x42d   :  { %v789_v25 = vmul.f32 0.00390625, %v768_v20  ;;  %v812_v26 = vmul.f32 %v5827_v18, %v5827_v18  ;;  %v813_v27 = vmul.f32 %v5829_v19, %v5829_v19 }
 0x42f   :  { %v5835_v28 = vsub.f32 %v729_v39, %v789_v25  ;;  %v5837_v29 = vsub.f32 %v731_v41, %v789_v25  ;;  %v828_v33 = vadd.f32 %v813_v27, %v812_v26 }
 0x430   :  { %v771_v36 = vpop.xlane.xlu1 %770 }
 0x431   :  { %v790_v38 = vmul.f32 0.00390625, %v771_v36  ;;  %829 = vadd.xlane.f32.xlu0 %v828_v33  ;;  %v814_v30 = vmul.f32 %v5835_v28, %v5835_v28  ;;  %v815_v35 = vmul.f32 %v5837_v29, %v5837_v29 }
 0x433   :  { %v5843_v42 = vsub.f32 %v735_v54, %v790_v38  ;;  %v5845_v46 = vsub.f32 %v737_v58, %v790_v38  ;;  %v831_v50 = vadd.f32 %v815_v35, %v814_v30  ;;  %v4803_v38 = vld [vmem:[#allocation12 + $0x10] sm:$0xff]   ;;  %v4804_v30 = vld [vmem:[#allocation12 + $0x58] sm:$0xff]  }
 0x434   :  { %v774_v56 = vpop.xlane.xlu1 %773  ;;  %v4805_v35 = vld [vmem:[#allocation12 + $0x18] sm:$0xff]  }
 0x435   :  { %v791_v39 = vmul.f32 0.00390625, %v774_v56  ;;  %832 = vadd.xlane.f32.xlu1 %v831_v50  ;;  %v816_v41 = vmul.f32 %v5843_v42, %v5843_v42  ;;  %v817_v59 = vmul.f32 %v5845_v46, %v5845_v46  ;;  %v4806_v50 = vld [vmem:[#allocation12 + $0x60] sm:$0xff]  }
 0x436   :  { %v4807_v56 = vld [vmem:[#allocation12 + $0x20] sm:$0xff]  }
 0x437   :  { %v5851_v60 = vsub.f32 %v739_v61, %v791_v39  ;;  %v5853_v62 = vsub.f32 %v741_v44, %v791_v39  ;;  %v834_v63 = vadd.f32 %v817_v59, %v816_v41  ;;  %v4808_v39 = vld [vmem:[#allocation12 + $0x68] sm:$0xff]   ;;  %v4810_v59 = vld [vmem:[#allocation12 + $0x70] sm:$0xff]  }
 0x438   :  { %v777_v51 = vpop.xlane.xlu0 %776  ;;  %v4809_v41 = vld [vmem:[#allocation12 + $0x28] sm:$0xff]  }
 0x439   :  { %v792_v54 = vmul.f32 0.00390625, %v777_v51  ;;  %835 = vadd.xlane.f32.xlu0 %v834_v63  ;;  %v818_v58 = vmul.f32 %v5851_v60, %v5851_v60  ;;  %v819_v43 = vmul.f32 %v5853_v62, %v5853_v62  ;;  %v4811_v63 = vld [vmem:[#allocation12 + $0x30] sm:$0xff]   ;;  %v4812_v51 = vld [vmem:[#allocation12 + $0x78] sm:$0xff]  }
 0x43a   :  { %v780_v47 = vpop.xlane.xlu1 %779 }
 0x43b   :  { %v5859_v52 = vsub.f32 %v745_v0, %v792_v54  ;;  %v5861_v48 = vsub.f32 %v747_v1, %v792_v54  ;;  %v793_v55 = vmul.f32 0.00390625, %v780_v47  ;;  %v837_v61 = vadd.f32 %v819_v43, %v818_v58  ;;  %v4813_v54 = vld [vmem:[#allocation12 + $0x38] sm:$0xff]   ;;  %v4814_v58 = vld [vmem:[#allocation16 + $0x40] sm:$0xff]  }
 0x43c   :  { %v4815_v43 = vld [vmem:[#allocation16 + $0x48] sm:$0xff]   ;;  %4590 = vmatprep.subr.bf16.mxu0 %v4814_v58  ;;  %v4816_v47 = vld [vmem:[#allocation16 + $0x50] sm:$0xff]  }
 0x43d   :  { %v5863_v3 = vsub.f32 %v749_v2, %v793_v55  ;;  %v5865_v44 = vsub.f32 %v751_v57, %v793_v55  ;;  %838 = vadd.xlane.f32.xlu1 %v837_v61  ;;  %v820_v5 = vmul.f32 %v5859_v52, %v5859_v52  ;;  %v821_v7 = vmul.f32 %v5861_v48, %v5861_v48  ;;  %v4817_v55 = vld [vmem:[#allocation16 + $0x58] sm:$0xff]  }
 0x43e   :  { %4591 = vmatpush3.bf16.msra.mxu0 %v4814_v58 }
 0x43f   :  { %v840_v9 = vadd.f32 %v821_v7, %v820_v5  ;;  %v822_v0 = vmul.f32 %v5863_v3, %v5863_v3  ;;  %v823_v1 = vmul.f32 %v5865_v44, %v5865_v44  ;;  %4592 = vmatprep.subr.bf16.mxu0 %v4815_v43 }
 0x440   :  { %v783_v11 = vpop.xlane.xlu0 %782 }
 0x441   :  { %v794_v12 = vmul.f32 0.00390625, %v783_v11  ;;  %841 = vadd.xlane.f32.xlu0 %v840_v9  ;;  %v843_v2 = vadd.f32 %v823_v1, %v822_v0  ;;  %v5896_v1 = vsub.s32 1, %v5796_v21  ;;  %v5899_v11 = vsub.s32 5, %v5796_v21 }
 0x442   :  { %v786_v57 = vpop.xlane.xlu1 %785  ;;  %4593 = vmatpush3.bf16.msra.mxu0 %v4815_v43 }
 0x443   :  { %v5876_v13 = vsub.f32 %v5815_v4, %v794_v12  ;;  %v5879_v14 = vsub.f32 %v5817_v6, %v794_v12  ;;  %v795_v15 = vmul.f32 0.00390625, %v786_v57  ;;  %844 = vadd.xlane.f32.xlu1 %v843_v2  ;;  %v4801_v4 = vld [vmem:[#allocation12 + $0x8] sm:$0xff]   ;;  %4594 = vmatprep.subr.bf16.mxu0 %v4816_v47 }
 0x444   :  { %4395 = vmatpush3.bf16.msra.mxu1 %v4801_v4 }
 0x445   :  { %v5882_v20 = vsub.f32 %v5819_v8, %v795_v15  ;;  %v5885_v25 = vsub.f32 %v5821_v10, %v795_v15  ;;  %v824_v26 = vmul.f32 %v5876_v13, %v5876_v13  ;;  %v825_v27 = vmul.f32 %v5879_v14, %v5879_v14  ;;  %v4802_v8 = vld [vmem:[#allocation12 + $0x50] sm:$0xff]  }
 0x446   :  { %4396 = vmatprep.subr.bf16.mxu1 %v4802_v8  ;;  %4595 = vmatpush3.bf16.msra.mxu0 %v4816_v47  ;;  %v5902_v15 = vsub.s32 6, %v5796_v21  ;;  %v929_v21 = vrot.slane %v5804_v23, %v5905_v16 }
 0x447   :  { %v846_v33 = vadd.f32 %v825_v27, %v824_v26  ;;  %v826_v6 = vmul.f32 %v5882_v20, %v5882_v20  ;;  %v827_v36 = vmul.f32 %v5885_v25, %v5885_v25  ;;  %4596 = vmatprep.subr.bf16.mxu0 %v4817_v55  ;;  %v895_v26 = vrot.slane %v5804_v23, %v5896_v1 }
 0x448   :  { %4397 = vmatpush3.bf16.msra.mxu1 %v4803_v38  ;;  %v899_v27 = vrot.slane %v5804_v23, %v5899_v11 }
 0x449   :  { %847 = vadd.xlane.f32.xlu0 %v846_v33  ;;  %v849_v10 = vadd.f32 %v827_v36, %v826_v6  ;;  %4398 = vmatprep.subr.bf16.mxu1 %v4804_v30  ;;  %v933_v36 = vrot.slane %v5804_v23, %v5902_v15  ;;  %v5914_v8 = vrot.slane %v895_v26, %v5896_v1 }
 0x44a   :  { %4597 = vmatpush3.bf16.msra.mxu0 %v4817_v55 }
 0x44b   :  { %850 = vadd.xlane.f32.xlu1 %v849_v10  ;;  %v5917_v10 = vrot.slane %v899_v27, %v5896_v1 }
 0x44c   :  { %4399 = vmatpush3.bf16.msra.mxu1 %v4805_v35 }
 0x44d   :  { %4400 = vmatprep.subr.bf16.mxu1 %v4806_v50 }
 0x450   :  { %4401 = vmatpush3.bf16.msra.mxu1 %v4807_v56 }
 0x451   :  { %4402 = vmatprep.subr.bf16.mxu1 %v4808_v39 }
 0x454   :  { %4403 = vmatpush3.bf16.msra.mxu1 %v4809_v41  ;;  %v5924_v41 = vrot.slane %v933_v36, %v5905_v16 }
 0x455   :  { %4404 = vmatprep.subr.bf16.mxu1 %v4810_v59 }
 0x458   :  { %4405 = vmatpush3.bf16.msra.mxu1 %v4811_v63 }
 0x459   :  { %4406 = vmatprep.subr.bf16.mxu1 %v4812_v51 }
 0x45c   :  { %4407 = vmatpush3.bf16.msra.mxu1 %v4813_v54  ;;  %v5929_v54 = vrot.slane %v929_v21, %v5905_v16 }
 0x4be   :  { %v830_v61 = vpop.xlane.xlu0 %829 }
 0x4bf   :  { %v852_v5 = vmul.f32 0.00390625, %v830_v61 }
 0x4c1   :  { %v860_v7 = vadd.f32 1e-05, %v852_v5 }
 0x4c2   :  { %v833_v9 = vpop.xlane.xlu1 %832 }
 0x4c3   :  { %4990 = vrsqrt.f32 %v860_v7  ;;  %v853_v0 = vmul.f32 0.00390625, %v833_v9 }
 0x4c5   :  { %v861_v12 = vadd.f32 1e-05, %v853_v0 }
 0x4c6   :  { %v836_v2 = vpop.xlane.xlu0 %835 }
 0x4c7   :  { %4992 = vrsqrt.f32 %v861_v12  ;;  %v854_v57 = vmul.f32 0.00390625, %v836_v2 }
 0x4c9   :  { %v862_v4 = vadd.f32 1e-05, %v854_v57 }
 0x4ca   :  { %v839_v33 = vpop.xlane.xlu1 %838 }
 0x4cb   :  { %4994 = vrsqrt.f32 %v862_v4  ;;  %v855_v6 = vmul.f32 0.00390625, %v839_v33 }
 0x4cd   :  { %v4991_v38 = vpop.eup %4990  ;;  %v863_v30 = vadd.f32 1e-05, %v855_v6 }
 0x4ce   :  { %v876_v35 = vmul.f32 %v4991_v38, %v5827_v18  ;;  %v842_v50 = vpop.xlane.xlu0 %841  ;;  %v877_v56 = vmul.f32 %v4991_v38, %v5829_v19 }
 0x4cf   :  { %4996 = vrsqrt.f32 %v863_v30  ;;  %v856_v39 = vmul.f32 0.00390625, %v842_v50 }
 0x4d0   :  { %v910_v59 = vmul.f32 %v5914_v8, %v876_v35  ;;  %v845_v63 = vpop.xlane.xlu1 %844  ;;  %v911_v51 = vmul.f32 %v5917_v10, %v877_v56 }
 0x4d1   :  { %v4993_v23 = vpop.eup %4992  ;;  %v864_v58 = vadd.f32 1e-05, %v856_v39  ;;  %v857_v43 = vmul.f32 0.00390625, %v845_v63 }
 0x4d2   :  { %v878_v18 = vmul.f32 %v4993_v23, %v5835_v28  ;;  %v879_v19 = vmul.f32 %v4993_v23, %v5837_v29  ;;  %v945_v55 = vadd.f32 %v5924_v41, %v911_v51  ;;  %v944_v7 = vadd.f32 %v5929_v54, %v910_v59 }
 0x4d3   :  { %4998 = vrsqrt.f32 %v864_v58  ;;  %v865_v47 = vadd.f32 1e-05, %v857_v43 }
 0x4d4   :  { %v912_v61 = vmul.f32 %v5914_v8, %v878_v18  ;;  %v913_v5 = vmul.f32 %v5917_v10, %v879_v19  ;;  %v961_v26 = vmax.f32 %v945_v55, 0.0  ;;  %v960_v33 = vmax.f32 %v944_v7, 0.0 }
 0x4d5   :  { %v4995_v9 = vpop.eup %4994  ;;  %5000 = vrsqrt.f32 %v865_v47 }
 0x4d6   :  { %v848_v0 = vpop.xlane.xlu0 %847  ;;  %v947_v12 = vadd.f32 %v5924_v41, %v913_v5  ;;  %v946_v2 = vadd.f32 %v5929_v54, %v912_v61  ;;  %v881_v28 = vmul.f32 %v4995_v9, %v5845_v46  ;;  %v880_v29 = vmul.f32 %v4995_v9, %v5843_v42 }
 0x4d7   :  { %v858_v57 = vmul.f32 0.00390625, %v848_v0 }
 0x4d8   :  { %v851_v27 = vpop.xlane.xlu1 %850  ;;  %v963_v4 = vmax.f32 %v947_v12, 0.0  ;;  %v962_v6 = vmax.f32 %v946_v2, 0.0  ;;  %v915_v36 = vmul.f32 %v5917_v10, %v881_v28  ;;  %v914_v35 = vmul.f32 %v5914_v8, %v880_v29 }
 0x4d9   :  { %v4997_v21 = vpop.eup %4996  ;;  %v866_v38 = vadd.f32 1e-05, %v858_v57  ;;  %v859_v30 = vmul.f32 0.00390625, %v851_v27 }
 0x4da   :  { %v1009_v50 = vpack.c.bf16 %v963_v4, %v961_v26  ;;  %v1008_v56 = vpack.c.bf16 %v962_v6, %v960_v33  ;;  %v883_v39 = vmul.f32 %v4997_v21, %v5853_v62  ;;  %v949_v42 = vadd.f32 %v5924_v41, %v915_v36 }
 0x4db   :  { %5002 = vrsqrt.f32 %v866_v38  ;;  %v867_v46 = vadd.f32 1e-05, %v859_v30  ;;  %v882_v59 = vmul.f32 %v4997_v21, %v5851_v60  ;;  %v948_v58 = vadd.f32 %v5929_v54, %v914_v35 }
 0x4dc   :  { %1149 = vmatprep.mubr.bf16.mxu1 %v1009_v50  ;;  %v917_v63 = vmul.f32 %v5917_v10, %v883_v39  ;;  %v965_v47 = vmax.f32 %v949_v42, 0.0 }
 0x4dd   :  { %v4999_v51 = vpop.eup %4998  ;;  %5004 = vrsqrt.f32 %v867_v46  ;;  %1150 = vmatmul.mubr.bf16.vlgmr.msra.gmra.mrb[24].mxu1 %v1008_v56  ;;  %v916_v23 = vmul.f32 %v5914_v8, %v882_v59  ;;  %v964_v9 = vmax.f32 %v948_v58, 0.0 }
 0x4de   :  { %v951_v43 = vadd.f32 %v5924_v41, %v917_v63  ;;  %v885_v62 = vmul.f32 %v4999_v51, %v5861_v48  ;;  %v884_v18 = vmul.f32 %v4999_v51, %v5859_v52 }
 0x4df   :  { %v5001_v19 = vpop.eup %5000  ;;  %v950_v60 = vadd.f32 %v5929_v54, %v916_v23 }
 0x4e0   :  { %v967_v55 = vmax.f32 %v951_v43, 0.0  ;;  %v887_v61 = vmul.f32 %v5001_v19, %v5865_v44  ;;  %v919_v5 = vmul.f32 %v5917_v10, %v885_v62  ;;  %v886_v7 = vmul.f32 %v5001_v19, %v5863_v3  ;;  %v1016_v19 = vld [vmem:[#allocation13] sm:$0x7] }
 0x4e1   :  { %v966_v0 = vmax.f32 %v950_v60, 0.0  ;;  %v918_v12 = vmul.f32 %v5914_v8, %v884_v18  ;;  %v4822_v18 = vld [vmem:[#allocation16] sm:$0xff]  }
 0x4e2   :  { %v1011_v2 = vpack.c.bf16 %v967_v55, %v965_v47  ;;  %v921_v48 = vmul.f32 %v5917_v10, %v887_v61  ;;  %v953_v52 = vadd.f32 %v5924_v41, %v919_v5  ;;  %v920_v28 = vmul.f32 %v5914_v8, %v886_v7 }
 0x4e3   :  { %v1010_v29 = vpack.c.bf16 %v966_v0, %v964_v9  ;;  %v952_v3 = vadd.f32 %v5929_v54, %v918_v12  ;;  %v1020_v55 = vrot.slane %v1016_v19, %v5799_v22 }
 0x4e4   :  { %1157 = vmatprep.mubr.bf16.mxu1 %v1011_v2  ;;  %v955_v57 = vadd.f32 %v5924_v41, %v921_v48  ;;  %v954_v44 = vadd.f32 %v5929_v54, %v920_v28  ;;  %v969_v27 = vmax.f32 %v953_v52, 0.0 }
 0x4e5   :  { %v5003_v26 = vpop.eup %5002  ;;  %1158 = vmatmul.mubr.bf16.gmra.mrb[28].mxu1 %v1010_v29  ;;  %v968_v50 = vmax.f32 %v952_v3, 0.0 }
 0x4e6   :  { %v971_v4 = vmax.f32 %v955_v57, 0.0  ;;  %v889_v33 = vmul.f32 %v5003_v26, %v5879_v14  ;;  %v888_v6 = vmul.f32 %v5003_v26, %v5876_v13  ;;  %v970_v21 = vmax.f32 %v954_v44, 0.0 }
 0x4e7   :  { %v5005_v36 = vpop.eup %5004 }
 0x4e8   :  { %v1013_v38 = vpack.c.bf16 %v971_v4, %v969_v27  ;;  %v891_v30 = vmul.f32 %v5005_v36, %v5885_v25  ;;  %v923_v35 = vmul.f32 %v5917_v10, %v889_v33  ;;  %v890_v56 = vmul.f32 %v5005_v36, %v5882_v20  ;;  %v4823_v33 = vld [vmem:[#allocation16 + $0x8] sm:$0xff]  }
 0x4e9   :  { %v922_v39 = vmul.f32 %v5914_v8, %v888_v6  ;;  %v1012_v14 = vpack.c.bf16 %v970_v21, %v968_v50 }
 0x4ea   :  { %1165 = vmatprep.mubr.bf16.mxu1 %v1013_v38  ;;  %v925_v46 = vmul.f32 %v5917_v10, %v891_v30  ;;  %v957_v42 = vadd.f32 %v5924_v41, %v923_v35  ;;  %v924_v13 = vmul.f32 %v5914_v8, %v890_v56  ;;  %v4818_v10 = vld [vmem:[#allocation16 + $0x60] sm:$0xff]   ;;  %v4819_v8 = vld [vmem:[#allocation16 + $0x68] sm:$0xff]   ;;  %v4824_v35 = vld [vmem:[#allocation16 + $0x10] sm:$0xff]  }
 0x4eb   :  { %v956_v25 = vadd.f32 %v5929_v54, %v922_v39  ;;  %4598 = vmatprep.subr.bf16.mxu0 %v4818_v10 }
 0x4ec   :  { %v959_v59 = vadd.f32 %v5924_v41, %v925_v46  ;;  %v958_v63 = vadd.f32 %v5929_v54, %v924_v13  ;;  %v973_v51 = vmax.f32 %v957_v42, 0.0  ;;  %4599 = vmatpush3.bf16.msra.mxu0 %v4818_v10  ;;  %v4820_v41 = vld [vmem:[#allocation16 + $0x70] sm:$0xff]   ;;  %v4821_v54 = vld [vmem:[#allocation16 + $0x78] sm:$0xff]  }
 0x4ed   :  { %1166 = vmatmul.mubr.bf16.gmra.mrb[32].mxu1 %v1012_v14  ;;  %v972_v43 = vmax.f32 %v956_v25, 0.0  ;;  %4600 = vmatprep.subr.bf16.mxu0 %v4819_v8  ;;  %v4825_v14 = vld [vmem:[#allocation16 + $0x18] sm:$0xff]  }
 0x4ee   :  { %v975_v23 = vmax.f32 %v959_v59, 0.0  ;;  %v974_v20 = vmax.f32 %v958_v63, 0.0 }
 0x4f0   :  { %v1015_v58 = vpack.c.bf16 %v975_v23, %v973_v51  ;;  %v1014_v62 = vpack.c.bf16 %v974_v20, %v972_v43  ;;  %4601 = vmatpush3.bf16.msra.mxu0 %v4819_v8 }
 0x4f1   :  { %4602 = vmatprep.subr.bf16.mxu0 %v4820_v41 }
 0x4f2   :  { %1173 = vmatprep.mubr.bf16.mxu1 %v1015_v58 }
 0x4f4   :  { %4603 = vmatpush3.bf16.msra.mxu0 %v4820_v41  ;;  %v4826_v41 = vld [vmem:[#allocation16 + $0x20] sm:$0xff]  }
 0x4f5   :  { %1174 = vmatmul.mubr.bf16.gmra.mrb[36].mxu1 %v1014_v62  ;;  %4604 = vmatprep.subr.bf16.mxu0 %v4821_v54 }
 0x4f6   :  { %1539 = vmatprep.mubr.bf16.mxu1 %v5447_v17 }
 0x4f8   :  { %4605 = vmatpush3.bf16.msra.mxu0 %v4821_v54 }
 0x4f9   :  { %4614 = vmatprep.subr.bf16.mxu0 %v4822_v18 }
 0x5b0   :  { %v4408_v47 = vpop.f32.mrb[24].mxu1 }
 0x5b1   :  { %v4409_v60 = vpop.f32.mrb[25].mxu1 }
 0x5b2   :  { %v4410_v61 = vadd.f32 %v4409_v60, %v4408_v47  ;;  %v4411_v5 = vpop.f32.mrb[26].mxu1 }
 0x5b3   :  { %v4412_v7 = vpop.f32.mrb[27].mxu1 }
 0x5b4   :  { %v4413_v9 = vadd.f32 %v4412_v7, %v4411_v5  ;;  %v5977_v0 = vadd.f32 %v4410_v61, %v1020_v55  ;;  %v1445_v61 = vstv %s4256_s5 }
 0x5b6   :  { %v5979_v12 = vadd.f32 %v4413_v9, %v1020_v55  ;;  %v1429_v23 = vmax.f32 %v5977_v0, 0.0 }
 0x5b8   :  { %v4414_v2 = vpop.f32.mrb[28].mxu1  ;;  %v1198_v48 = vpack.c.bf16 %v5979_v12, %v5977_v0  ;;  %v1430_v59 = vmax.f32 %v5979_v12, 0.0  ;;  %v6012_v60 = vadd.f32 1e-07, %v1429_v23 }
 0x5b9   :  { %v4415_v52 = vpop.f32.mrb[29].mxu1 }
 0x5ba   :  { %v4416_v28 = vadd.f32 %v4415_v52, %v4414_v2  ;;  %v4417_v29 = vpop.f32.mrb[30].mxu1  ;;  %4606 = vmatprep.mubr.bf16.mxu0 %v1198_v48  ;;  %v6005_v54 = vadd.f32 1e-07, %v1430_v59  ;;  %v343_v59 = vpack.c.bf16 %v5722_v34, %v5718_v31 }
 0x5bb   :  { %v4418_v57 = vpop.f32.mrb[31].mxu1 }
 0x5bc   :  { %v4419_v44 = vadd.f32 %v4418_v57, %v4417_v29  ;;  %v5983_v26 = vadd.f32 %v4416_v28, %v1020_v55  ;;  %v342_v28 = vpack.c.bf16 %v5724_v37, %v5720_v32  ;;  %v1447_v29 = vmul.f32 %v1445_v61, %v6005_v54  ;;  %v4828_v37 = vld [vmem:[#allocation16 + $0x30] sm:$0xff]  }
 0x5be   :  { %v5985_v3 = vadd.f32 %v4419_v44, %v1020_v55  ;;  %v1431_v20 = vmax.f32 %v5983_v26, 0.0 }
 0x5c0   :  { %v1199_v27 = vpack.c.bf16 %v5985_v3, %v5983_v26  ;;  %v4420_v4 = vpop.f32.mrb[32].mxu1  ;;  %v1432_v58 = vmax.f32 %v5985_v3, 0.0  ;;  %v6014_v5 = vadd.f32 1e-07, %v1431_v20 }
 0x5c1   :  { %v4421_v6 = vpop.f32.mrb[33].mxu1 }
 0x5c2   :  { %v4422_v36 = vadd.f32 %v4421_v6, %v4420_v4  ;;  %v4423_v21 = vpop.f32.mrb[34].mxu1  ;;  %4607 = vmatmul.mubr.bf16.vlgmr.msra.gmra.mrb[16].mxu0 %v1199_v27  ;;  %v6016_v7 = vadd.f32 1e-07, %v1432_v58  ;;  %v1446_v4 = vmul.f32 %v1445_v61, %v6012_v60  ;;  %v345_v58 = vpack.c.bf16 %v5740_v49, %v5726_v40 }
 0x5c3   :  { %4615 = vmatpush3.bf16.msra.mxu0 %v4822_v18  ;;  %v4424_v38 = vpop.f32.mrb[35].mxu1 }
 0x5c4   :  { %v4425_v30 = vadd.f32 %v4424_v38, %v4423_v21  ;;  %4616 = vmatprep.subr.bf16.mxu0 %v4823_v33  ;;  %v5989_v50 = vadd.f32 %v4422_v36, %v1020_v55  ;;  %v1449_v6 = vmul.f32 %v1445_v61, %v6016_v7 }
 0x5c6   :  { %v5991_v56 = vadd.f32 %v4425_v30, %v1020_v55  ;;  %v1433_v25 = vmax.f32 %v5989_v50, 0.0 }
 0x5c7   :  { %4617 = vmatpush3.bf16.msra.mxu0 %v4823_v33  ;;  %v1448_v33 = vmul.f32 %v1445_v61, %v6014_v5 }
 0x5c8   :  { %v1434_v39 = vmax.f32 %v5991_v56, 0.0  ;;  %v4426_v46 = vpop.f32.mrb[36].mxu1  ;;  %4618 = vmatprep.subr.bf16.mxu0 %v4824_v35  ;;  %v1200_v42 = vpack.c.bf16 %v5991_v56, %v5989_v50  ;;  %v6007_v18 = vadd.f32 1e-07, %v1433_v25 }
 0x5c9   :  { %v4427_v13 = vpop.f32.mrb[37].mxu1 }
 0x5ca   :  { %v4428_v63 = vadd.f32 %v4427_v13, %v4426_v46  ;;  %v4429_v51 = vpop.f32.mrb[38].mxu1  ;;  %4610 = vmatprep.mubr.bf16.mxu0 %v1200_v42  ;;  %v6001_v62 = vadd.f32 1e-07, %v1434_v39  ;;  %v1450_v57 = vmul.f32 %v1445_v61, %v6007_v18  ;;  %v4829_v46 = vld [vmem:[#allocation16 + $0x38] sm:$0xff]  }
 0x5cb   :  { %4619 = vmatpush3.bf16.msra.mxu0 %v4824_v35  ;;  %v4430_v43 = vpop.f32.mrb[39].mxu1 }
 0x5cc   :  { %v6003_v10 = vadd.f32 %v4428_v63, %v1020_v55  ;;  %v4431_v8 = vadd.f32 %v4430_v43, %v4429_v51  ;;  %4620 = vmatprep.subr.bf16.mxu0 %v4825_v14  ;;  %v1451_v9 = vmul.f32 %v1445_v61, %v6001_v62  ;;  %v1454_v21 = vmax.f32 %v1446_v4, %v1450_v57 }
 0x5cd   :  { %v344_v63 = vpack.c.bf16 %v5746_v53, %v5732_v45 }
 0x5ce   :  { %v1435_v19 = vmax.f32 %v6003_v10, 0.0  ;;  %v6010_v47 = vadd.f32 %v4431_v8, %v1020_v55  ;;  %v4827_v55 = vld [vmem:[#allocation16 + $0x28] sm:$0xff]   ;;  %v1455_v36 = vmax.f32 %v1447_v29, %v1451_v9 }
 0x5cf   :  { %4621 = vmatpush3.bf16.msra.mxu0 %v4825_v14 }
 0x5d0   :  { %v6019_v2 = vadd.f32 1e-07, %v1435_v19  ;;  %v1436_v48 = vmax.f32 %v6010_v47, 0.0  ;;  %4622 = vmatprep.subr.bf16.mxu0 %v4826_v41  ;;  %v1201_v52 = vpack.c.bf16 %v6010_v47, %v6003_v10  ;;  %v1458_v35 = vmax.f32 %v1454_v21, %v1455_v36 }
 0x5d2   :  { %v1452_v44 = vmul.f32 %v1445_v61, %v6019_v2  ;;  %v6029_v27 = vadd.f32 1e-07, %v1436_v48  ;;  %4611 = vmatmul.mubr.bf16.gmra.mrb[20].mxu0 %v1201_v52 }
 0x5d3   :  { %4623 = vmatpush3.bf16.msra.mxu0 %v4826_v41  ;;  %4630 = vmatprep.mubr.bf16.mxu0 %v342_v28 }
 0x5d4   :  { %v1453_v32 = vmul.f32 %v1445_v61, %v6029_v27  ;;  %4624 = vmatprep.subr.bf16.mxu0 %v4827_v55  ;;  %v1456_v38 = vmax.f32 %v1448_v33, %v1452_v44 }
 0x5d6   :  { %v1457_v30 = vmax.f32 %v1449_v6, %v1453_v32 }
 0x5d7   :  { %4625 = vmatpush3.bf16.msra.mxu0 %v4827_v55 }
 0x5d8   :  { %v1459_v39 = vmax.f32 %v1456_v38, %v1457_v30  ;;  %4626 = vmatprep.subr.bf16.mxu0 %v4828_v37 }
 0x5da   :  { %v1460_v42 = vmax.f32 %v1458_v35, %v1459_v39 }
 0x5db   :  { %4627 = vmatpush3.bf16.msra.mxu0 %v4828_v37 }
 0x5dc   :  { %v1461_v14 = vrot.slane %v1460_v42, 4  ;;  %4628 = vmatprep.subr.bf16.mxu0 %v4829_v46 }
 0x5de   :  { %v1462_v13 = vmax.f32 %v1460_v42, %v1461_v14 }
 0x5df   :  { %4629 = vmatpush3.bf16.msra.mxu0 %v4829_v46 }
 0x5e0   :  { %v1463_v25 = vrot.slane %v1462_v13, 2 }
 0x5e2   :  { %v1464_v51 = vmax.f32 %v1462_v13, %v1463_v25  ;;  %4631 = vmatmul.mubr.bf16.vlgmr.msra.gmra.mrb[16].mxu0 %v343_v59  ;;  %v4832_v25 = vld [vmem:[#allocation10 + $0x84] ss:$8 sps:$4 sm:$0xff]  }
 0x5e3   :  { %4634 = vmatprep.mubr.bf16.mxu0 %v344_v63 }
 0x5e4   :  { %v1465_v23 = vrot.slane %v1464_v51, 1 }
 0x5e6   :  { %v1466_v20 = vmax.f32 %v1464_v51, %v1465_v23  ;;  %v4830_v51 = vld [vmem:[#allocation10 + $0x80] ss:$8 sps:$4 sm:$0xff]  }
 0x5e7   :  { %v5200_v23 = vld [vmem:[#allocation3] sm:$0xff]  }
 0x5e8   :  { %v1467_v43 = vsub.f32 %v1446_v4, %v1466_v20  ;;  %v1468_v8 = vsub.f32 %v1447_v29, %v1466_v20  ;;  %v1469_v41 = vsub.f32 %v1448_v33, %v1466_v20  ;;  %v1470_v19 = vsub.f32 %v1449_v6, %v1466_v20 }
 0x5e9   :  { %v1471_v61 = vsub.f32 %v1450_v57, %v1466_v20  ;;  %v1472_v48 = vsub.f32 %v1451_v9, %v1466_v20  ;;  %v1473_v53 = vsub.f32 %v1452_v44, %v1466_v20  ;;  %v1474_v28 = vsub.f32 %v1453_v32, %v1466_v20  ;;  %v5203_v20 = vld [vmem:[#allocation3 + $0x18] sm:$0xff]  }
 0x5ea   :  { %4635 = vmatmul.mubr.bf16.gmra.mrb[20].mxu0 %v345_v58  ;;  %v1475_v31 = vmul.f32 1.442695, %v1467_v43  ;;  %v1477_v34 = vmul.f32 1.442695, %v1468_v8  ;;  %v1479_v52 = vmul.f32 1.442695, %v1469_v41 }
 0x5eb   :  { %v1481_v55 = vmul.f32 1.442695, %v1470_v19  ;;  %v1483_v45 = vmul.f32 1.442695, %v1471_v61  ;;  %v1485_v36 = vmul.f32 1.442695, %v1472_v48 }
 0x5ec   :  { %5006 = vpow2.f32 %v1475_v31  ;;  %v1487_v40 = vmul.f32 1.442695, %v1473_v53  ;;  %v1489_v49 = vmul.f32 1.442695, %v1474_v28  ;;  %v4836_v58 = vld [vmem:[#allocation10 + $0xa0] ss:$8 sps:$4 sm:$0xff]  }
 0x5ed   :  { %5008 = vpow2.f32 %v1477_v34  ;;  %v4838_v43 = vld [vmem:[#allocation10 + $0xa4] ss:$8 sps:$4 sm:$0xff]   ;;  %v4841_v8 = vld [vmem:[#allocation10 + $0xb4] ss:$8 sps:$4 sm:$0xff]   ;;  %v4839_v41 = vld [vmem:[#allocation10 + $0xb0] ss:$8 sps:$4 sm:$0xff]  }
 0x5ee   :  { %5010 = vpow2.f32 %v1479_v52  ;;  %v4844_v19 = vld [vmem:[#allocation10 + $0xc4] ss:$8 sps:$4 sm:$0xff]   ;;  %v4842_v61 = vld [vmem:[#allocation10 + $0xc0] ss:$8 sps:$4 sm:$0xff]   ;;  %v4847_v48 = vld [vmem:[#allocation10 + $0xd4] ss:$8 sps:$4 sm:$0xff]  }
 0x5ef   :  { %5012 = vpow2.f32 %v1481_v55  ;;  %v4845_v31 = vld [vmem:[#allocation10 + $0xd0] ss:$8 sps:$4 sm:$0xff]   ;;  %v4850_v34 = vld [vmem:[#allocation10 + $0xe4] ss:$8 sps:$4 sm:$0xff]   ;;  %v4848_v52 = vld [vmem:[#allocation10 + $0xe0] ss:$8 sps:$4 sm:$0xff]  }
 0x5f0   :  { %5014 = vpow2.f32 %v1483_v45  ;;  %v4853_v55 = vld [vmem:[#allocation10 + $0xf4] ss:$8 sps:$4 sm:$0xff]   ;;  %v4851_v45 = vld [vmem:[#allocation10 + $0xf0] ss:$8 sps:$4 sm:$0xff]  }
 0x5f1   :  { %5016 = vpow2.f32 %v1485_v36 }
 0x5f2   :  { %5018 = vpow2.f32 %v1487_v40 }
 0x5f3   :  { %5020 = vpow2.f32 %v1489_v49 }
 0x5f6   :  { %v5007_v9 = vpop.eup %5006 }
 0x5f7   :  { %v5009_v29 = vpop.eup %5008  ;;  %v1491_v57 = vmul.f32 %v5007_v9, %v6012_v60 }
 0x5f8   :  { %v5011_v4 = vpop.eup %5010  ;;  %v1503_v33 = vpack.c.bf16 %v5009_v29, %v5007_v9  ;;  %v1492_v6 = vmul.f32 %v5009_v29, %v6005_v54 }
 0x5f9   :  { %v5013_v44 = vpop.eup %5012  ;;  %v1493_v21 = vmul.f32 %v5011_v4, %v6014_v5 }
 0x5fa   :  { %v5015_v32 = vpop.eup %5014  ;;  %1507 = vmatprep.subr.bf16.mxu1 %v1503_v33  ;;  %v1499_v37 = vpack.c.bf16 %v1492_v6, %v1491_v57  ;;  %v1494_v38 = vmul.f32 %v5013_v44, %v6016_v7  ;;  %v1504_v35 = vpack.c.bf16 %v5013_v44, %v5011_v4 }
 0x5fb   :  { %v5017_v30 = vpop.eup %5016  ;;  %v1495_v60 = vmul.f32 %v5015_v32, %v6007_v18  ;;  %v4835_v18 = vld [vmem:[#allocation10 + $0x94] ss:$8 sps:$4 sm:$0xff]  }
 0x5fc   :  { %1508 = vmatpush1.bf16.msra.mxu1 %v1499_v37  ;;  %v5019_v39 = vpop.eup %5018  ;;  %v1500_v46 = vpack.c.bf16 %v1494_v38, %v1493_v21  ;;  %v1496_v42 = vmul.f32 %v5017_v30, %v6001_v62  ;;  %v1505_v54 = vpack.c.bf16 %v5017_v30, %v5015_v32  ;;  %v4833_v62 = vld [vmem:[#allocation10 + $0x90] ss:$8 sps:$4 sm:$0xff]  }
 0x5fd   :  { %1509 = vmatprep.subr.bf16.mxu1 %v1504_v35  ;;  %v5021_v14 = vpop.eup %5020  ;;  %v1497_v59 = vmul.f32 %v5019_v39, %v6019_v2  ;;  %v5201_v2 = vld [vmem:[#allocation3 + $0x8] sm:$0xff]  }
 0x5fe   :  { %v1501_v13 = vpack.c.bf16 %v1496_v42, %v1495_v60  ;;  %v1498_v5 = vmul.f32 %v5021_v14, %v6029_v27  ;;  %v1506_v7 = vpack.c.bf16 %v5021_v14, %v5019_v39  ;;  %v5202_v27 = vld [vmem:[#allocation3 + $0x10] sm:$0xff]  }
 0x600   :  { %1510 = vmatpush1.bf16.msra.mxu1 %v1500_v46  ;;  %v1502_v63 = vpack.c.bf16 %v1498_v5, %v1497_v59 }
 0x601   :  { %1511 = vmatprep.subr.bf16.mxu1 %v1505_v54 }
 0x604   :  { %1512 = vmatpush1.bf16.msra.mxu1 %v1501_v13 }
 0x605   :  { %1513 = vmatprep.subr.bf16.mxu1 %v1506_v7 }
 0x608   :  { %1514 = vmatpush1.bf16.msra.mxu1 %v1502_v63 }
 0x609   :  { %1750 = vmatprep.subr.bf16.mxu1 %v4832_v25 }
 0x60b   :  { %4257 = vmatmul.mubr.msk.bf16.vlgmr.msra.gmra.mrb[40].mxu1 %vm240_vm0, %v5200_v23 }
 0x60c   :  { %1549 = vmatprep.mubr.bf16.mxu1 %v5447_v17  ;;  %1751 = vmatpush1.bf16.msra.mxu1 %v4830_v51 }
 0x60d   :  { %1752 = vmatprep.subr.bf16.mxu1 %v4835_v18 }
 0x610   :  { %1753 = vmatpush1.bf16.msra.mxu1 %v4833_v62 }
 0x611   :  { %1754 = vmatprep.subr.bf16.mxu1 %v4838_v43 }
 0x613   :  { %4258 = vmatmul.mubr.msk.bf16.gmra.mrb[44].mxu1 %vm240_vm0, %v5201_v2 }
 0x614   :  { %1559 = vmatprep.mubr.bf16.mxu1 %v5447_v17  ;;  %1755 = vmatpush1.bf16.msra.mxu1 %v4836_v58 }
 0x615   :  { %1756 = vmatprep.subr.bf16.mxu1 %v4841_v8 }
 0x618   :  { %1757 = vmatpush1.bf16.msra.mxu1 %v4839_v41 }
 0x619   :  { %1758 = vmatprep.subr.bf16.mxu1 %v4844_v19 }
 0x61b   :  { %4259 = vmatmul.mubr.msk.bf16.gmra.mrb[48].mxu1 %vm240_vm0, %v5202_v27 }
 0x61c   :  { %1569 = vmatprep.mubr.bf16.mxu1 %v5447_v17  ;;  %1759 = vmatpush1.bf16.msra.mxu1 %v4842_v61 }
 0x61d   :  { %1760 = vmatprep.subr.bf16.mxu1 %v4847_v48 }
 0x620   :  { %1761 = vmatpush1.bf16.msra.mxu1 %v4845_v31 }
 0x621   :  { %1762 = vmatprep.subr.bf16.mxu1 %v4850_v34 }
 0x623   :  { %4260 = vmatmul.mubr.msk.bf16.gmra.mrb[52].mxu1 %vm240_vm0, %v5203_v20 }
 0x624   :  { %1782 = vmatprep.mubr.bf16.mxu1 %v5447_v17  ;;  %1763 = vmatpush1.bf16.msra.mxu1 %v4848_v52 }
 0x625   :  { %1764 = vmatprep.subr.bf16.mxu1 %v4853_v55 }
 0x628   :  { %1765 = vmatpush1.bf16.msra.mxu1 %v4851_v45 }
 0x6de   :  { %v1541_v53 = vpop.f32.mrb[40].mxu1 }
 0x6df   :  { %v1543_v28 = vpop.f32.mrb[41].mxu1 }
 0x6e0   :  { %vm1580_vm9 = vcmp.gt.f32.partialorder %v1543_v28, 0.0  ;;  %v1545_v36 = vpop.f32.mrb[42].mxu1 }
 0x6e1   :  { %v1588_v40 = vsel %vm1580_vm9, %v1543_v28, 1.0  ;;  %v1547_v49 = vpop.f32.mrb[43].mxu1 }
 0x6e2   :  { %5022 = vrcp.f32 %v1588_v40  ;;  %vm1581_vm10 = vcmp.gt.f32.partialorder %v1547_v49, 0.0 }
 0x6e3   :  { %v1589_v9 = vsel %vm1581_vm10, %v1547_v49, 1.0 }
 0x6e4   :  { %5024 = vrcp.f32 %v1589_v9 }
 0x6e6   :  { %v1551_v29 = vpop.f32.mrb[44].mxu1 }
 0x6e7   :  { %v1553_v57 = vpop.f32.mrb[45].mxu1 }
 0x6e8   :  { %vm1582_vm11 = vcmp.gt.f32.partialorder %v1553_v57, 0.0  ;;  %v1555_v4 = vpop.f32.mrb[46].mxu1 }
 0x6e9   :  { %v1590_v33 = vsel %vm1582_vm11, %v1553_v57, 1.0  ;;  %v1557_v6 = vpop.f32.mrb[47].mxu1 }
 0x6ea   :  { %5026 = vrcp.f32 %v1590_v33  ;;  %vm1583_vm12 = vcmp.gt.f32.partialorder %v1557_v6, 0.0 }
 0x6eb   :  { %v1591_v44 = vsel %vm1583_vm12, %v1557_v6, 1.0 }
 0x6ec   :  { %v5023_v32 = vpop.eup %5022  ;;  %5028 = vrcp.f32 %v1591_v44  ;;  %v6088_v44 = vld [vmem:[%s6763_s6 + $0x8] sm:$0x77] }
 0x6ed   :  { %v1604_v37 = vmul.f32 %v5023_v32, %v1541_v53  ;;  %v1655_v32 = vrot.slane %v6088_v44, %v5799_v22 }
 0x6ee   :  { %v5025_v21 = vpop.eup %5024  ;;  %v1561_v38 = vpop.f32.mrb[48].mxu1 }
 0x6ef   :  { %v1612_v30 = vsel %vm1580_vm9, %v1604_v37, 0.0  ;;  %v1605_v35 = vmul.f32 %v5025_v21, %v1545_v36  ;;  %v1563_v39 = vpop.f32.mrb[49].mxu1  ;;  %v1659_v37 = vrot.slane %v6088_v44, %v5807_v24  ;;  %v1665_v21 = vrot.slane %v1655_v32, %v5799_v22 }
 0x6f0   :  { %vm1584_vm13 = vcmp.gt.f32.partialorder %v1563_v39, 0.0  ;;  %v1565_v46 = vpop.f32.mrb[50].mxu1  ;;  %v1620_v54 = vadd.f32 %v1612_v30, %v5977_v0 }
 0x6f1   :  { %v1613_v60 = vsel %vm1581_vm10, %v1605_v35, 0.0  ;;  %v1592_v42 = vsel %vm1584_vm13, %v1563_v39, 1.0  ;;  %v1567_v14 = vpop.f32.mrb[51].mxu1  ;;  %vm3915_vm10 = vcmask 7168  }
 0x6f2   :  { %v1621_v13 = vadd.f32 %v1613_v60, %v5979_v12  ;;  %5030 = vrcp.f32 %v1592_v42  ;;  %vm1585_vm14 = vcmp.gt.f32.partialorder %v1567_v14, 0.0 }
 0x6f3   :  { %v1593_v59 = vsel %vm1585_vm14, %v1567_v14, 1.0 }
 0x6f4   :  { %v5027_v5 = vpop.eup %5026  ;;  %v1647_v7 = vpack.c.bf16 %v1621_v13, %v1620_v54  ;;  %5032 = vrcp.f32 %v1593_v59 }
 0x6f5   :  { %v1606_v25 = vmul.f32 %v5027_v5, %v1551_v29 }
 0x6f6   :  { %v5029_v63 = vpop.eup %5028  ;;  %v1571_v51 = vpop.f32.mrb[52].mxu1  ;;  %1783 = vmatmul.mubr.bf16.vlgmr.msra.gmra.mrb[56].mxu1 %v1647_v7 }
 0x6f7   :  { %v1614_v18 = vsel %vm1582_vm11, %v1606_v25, 0.0  ;;  %v1607_v23 = vmul.f32 %v5029_v63, %v1555_v4  ;;  %v1573_v62 = vpop.f32.mrb[53].mxu1  ;;  %1792 = vmatprep.mubr.bf16.mxu1 %v5447_v17  ;;  %vm5449_vm11 = vmmov 0  }
 0x6f8   :  { %vm1586_vm15 = vcmp.gt.f32.partialorder %v1573_v62, 0.0  ;;  %v1575_v2 = vpop.f32.mrb[54].mxu1  ;;  %v1622_v43 = vadd.f32 %v1614_v18, %v5983_v26 }
 0x6f9   :  { %v1615_v27 = vsel %vm1583_vm12, %v1607_v23, 0.0  ;;  %v1594_v20 = vsel %vm1586_vm15, %v1573_v62, 1.0  ;;  %v1577_v58 = vpop.f32.mrb[55].mxu1 }
 0x6fa   :  { %v1623_v8 = vadd.f32 %v1615_v27, %v5985_v3  ;;  %5034 = vrcp.f32 %v1594_v20  ;;  %vm1587_vm1 = vcmp.gt.f32.partialorder %v1577_v58, 0.0 }
 0x6fb   :  { %v1595_v41 = vsel %vm1587_vm1, %v1577_v58, 1.0 }
 0x6fc   :  { %v5031_v19 = vpop.eup %5030  ;;  %5036 = vrcp.f32 %v1595_v41  ;;  %v1648_v61 = vpack.c.bf16 %v1623_v8, %v1622_v43 }
 0x6fd   :  { %v1608_v48 = vmul.f32 %v5031_v19, %v1561_v38  ;;  %v1669_v38 = vrot.slane %v1659_v37, %v5799_v22 }
 0x6fe   :  { %v5033_v31 = vpop.eup %5032  ;;  %1793 = vmatmul.mubr.bf16.gmra.mrb[60].mxu1 %v1648_v61 }
 0x6ff   :  { %v1616_v34 = vsel %vm1584_vm13, %v1608_v48, 0.0  ;;  %v1609_v52 = vmul.f32 %v5033_v31, %v1565_v46  ;;  %1802 = vmatprep.mubr.bf16.mxu1 %v5447_v17 }
 0x700   :  { %v1624_v45 = vadd.f32 %v1616_v34, %v5989_v50 }
 0x701   :  { %v1617_v55 = vsel %vm1585_vm14, %v1609_v52, 0.0 }
 0x702   :  { %v1625_v53 = vadd.f32 %v1617_v55, %v5991_v56 }
 0x704   :  { %v5035_v28 = vpop.eup %5034  ;;  %v1649_v36 = vpack.c.bf16 %v1625_v53, %v1624_v45 }
 0x705   :  { %v1610_v40 = vmul.f32 %v5035_v28, %v1571_v51 }
 0x706   :  { %v5037_v49 = vpop.eup %5036  ;;  %1803 = vmatmul.mubr.bf16.gmra.mrb[64].mxu1 %v1649_v36 }
 0x707   :  { %v1618_v9 = vsel %vm1586_vm15, %v1610_v40, 0.0  ;;  %v1611_v29 = vmul.f32 %v5037_v49, %v1575_v2  ;;  %1812 = vmatprep.mubr.bf16.mxu1 %v5447_v17 }
 0x708   :  { %v1626_v4 = vadd.f32 %v1618_v9, %v6003_v10 }
 0x709   :  { %v1619_v57 = vsel %vm1587_vm1, %v1611_v29, 0.0 }
 0x70a   :  { %v1627_v33 = vadd.f32 %v1619_v57, %v6010_v47  ;;  %v4854_v57 = vld [vmem:[#allocation12 + $0xc0] sm:$0xff]  }
 0x70b   :  { %4456 = vmatprep.subr.bf16.mxu0 %v4854_v57 }
 0x70c   :  { %v1650_v6 = vpack.c.bf16 %v1627_v33, %v1626_v4  ;;  %v4855_v4 = vld [vmem:[#allocation12 + $0x80] sm:$0xff]  }
 0x70d   :  { %4457 = vmatpush3.bf16.msra.mxu0 %v4855_v4 }
 0x70e   :  { %1813 = vmatmul.mubr.bf16.gmra.mrb[68].mxu1 %v1650_v6 }
 0x70f   :  { %2624 = vmatprep.mubr.bf16.mxu1 %v5447_v17 }
 0x7c9   :  { %v1784_v30 = vpop.f32.mrb[56].mxu1 }
 0x7ca   :  { %v1785_v35 = vadd.f32 %v1784_v30, %v1665_v21  ;;  %v1786_v39 = vpop.f32.mrb[57].mxu1 }
 0x7cb   :  { %v1787_v46 = vadd.f32 %v1786_v39, %v1669_v38  ;;  %v1788_v60 = vpop.f32.mrb[58].mxu1 }
 0x7cc   :  { %v1789_v42 = vadd.f32 %v1788_v60, %v1665_v21  ;;  %v1790_v14 = vpop.f32.mrb[59].mxu1 }
 0x7cd   :  { %v1791_v54 = vadd.f32 %v1790_v14, %v1669_v38  ;;  %v1823_v13 = vadd.f32 %v1787_v46, %v1785_v35 }
 0x7cf   :  { %1824 = vadd.xlane.f32.xlu0 %v1823_v13  ;;  %v1826_v59 = vadd.f32 %v1791_v54, %v1789_v42 }
 0x7d1   :  { %v1794_v5 = vpop.f32.mrb[60].mxu1  ;;  %1827 = vadd.xlane.f32.xlu1 %v1826_v59 }
 0x7d2   :  { %v1795_v7 = vadd.f32 %v1794_v5, %v1665_v21  ;;  %v1796_v25 = vpop.f32.mrb[61].mxu1 }
 0x7d3   :  { %v1797_v63 = vadd.f32 %v1796_v25, %v1669_v38  ;;  %v1798_v51 = vpop.f32.mrb[62].mxu1 }
 0x7d4   :  { %v1799_v18 = vadd.f32 %v1798_v51, %v1665_v21  ;;  %v1800_v23 = vpop.f32.mrb[63].mxu1 }
 0x7d5   :  { %v1801_v62 = vadd.f32 %v1800_v23, %v1669_v38  ;;  %v1829_v2 = vadd.f32 %v1797_v63, %v1795_v7 }
 0x7d7   :  { %1830 = vadd.xlane.f32.xlu0 %v1829_v2  ;;  %v1832_v27 = vadd.f32 %v1801_v62, %v1799_v18 }
 0x7d9   :  { %v1804_v20 = vpop.f32.mrb[64].mxu1  ;;  %1833 = vadd.xlane.f32.xlu1 %v1832_v27 }
 0x7da   :  { %v1805_v58 = vadd.f32 %v1804_v20, %v1665_v21  ;;  %v1806_v43 = vpop.f32.mrb[65].mxu1 }
 0x7db   :  { %v1807_v8 = vadd.f32 %v1806_v43, %v1669_v38  ;;  %v1808_v41 = vpop.f32.mrb[66].mxu1 }
 0x7dc   :  { %v1809_v19 = vadd.f32 %v1808_v41, %v1665_v21  ;;  %v1810_v61 = vpop.f32.mrb[67].mxu1 }
 0x7dd   :  { %v1811_v48 = vadd.f32 %v1810_v61, %v1669_v38  ;;  %v1835_v31 = vadd.f32 %v1807_v8, %v1805_v58 }
 0x7df   :  { %1836 = vadd.xlane.f32.xlu0 %v1835_v31  ;;  %v1838_v34 = vadd.f32 %v1811_v48, %v1809_v19 }
 0x7e1   :  { %1839 = vadd.xlane.f32.xlu1 %v1838_v34  ;;  %v1814_v52 = vpop.f32.mrb[68].mxu1 }
 0x7e2   :  { %v6096_v55 = vadd.f32 %v1814_v52, %v1665_v21  ;;  %v1816_v45 = vpop.f32.mrb[69].mxu1 }
 0x7e3   :  { %v6098_v53 = vadd.f32 %v1816_v45, %v1669_v38  ;;  %v1818_v28 = vpop.f32.mrb[70].mxu1 }
 0x7e4   :  { %v6100_v36 = vadd.f32 %v1818_v28, %v1665_v21  ;;  %v1820_v40 = vpop.f32.mrb[71].mxu1 }
 0x7e5   :  { %v6102_v49 = vadd.f32 %v1820_v40, %v1669_v38  ;;  %v1841_v9 = vadd.f32 %v6098_v53, %v6096_v55 }
 0x7e7   :  { %1842 = vadd.xlane.f32.xlu0 %v1841_v9  ;;  %v1844_v29 = vadd.f32 %v6102_v49, %v6100_v36 }
 0x7e9   :  { %1845 = vadd.xlane.f32.xlu1 %v1844_v29 }
 0x85c   :  { %v1825_v33 = vpop.xlane.xlu0 %1824 }
 0x85d   :  { %v1847_v6 = vmul.f32 0.00390625, %v1825_v33 }
 0x85e   :  { %v1828_v32 = vpop.xlane.xlu1 %1827 }
 0x85f   :  { %v6108_v37 = vsub.f32 %v1785_v35, %v1847_v6  ;;  %v6110_v21 = vsub.f32 %v1787_v46, %v1847_v6  ;;  %v1848_v38 = vmul.f32 0.00390625, %v1828_v32 }
 0x861   :  { %v6112_v30 = vsub.f32 %v1789_v42, %v1848_v38  ;;  %v6114_v39 = vsub.f32 %v1791_v54, %v1848_v38  ;;  %v1871_v60 = vmul.f32 %v6108_v37, %v6108_v37  ;;  %v1872_v14 = vmul.f32 %v6110_v21, %v6110_v21 }
 0x863   :  { %v1887_v13 = vadd.f32 %v1872_v14, %v1871_v60  ;;  %v1873_v59 = vmul.f32 %v6112_v30, %v6112_v30  ;;  %v1874_v35 = vmul.f32 %v6114_v39, %v6114_v39  ;;  %v4856_v60 = vld [vmem:[#allocation12 + $0xc8] sm:$0xff]  }
 0x864   :  { %v1831_v46 = vpop.xlane.xlu0 %1830  ;;  %v4857_v14 = vld [vmem:[#allocation12 + $0x88] sm:$0xff]   ;;  %4458 = vmatprep.subr.bf16.mxu0 %v4856_v60 }
 0x865   :  { %v1849_v5 = vmul.f32 0.00390625, %v1831_v46  ;;  %1888 = vadd.xlane.f32.xlu0 %v1887_v13  ;;  %v1890_v42 = vadd.f32 %v1874_v35, %v1873_v59  ;;  %4459 = vmatpush3.bf16.msra.mxu0 %v4857_v14  ;;  %v1992_v14 = vrot.slane %v6088_v44, %v5902_v15 }
 0x866   :  { %v1834_v25 = vpop.xlane.xlu1 %1833 }
 0x867   :  { %v6124_v54 = vsub.f32 %v1795_v7, %v1849_v5  ;;  %v6126_v51 = vsub.f32 %v1797_v63, %v1849_v5  ;;  %v1850_v23 = vmul.f32 0.00390625, %v1834_v25  ;;  %1891 = vadd.xlane.f32.xlu1 %v1890_v42  ;;  %v4859_v42 = vld [vmem:[#allocation12 + $0x90] sm:$0xff]   ;;  %v4860_v25 = vld [vmem:[#allocation12 + $0xd8] sm:$0xff]  }
 0x869   :  { %v6128_v2 = vsub.f32 %v1799_v18, %v1850_v23  ;;  %v6130_v27 = vsub.f32 %v1801_v62, %v1850_v23  ;;  %v1875_v20 = vmul.f32 %v6124_v54, %v6124_v54  ;;  %v1876_v43 = vmul.f32 %v6126_v51, %v6126_v51  ;;  %v4861_v23 = vld [vmem:[#allocation12 + $0x98] sm:$0xff]  }
 0x86b   :  { %v1893_v41 = vadd.f32 %v1876_v43, %v1875_v20  ;;  %v1877_v61 = vmul.f32 %v6128_v2, %v6128_v2  ;;  %v1878_v7 = vmul.f32 %v6130_v27, %v6130_v27  ;;  %v4862_v20 = vld [vmem:[#allocation12 + $0xe0] sm:$0xff]  }
 0x86c   :  { %v1837_v63 = vpop.xlane.xlu0 %1836  ;;  %v4863_v43 = vld [vmem:[#allocation12 + $0xa0] sm:$0xff]  }
 0x86d   :  { %v1851_v31 = vmul.f32 0.00390625, %v1837_v63  ;;  %1894 = vadd.xlane.f32.xlu0 %v1893_v41  ;;  %v1896_v18 = vadd.f32 %v1878_v7, %v1877_v61  ;;  %v4864_v41 = vld [vmem:[#allocation12 + $0xe8] sm:$0xff]   ;;  %v4866_v7 = vld [vmem:[#allocation12 + $0xf0] sm:$0xff]  }
 0x86e   :  { %v1840_v34 = vpop.xlane.xlu1 %1839  ;;  %v4865_v61 = vld [vmem:[#allocation12 + $0xa8] sm:$0xff]   ;;  %v4867_v63 = vld [vmem:[#allocation12 + $0xb0] sm:$0xff]  }
 0x86f   :  { %v6140_v62 = vsub.f32 %v1805_v58, %v1851_v31  ;;  %v6142_v52 = vsub.f32 %v1807_v8, %v1851_v31  ;;  %v1852_v45 = vmul.f32 0.00390625, %v1840_v34  ;;  %1897 = vadd.xlane.f32.xlu1 %v1896_v18  ;;  %v4868_v31 = vld [vmem:[#allocation12 + $0xf8] sm:$0xff]  }
 0x870   :  { %v4869_v18 = vld [vmem:[#allocation12 + $0xb8] sm:$0xff]  }
 0x871   :  { %v6144_v28 = vsub.f32 %v1809_v19, %v1852_v45  ;;  %v6146_v40 = vsub.f32 %v1811_v48, %v1852_v45  ;;  %v1879_v9 = vmul.f32 %v6140_v62, %v6140_v62  ;;  %v1880_v29 = vmul.f32 %v6142_v52, %v6142_v52 }
 0x873   :  { %v1899_v57 = vadd.f32 %v1880_v29, %v1879_v9  ;;  %v1881_v4 = vmul.f32 %v6144_v28, %v6144_v28  ;;  %v1882_v58 = vmul.f32 %v6146_v40, %v6146_v40 }
 0x874   :  { %v1843_v8 = vpop.xlane.xlu0 %1842 }
 0x875   :  { %v1853_v33 = vmul.f32 0.00390625, %v1843_v8  ;;  %1900 = vadd.xlane.f32.xlu0 %v1899_v57  ;;  %v1902_v19 = vadd.f32 %v1882_v58, %v1881_v4 }
 0x876   :  { %v1846_v6 = vpop.xlane.xlu1 %1845 }
 0x877   :  { %v6157_v48 = vsub.f32 %v6096_v55, %v1853_v33  ;;  %v6160_v32 = vsub.f32 %v6098_v53, %v1853_v33  ;;  %v1854_v38 = vmul.f32 0.00390625, %v1846_v6  ;;  %1903 = vadd.xlane.f32.xlu1 %v1902_v19  ;;  %v1954_v33 = vrot.slane %v6088_v44, %v5896_v1 }
 0x878   :  { %v1958_v6 = vrot.slane %v6088_v44, %v5899_v11 }
 0x879   :  { %v6163_v13 = vsub.f32 %v6100_v36, %v1854_v38  ;;  %v6166_v59 = vsub.f32 %v6102_v49, %v1854_v38  ;;  %v1883_v35 = vmul.f32 %v6157_v48, %v6157_v48  ;;  %v1884_v55 = vmul.f32 %v6160_v32, %v6160_v32  ;;  %v4858_v36 = vld [vmem:[#allocation12 + $0xd0] sm:$0xff]  }
 0x87a   :  { %4460 = vmatprep.subr.bf16.mxu0 %v4858_v36 }
 0x87b   :  { %v1905_v53 = vadd.f32 %v1884_v55, %v1883_v35  ;;  %v1885_v46 = vmul.f32 %v6163_v13, %v6163_v13  ;;  %v1886_v5 = vmul.f32 %v6166_v59, %v6166_v59  ;;  %4461 = vmatpush3.bf16.msra.mxu0 %v4859_v42  ;;  %v1988_v35 = vrot.slane %v6088_v44, %v5905_v16 }
 0x87c   :  { %4462 = vmatprep.subr.bf16.mxu0 %v4860_v25  ;;  %v6193_v25 = vrot.slane %v1992_v14, %v5905_v16 }
 0x87d   :  { %1906 = vadd.xlane.f32.xlu0 %v1905_v53  ;;  %v1908_v49 = vadd.f32 %v1886_v5, %v1885_v46  ;;  %v6185_v53 = vrot.slane %v1954_v33, %v5896_v1  ;;  %v6188_v46 = vrot.slane %v1958_v6, %v5896_v1  ;;  %v6196_v44 = vrot.slane %v1988_v35, %v5905_v16 }
 0x87f   :  { %1909 = vadd.xlane.f32.xlu1 %v1908_v49  ;;  %4463 = vmatpush3.bf16.msra.mxu0 %v4861_v23 }
 0x880   :  { %4464 = vmatprep.subr.bf16.mxu0 %v4862_v20 }
 0x883   :  { %4465 = vmatpush3.bf16.msra.mxu0 %v4863_v43 }
 0x884   :  { %4466 = vmatprep.subr.bf16.mxu0 %v4864_v41 }
 0x887   :  { %4467 = vmatpush3.bf16.msra.mxu0 %v4865_v61 }
 0x888   :  { %4468 = vmatprep.subr.bf16.mxu0 %v4866_v7 }
 0x88b   :  { %4469 = vmatpush3.bf16.msra.mxu0 %v4867_v63 }
 0x88c   :  { %4470 = vmatprep.subr.bf16.mxu0 %v4868_v31 }
 0x88f   :  { %4471 = vmatpush3.bf16.msra.mxu0 %v4869_v18 }
 0x8f2   :  { %v1889_v34 = vpop.xlane.xlu0 %1888 }
 0x8f3   :  { %v1911_v45 = vmul.f32 0.00390625, %v1889_v34 }
 0x8f4   :  { %v1892_v9 = vpop.xlane.xlu1 %1891 }
 0x8f5   :  { %v1919_v29 = vadd.f32 1e-05, %v1911_v45  ;;  %v1912_v57 = vmul.f32 0.00390625, %v1892_v9 }
 0x8f7   :  { %5038 = vrsqrt.f32 %v1919_v29  ;;  %v1920_v4 = vadd.f32 1e-05, %v1912_v57 }
 0x8f9   :  { %5040 = vrsqrt.f32 %v1920_v4 }
 0x8fa   :  { %v1895_v58 = vpop.xlane.xlu0 %1894 }
 0x8fb   :  { %v1913_v8 = vmul.f32 0.00390625, %v1895_v58 }
 0x8fc   :  { %v1898_v19 = vpop.xlane.xlu1 %1897 }
 0x8fd   :  { %v1921_v38 = vadd.f32 1e-05, %v1913_v8  ;;  %v1914_v60 = vmul.f32 0.00390625, %v1898_v19 }
 0x8ff   :  { %5042 = vrsqrt.f32 %v1921_v38  ;;  %v1922_v55 = vadd.f32 1e-05, %v1914_v60 }
 0x901   :  { %v5039_v5 = vpop.eup %5038  ;;  %5044 = vrsqrt.f32 %v1922_v55 }
 0x902   :  { %v1935_v36 = vmul.f32 %v5039_v5, %v6108_v37  ;;  %v1901_v42 = vpop.xlane.xlu0 %1900  ;;  %v1936_v49 = vmul.f32 %v5039_v5, %v6110_v21 }
 0x903   :  { %v5041_v23 = vpop.eup %5040  ;;  %v1915_v20 = vmul.f32 0.00390625, %v1901_v42 }
 0x904   :  { %v1969_v43 = vmul.f32 %v6185_v53, %v1935_v36  ;;  %v1937_v41 = vmul.f32 %v5041_v23, %v6112_v30  ;;  %v1904_v61 = vpop.xlane.xlu1 %1903  ;;  %v1938_v7 = vmul.f32 %v5041_v23, %v6114_v39  ;;  %v1970_v37 = vmul.f32 %v6188_v46, %v1936_v49 }
 0x905   :  { %v1923_v63 = vadd.f32 1e-05, %v1915_v20  ;;  %v1916_v31 = vmul.f32 0.00390625, %v1904_v61 }
 0x906   :  { %v1971_v21 = vmul.f32 %v6185_v53, %v1937_v41  ;;  %v1972_v18 = vmul.f32 %v6188_v46, %v1938_v7  ;;  %v2004_v34 = vadd.f32 %v6193_v25, %v1970_v37  ;;  %v2003_v45 = vadd.f32 %v6196_v44, %v1969_v43 }
 0x907   :  { %5046 = vrsqrt.f32 %v1923_v63  ;;  %v1924_v9 = vadd.f32 1e-05, %v1916_v31 }
 0x908   :  { %v2006_v29 = vadd.f32 %v6193_v25, %v1972_v18  ;;  %v2005_v30 = vadd.f32 %v6196_v44, %v1971_v21  ;;  %v2020_v39 = vmax.f32 %v2004_v34, 0.0  ;;  %v2019_v4 = vmax.f32 %v2003_v45, 0.0 }
 0x909   :  { %v5043_v57 = vpop.eup %5042  ;;  %5048 = vrsqrt.f32 %v1924_v9 }
 0x90a   :  { %v1907_v58 = vpop.xlane.xlu0 %1906  ;;  %v2022_v8 = vmax.f32 %v2006_v29, 0.0  ;;  %v2021_v33 = vmax.f32 %v2005_v30, 0.0  ;;  %v1940_v19 = vmul.f32 %v5043_v57, %v6126_v51  ;;  %v1939_v6 = vmul.f32 %v5043_v57, %v6124_v54 }
 0x90b   :  { %v5045_v38 = vpop.eup %5044  ;;  %v1917_v60 = vmul.f32 0.00390625, %v1907_v58 }
 0x90c   :  { %v1910_v14 = vpop.xlane.xlu1 %1909  ;;  %v2069_v35 = vpack.c.bf16 %v2022_v8, %v2020_v39  ;;  %v2068_v55 = vpack.c.bf16 %v2021_v33, %v2019_v4  ;;  %v1942_v5 = vmul.f32 %v5045_v38, %v6130_v27  ;;  %v1974_v36 = vmul.f32 %v6188_v46, %v1940_v19 }
 0x90d   :  { %v1925_v42 = vadd.f32 1e-05, %v1917_v60  ;;  %v1918_v49 = vmul.f32 0.00390625, %v1910_v14  ;;  %v1941_v23 = vmul.f32 %v5045_v38, %v6128_v2  ;;  %v1973_v20 = vmul.f32 %v6185_v53, %v1939_v6 }
 0x90e   :  { %2210 = vmatprep.mubr.bf16.mxu0 %v2069_v35  ;;  %v1976_v51 = vmul.f32 %v6188_v46, %v1942_v5  ;;  %v2008_v54 = vadd.f32 %v6193_v25, %v1974_v36 }
 0x90f   :  { %5050 = vrsqrt.f32 %v1925_v42  ;;  %v1926_v43 = vadd.f32 1e-05, %v1918_v49  ;;  %2211 = vmatmul.mubr.bf16.vlgmr.msra.gmra.mrb[24].mxu0 %v2068_v55  ;;  %v1975_v41 = vmul.f32 %v6185_v53, %v1941_v23  ;;  %v2007_v27 = vadd.f32 %v6196_v44, %v1973_v20 }
 0x910   :  { %v2010_v61 = vadd.f32 %v6193_v25, %v1976_v51  ;;  %v2024_v37 = vmax.f32 %v2008_v54, 0.0 }
 0x911   :  { %v5047_v7 = vpop.eup %5046  ;;  %5052 = vrsqrt.f32 %v1926_v43  ;;  %v2009_v2 = vadd.f32 %v6196_v44, %v1975_v41  ;;  %v2023_v34 = vmax.f32 %v2007_v27, 0.0 }
 0x912   :  { %v2026_v63 = vmax.f32 %v2010_v61, 0.0  ;;  %v1944_v31 = vmul.f32 %v5047_v7, %v6142_v52  ;;  %v1943_v21 = vmul.f32 %v5047_v7, %v6140_v62 }
 0x913   :  { %v5049_v18 = vpop.eup %5048  ;;  %v2025_v45 = vmax.f32 %v2009_v2, 0.0 }
 0x914   :  { %v2071_v9 = vpack.c.bf16 %v2026_v63, %v2024_v37  ;;  %v1946_v29 = vmul.f32 %v5049_v18, %v6146_v40  ;;  %v1978_v30 = vmul.f32 %v6188_v46, %v1944_v31  ;;  %v1945_v57 = vmul.f32 %v5049_v18, %v6144_v28 }
 0x915   :  { %v2070_v39 = vpack.c.bf16 %v2025_v45, %v2023_v34  ;;  %v1977_v4 = vmul.f32 %v6185_v53, %v1943_v21 }
 0x916   :  { %2218 = vmatprep.mubr.bf16.mxu0 %v2071_v9  ;;  %v1980_v58 = vmul.f32 %v6188_v46, %v1946_v29  ;;  %v2012_v52 = vadd.f32 %v6193_v25, %v1978_v30  ;;  %v1979_v62 = vmul.f32 %v6185_v53, %v1945_v57 }
 0x917   :  { %2219 = vmatmul.mubr.bf16.gmra.mrb[28].mxu0 %v2070_v39  ;;  %v2011_v8 = vadd.f32 %v6196_v44, %v1977_v4 }
 0x918   :  { %v2014_v33 = vadd.f32 %v6193_v25, %v1980_v58  ;;  %v2013_v40 = vadd.f32 %v6196_v44, %v1979_v62  ;;  %v2028_v6 = vmax.f32 %v2012_v52, 0.0 }
 0x919   :  { %v5051_v19 = vpop.eup %5050  ;;  %v2027_v28 = vmax.f32 %v2011_v8, 0.0 }
 0x91a   :  { %v2030_v38 = vmax.f32 %v2014_v33, 0.0  ;;  %v2029_v60 = vmax.f32 %v2013_v40, 0.0  ;;  %v1948_v14 = vmul.f32 %v5051_v19, %v6160_v32  ;;  %v1947_v35 = vmul.f32 %v5051_v19, %v6157_v48 }
 0x91b   :  { %v5053_v55 = vpop.eup %5052 }
 0x91c   :  { %v2073_v5 = vpack.c.bf16 %v2030_v38, %v2028_v6  ;;  %v2072_v36 = vpack.c.bf16 %v2029_v60, %v2027_v28  ;;  %v1950_v42 = vmul.f32 %v5053_v55, %v6166_v59  ;;  %v1982_v49 = vmul.f32 %v6188_v46, %v1948_v14 }
 0x91d   :  { %v1949_v23 = vmul.f32 %v5053_v55, %v6163_v13  ;;  %v1981_v20 = vmul.f32 %v6185_v53, %v1947_v35 }
 0x91e   :  { %2226 = vmatprep.mubr.bf16.mxu0 %v2073_v5  ;;  %v1984_v51 = vmul.f32 %v6188_v46, %v1950_v42  ;;  %v2016_v54 = vadd.f32 %v6193_v25, %v1982_v49  ;;  %v6244_v46 = vld [vmem:[#allocation13 + $0x4] sm:$0x7] }
 0x91f   :  { %2227 = vmatmul.mubr.bf16.gmra.mrb[32].mxu0 %v2072_v36  ;;  %v1983_v32 = vmul.f32 %v6185_v53, %v1949_v23  ;;  %v2015_v48 = vadd.f32 %v6196_v44, %v1981_v20  ;;  %v2081_v53 = vrot.slane %v6244_v46, %v5799_v22 }
 0x920   :  { %v2018_v43 = vadd.f32 %v6193_v25, %v1984_v51  ;;  %v2032_v41 = vmax.f32 %v2016_v54, 0.0 }
 0x921   :  { %v2017_v59 = vadd.f32 %v6196_v44, %v1983_v32  ;;  %v2031_v61 = vmax.f32 %v2015_v48, 0.0 }
 0x922   :  { %v2034_v27 = vmax.f32 %v2018_v43, 0.0 }
 0x923   :  { %v2033_v13 = vmax.f32 %v2017_v59, 0.0 }
 0x924   :  { %v2075_v7 = vpack.c.bf16 %v2034_v27, %v2032_v41 }
 0x925   :  { %v2074_v2 = vpack.c.bf16 %v2033_v13, %v2031_v61 }
 0x926   :  { %2234 = vmatprep.mubr.bf16.mxu0 %v2075_v7 }
 0x927   :  { %2235 = vmatmul.mubr.bf16.gmra.mrb[36].mxu0 %v2074_v2 }
 0x9e2   :  { %v4472_v37 = vpop.f32.mrb[24].mxu0 }
 0x9e3   :  { %v4473_v63 = vpop.f32.mrb[25].mxu0 }
 0x9e4   :  { %v4474_v31 = vadd.f32 %v4473_v63, %v4472_v37  ;;  %v4475_v21 = vpop.f32.mrb[26].mxu0 }
 0x9e5   :  { %v4476_v25 = vpop.f32.mrb[27].mxu0 }
 0x9e6   :  { %v4477_v18 = vadd.f32 %v4476_v25, %v4475_v21  ;;  %v2213_v44 = vadd.f32 %v4474_v31, %v2081_v53 }
 0x9e8   :  { %2243 = vadd.xlane.f32.xlu0 %v2213_v44  ;;  %v2216_v34 = vadd.f32 %v4477_v18, %v2081_v53 }
 0x9ea   :  { %v4478_v45 = vpop.f32.mrb[28].mxu0  ;;  %2245 = vadd.xlane.f32.xlu1 %v2216_v34 }
 0x9eb   :  { %v4479_v9 = vpop.f32.mrb[29].mxu0 }
 0x9ec   :  { %v4480_v29 = vadd.f32 %v4479_v9, %v4478_v45  ;;  %v4481_v30 = vpop.f32.mrb[30].mxu0 }
 0x9ed   :  { %v4482_v57 = vpop.f32.mrb[31].mxu0 }
 0x9ee   :  { %v4483_v39 = vadd.f32 %v4482_v57, %v4481_v30  ;;  %v2221_v4 = vadd.f32 %v4480_v29, %v2081_v53 }
 0x9f0   :  { %2247 = vadd.xlane.f32.xlu0 %v2221_v4  ;;  %v2224_v58 = vadd.f32 %v4483_v39, %v2081_v53 }
 0x9f2   :  { %v4484_v52 = vpop.f32.mrb[32].mxu0  ;;  %2249 = vadd.xlane.f32.xlu1 %v2224_v58 }
 0x9f3   :  { %v4485_v62 = vpop.f32.mrb[33].mxu0 }
 0x9f4   :  { %v4486_v8 = vadd.f32 %v4485_v62, %v4484_v52  ;;  %v4487_v33 = vpop.f32.mrb[34].mxu0  ;;  %v4871_v62 = vld [vmem:[#allocation16 + $0x88] sm:$0xff]  }
 0x9f5   :  { %v4488_v40 = vpop.f32.mrb[35].mxu0 }
 0x9f6   :  { %v4489_v19 = vadd.f32 %v4488_v40, %v4487_v33  ;;  %v2229_v6 = vadd.f32 %v4486_v8, %v2081_v53  ;;  %v4872_v8 = vld [vmem:[#allocation16 + $0x90] sm:$0xff]   ;;  %v4873_v33 = vld [vmem:[#allocation16 + $0x98] sm:$0xff]   ;;  %v4874_v40 = vld [vmem:[#allocation16 + $0xa0] sm:$0xff]  }
 0x9f8   :  { %2251 = vadd.xlane.f32.xlu0 %v2229_v6  ;;  %v2232_v28 = vadd.f32 %v4489_v19, %v2081_v53  ;;  %v4875_v19 = vld [vmem:[#allocation16 + $0xa8] sm:$0xff]  }
 0x9fa   :  { %v4490_v38 = vpop.f32.mrb[36].mxu0  ;;  %2253 = vadd.xlane.f32.xlu1 %v2232_v28 }
 0x9fb   :  { %v4491_v60 = vpop.f32.mrb[37].mxu0 }
 0x9fc   :  { %v4492_v14 = vadd.f32 %v4491_v60, %v4490_v38  ;;  %v4493_v35 = vpop.f32.mrb[38].mxu0 }
 0x9fd   :  { %v4494_v55 = vpop.f32.mrb[39].mxu0 }
 0x9fe   :  { %v4495_v5 = vadd.f32 %v4494_v55, %v4493_v35  ;;  %v2237_v36 = vadd.f32 %v4492_v14, %v2081_v53 }
 0xa00   :  { %2255 = vadd.xlane.f32.xlu0 %v2237_v36  ;;  %v2240_v42 = vadd.f32 %v4495_v5, %v2081_v53 }
 0xa02   :  { %2257 = vadd.xlane.f32.xlu1 %v2240_v42 }
 0xa75   :  { %v2244_v49 = vpop.xlane.xlu0 %2243 }
 0xa76   :  { %v2260_v23 = vmul.f32 0.0078125, %v2244_v49 }
 0xa77   :  { %v2246_v20 = vpop.xlane.xlu1 %2245 }
 0xa78   :  { %v6248_v51 = vsub.f32 %v2213_v44, %v2260_v23  ;;  %v2261_v54 = vmul.f32 0.0078125, %v2246_v20 }
 0xa7a   :  { %v6250_v32 = vsub.f32 %v2216_v34, %v2261_v54  ;;  %v2276_v48 = vmul.f32 %v6248_v51, %v6248_v51 }
 0xa7c   :  { %2284 = vadd.xlane.f32.xlu0 %v2276_v48  ;;  %v2277_v43 = vmul.f32 %v6250_v32, %v6250_v32  ;;  %v6282_v48 = vrot.slane %v6244_v46, %v5896_v1 }
 0xa7d   :  { %v2248_v59 = vpop.xlane.xlu0 %2247 }
 0xa7e   :  { %v2262_v41 = vmul.f32 0.0078125, %v2248_v59  ;;  %2286 = vadd.xlane.f32.xlu1 %v2277_v43  ;;  %v6286_v59 = vrot.slane %v6244_v46, %v5905_v16 }
 0xa7f   :  { %v2250_v27 = vpop.xlane.xlu1 %2249 }
 0xa80   :  { %v6256_v61 = vsub.f32 %v2221_v4, %v2262_v41  ;;  %v2263_v13 = vmul.f32 0.0078125, %v2250_v27 }
 0xa82   :  { %v6258_v7 = vsub.f32 %v2224_v58, %v2263_v13  ;;  %v2278_v2 = vmul.f32 %v6256_v61, %v6256_v61  ;;  %v4870_v58 = vld [vmem:[#allocation16 + $0x80] sm:$0xff]  }
 0xa83   :  { %4638 = vmatprep.subr.bf16.mxu0 %v4870_v58 }
 0xa84   :  { %2288 = vadd.xlane.f32.xlu0 %v2278_v2  ;;  %v2279_v37 = vmul.f32 %v6258_v7, %v6258_v7  ;;  %4639 = vmatpush3.bf16.msra.mxu0 %v4870_v58 }
 0xa85   :  { %v2252_v53 = vpop.xlane.xlu0 %2251  ;;  %4640 = vmatprep.subr.bf16.mxu0 %v4871_v62 }
 0xa86   :  { %v2264_v63 = vmul.f32 0.0078125, %v2252_v53  ;;  %2290 = vadd.xlane.f32.xlu1 %v2279_v37 }
 0xa87   :  { %v2254_v31 = vpop.xlane.xlu1 %2253 }
 0xa88   :  { %v6264_v21 = vsub.f32 %v2229_v6, %v2264_v63  ;;  %v2265_v25 = vmul.f32 0.0078125, %v2254_v31  ;;  %4641 = vmatpush3.bf16.msra.mxu0 %v4871_v62  ;;  %v4876_v6 = vld [vmem:[#allocation16 + $0xb0] sm:$0xff]  }
 0xa89   :  { %4642 = vmatprep.subr.bf16.mxu0 %v4872_v8 }
 0xa8a   :  { %v6266_v18 = vsub.f32 %v2232_v28, %v2265_v25  ;;  %v2280_v44 = vmul.f32 %v6264_v21, %v6264_v21  ;;  %v4877_v28 = vld [vmem:[#allocation16 + $0xb8] sm:$0xff]  }
 0xa8c   :  { %2292 = vadd.xlane.f32.xlu0 %v2280_v44  ;;  %v2281_v34 = vmul.f32 %v6266_v18, %v6266_v18  ;;  %4643 = vmatpush3.bf16.msra.mxu0 %v4872_v8 }
 0xa8d   :  { %v2256_v45 = vpop.xlane.xlu0 %2255  ;;  %4644 = vmatprep.subr.bf16.mxu0 %v4873_v33 }
 0xa8e   :  { %v2266_v9 = vmul.f32 0.0078125, %v2256_v45  ;;  %2294 = vadd.xlane.f32.xlu1 %v2281_v34 }
 0xa8f   :  { %v2258_v29 = vpop.xlane.xlu1 %2257 }
 0xa90   :  { %v6272_v30 = vsub.f32 %v2237_v36, %v2266_v9  ;;  %v2267_v57 = vmul.f32 0.0078125, %v2258_v29  ;;  %4645 = vmatpush3.bf16.msra.mxu0 %v4873_v33 }
 0xa91   :  { %4646 = vmatprep.subr.bf16.mxu0 %v4874_v40 }
 0xa92   :  { %v6274_v39 = vsub.f32 %v2240_v42, %v2267_v57  ;;  %v2282_v4 = vmul.f32 %v6272_v30, %v6272_v30 }
 0xa94   :  { %2296 = vadd.xlane.f32.xlu0 %v2282_v4  ;;  %v2283_v52 = vmul.f32 %v6274_v39, %v6274_v39  ;;  %4647 = vmatpush3.bf16.msra.mxu0 %v4874_v40 }
 0xa95   :  { %4648 = vmatprep.subr.bf16.mxu0 %v4875_v19 }
 0xa96   :  { %2298 = vadd.xlane.f32.xlu1 %v2283_v52 }
 0xa98   :  { %4649 = vmatpush3.bf16.msra.mxu0 %v4875_v19 }
 0xa99   :  { %4650 = vmatprep.subr.bf16.mxu0 %v4876_v6 }
 0xa9c   :  { %4651 = vmatpush3.bf16.msra.mxu0 %v4876_v6 }
 0xa9d   :  { %4652 = vmatprep.subr.bf16.mxu0 %v4877_v28 }
 0xaa0   :  { %4653 = vmatpush3.bf16.msra.mxu0 %v4877_v28 }
 0xb09   :  { %v2285_v38 = vpop.xlane.xlu0 %2284 }
 0xb0a   :  { %v2300_v60 = vmul.f32 0.0078125, %v2285_v38 }
 0xb0b   :  { %v2287_v14 = vpop.xlane.xlu1 %2286 }
 0xb0c   :  { %v2308_v35 = vadd.f32 1e-05, %v2300_v60  ;;  %v2301_v55 = vmul.f32 0.0078125, %v2287_v14 }
 0xb0e   :  { %5054 = vrsqrt.f32 %v2308_v35  ;;  %v2309_v5 = vadd.f32 1e-05, %v2301_v55 }
 0xb10   :  { %5056 = vrsqrt.f32 %v2309_v5 }
 0xb11   :  { %v2289_v36 = vpop.xlane.xlu0 %2288 }
 0xb12   :  { %v2302_v42 = vmul.f32 0.0078125, %v2289_v36 }
 0xb13   :  { %v2291_v49 = vpop.xlane.xlu1 %2290 }
 0xb14   :  { %v2310_v23 = vadd.f32 1e-05, %v2302_v42  ;;  %v2303_v20 = vmul.f32 0.0078125, %v2291_v49 }
 0xb16   :  { %5058 = vrsqrt.f32 %v2310_v23  ;;  %v2311_v54 = vadd.f32 1e-05, %v2303_v20 }
 0xb18   :  { %v5055_v43 = vpop.eup %5054  ;;  %5060 = vrsqrt.f32 %v2311_v54 }
 0xb19   :  { %v2324_v41 = vmul.f32 %v5055_v43, %v6248_v51  ;;  %v2293_v27 = vpop.xlane.xlu0 %2292 }
 0xb1a   :  { %v5057_v13 = vpop.eup %5056  ;;  %v2304_v2 = vmul.f32 0.0078125, %v2293_v27 }
 0xb1b   :  { %v2336_v37 = vmul.f32 %v6282_v48, %v2324_v41  ;;  %v2325_v53 = vmul.f32 %v5057_v13, %v6250_v32  ;;  %v2295_v63 = vpop.xlane.xlu1 %2294 }
 0xb1c   :  { %v2312_v31 = vadd.f32 1e-05, %v2304_v2  ;;  %v2305_v25 = vmul.f32 0.0078125, %v2295_v63 }
 0xb1d   :  { %v2337_v44 = vmul.f32 %v6282_v48, %v2325_v53  ;;  %v2348_v34 = vadd.f32 %v6286_v59, %v2336_v37 }
 0xb1e   :  { %5062 = vrsqrt.f32 %v2312_v31  ;;  %v2313_v45 = vadd.f32 1e-05, %v2305_v25 }
 0xb1f   :  { %v2349_v46 = vadd.f32 %v6286_v59, %v2337_v44  ;;  %v2356_v9 = vmax.f32 %v2348_v34, 0.0 }
 0xb20   :  { %v5059_v51 = vpop.eup %5058  ;;  %5064 = vrsqrt.f32 %v2313_v45 }
 0xb21   :  { %v2326_v29 = vmul.f32 %v5059_v51, %v6256_v61  ;;  %v2297_v57 = vpop.xlane.xlu0 %2296  ;;  %v2357_v4 = vmax.f32 %v2349_v46, 0.0  ;;  %v6298_v33 = vadd.f32 %v2356_v9, %v5977_v0 }
 0xb22   :  { %v5061_v58 = vpop.eup %5060  ;;  %v2306_v32 = vmul.f32 0.0078125, %v2297_v57 }
 0xb23   :  { %v2338_v52 = vmul.f32 %v6282_v48, %v2326_v29  ;;  %v2327_v62 = vmul.f32 %v5061_v58, %v6258_v7  ;;  %v2299_v8 = vpop.xlane.xlu1 %2298  ;;  %v6301_v40 = vadd.f32 %v2357_v4, %v5979_v12 }
 0xb24   :  { %v2314_v19 = vadd.f32 1e-05, %v2306_v32  ;;  %v2307_v6 = vmul.f32 0.0078125, %v2299_v8  ;;  %v2530_v32 = vstv %s4302_s23 }
 0xb25   :  { %v2350_v28 = vadd.f32 %v6286_v59, %v2338_v52  ;;  %v2339_v61 = vmul.f32 %v6282_v48, %v2327_v62  ;;  %v2388_v38 = vpack.c.bf16 %v6301_v40, %v6298_v33  ;;  %v2515_v25 = vmax.f32 %v6301_v40, 0.0 }
 0xb26   :  { %5066 = vrsqrt.f32 %v2314_v19  ;;  %v2315_v60 = vadd.f32 1e-05, %v2307_v6 }
 0xb27   :  { %v2358_v14 = vmax.f32 %v2350_v28, 0.0  ;;  %v2351_v7 = vadd.f32 %v6286_v59, %v2339_v61  ;;  %4654 = vmatprep.mubr.bf16.mxu0 %v2388_v38  ;;  %v2523_v57 = vadd.f32 1e-07, %v2515_v25 }
 0xb28   :  { %v5063_v0 = vpop.eup %5062  ;;  %5068 = vrsqrt.f32 %v2315_v60 }
 0xb29   :  { %v2359_v35 = vmax.f32 %v2351_v7, 0.0  ;;  %v2328_v12 = vmul.f32 %v5063_v0, %v6264_v21  ;;  %v6310_v5 = vadd.f32 %v2358_v14, %v5983_v26  ;;  %v2532_v28 = vmul.f32 %v2530_v32, %v2523_v57 }
 0xb2a   :  { %v5065_v55 = vpop.eup %5064 }
 0xb2b   :  { %v6313_v36 = vadd.f32 %v2359_v35, %v5985_v3  ;;  %v2340_v42 = vmul.f32 %v6282_v48, %v2328_v12  ;;  %v2329_v49 = vmul.f32 %v5065_v55, %v6266_v18 }
 0xb2d   :  { %v2341_v23 = vmul.f32 %v6282_v48, %v2329_v49  ;;  %v2389_v20 = vpack.c.bf16 %v6313_v36, %v6310_v5  ;;  %v2352_v54 = vadd.f32 %v6286_v59, %v2340_v42  ;;  %v2517_v34 = vmax.f32 %v6313_v36, 0.0 }
 0xb2f   :  { %4655 = vmatmul.mubr.bf16.vlgmr.msra.gmra.mrb[16].mxu0 %v2389_v20  ;;  %v2353_v21 = vadd.f32 %v6286_v59, %v2341_v23  ;;  %v2360_v26 = vmax.f32 %v2352_v54, 0.0  ;;  %v6355_v58 = vadd.f32 1e-07, %v2517_v34 }
 0xb30   :  { %v5067_v43 = vpop.eup %5066 }
 0xb31   :  { %v2330_v41 = vmul.f32 %v5067_v43, %v6272_v30  ;;  %v2361_v3 = vmax.f32 %v2353_v21, 0.0  ;;  %v6326_v2 = vadd.f32 %v2360_v26, %v5989_v50  ;;  %v2534_v14 = vmul.f32 %v2530_v32, %v6355_v58 }
 0xb32   :  { %v5069_v27 = vpop.eup %5068 }
 0xb33   :  { %v2342_v13 = vmul.f32 %v6282_v48, %v2330_v41  ;;  %v2331_v18 = vmul.f32 %v5069_v27, %v6274_v39  ;;  %v6329_v37 = vadd.f32 %v2361_v3, %v5991_v56  ;;  %v2518_v39 = vmax.f32 %v6326_v2, 0.0 }
 0xb34   :  { %v2516_v56 = vmax.f32 %v6310_v5, 0.0 }
 0xb35   :  { %v2343_v53 = vmul.f32 %v6282_v48, %v2331_v18  ;;  %v2390_v63 = vpack.c.bf16 %v6329_v37, %v6326_v2  ;;  %v2519_v30 = vmax.f32 %v6329_v37, 0.0  ;;  %v2354_v31 = vadd.f32 %v6286_v59, %v2342_v13 }
 0xb36   :  { %v2514_v48 = vmax.f32 %v6298_v33, 0.0  ;;  %v6347_v51 = vadd.f32 1e-07, %v2518_v39  ;;  %v6353_v4 = vadd.f32 1e-07, %v2516_v56 }
 0xb37   :  { %4658 = vmatprep.mubr.bf16.mxu0 %v2390_v63  ;;  %v2355_v50 = vadd.f32 %v6286_v59, %v2343_v53  ;;  %v2362_v44 = vmax.f32 %v2354_v31, 0.0  ;;  %v6342_v45 = vadd.f32 1e-07, %v2519_v30 }
 0xb38   :  { %v2522_v52 = vadd.f32 1e-07, %v2514_v48  ;;  %v2535_v61 = vmul.f32 %v2530_v32, %v6347_v51  ;;  %v2533_v60 = vmul.f32 %v2530_v32, %v6353_v4 }
 0xb39   :  { %v2363_v46 = vmax.f32 %v2355_v50, 0.0  ;;  %v6345_v9 = vadd.f32 %v2362_v44, %v6003_v10  ;;  %v2536_v19 = vmul.f32 %v2530_v32, %v6342_v45 }
 0xb3a   :  { %v2531_v38 = vmul.f32 %v2530_v32, %v2522_v52 }
 0xb3b   :  { %v6350_v29 = vadd.f32 %v2363_v46, %v6010_v47  ;;  %v2520_v59 = vmax.f32 %v6345_v9, 0.0  ;;  %v2540_v0 = vmax.f32 %v2532_v28, %v2536_v19 }
 0xb3c   :  { %v2539_v55 = vmax.f32 %v2531_v38, %v2535_v61 }
 0xb3d   :  { %v2391_v62 = vpack.c.bf16 %v6350_v29, %v6345_v9  ;;  %v2521_v10 = vmax.f32 %v6350_v29, 0.0  ;;  %v6360_v8 = vadd.f32 1e-07, %v2520_v59 }
 0xb3e   :  { %v2543_v42 = vmax.f32 %v2539_v55, %v2540_v0 }
 0xb3f   :  { %4659 = vmatmul.mubr.bf16.gmra.mrb[20].mxu0 %v2391_v62  ;;  %v6363_v47 = vadd.f32 1e-07, %v2521_v10  ;;  %v2537_v6 = vmul.f32 %v2530_v32, %v6360_v8 }
 0xb41   :  { %v2538_v7 = vmul.f32 %v2530_v32, %v6363_v47  ;;  %v2541_v35 = vmax.f32 %v2533_v60, %v2537_v6 }
 0xb43   :  { %v2542_v12 = vmax.f32 %v2534_v14, %v2538_v7 }
 0xb45   :  { %v2544_v49 = vmax.f32 %v2541_v35, %v2542_v12 }
 0xb47   :  { %v2545_v23 = vmax.f32 %v2543_v42, %v2544_v49 }
 0xb49   :  { %v2546_v20 = vrot.slane %v2545_v23, 4 }
 0xb4b   :  { %v2547_v54 = vmax.f32 %v2545_v23, %v2546_v20  ;;  %v4880_v20 = vld [vmem:[#allocation10 + $0x104] ss:$8 sps:$4 sm:$0xff]  }
 0xb4d   :  { %v2548_v21 = vrot.slane %v2547_v54, 2 }
 0xb4f   :  { %v2549_v43 = vmax.f32 %v2547_v54, %v2548_v21  ;;  %v4878_v21 = vld [vmem:[#allocation10 + $0x100] ss:$8 sps:$4 sm:$0xff]  }
 0xb51   :  { %v2550_v26 = vrot.slane %v2549_v43, 1 }
 0xb53   :  { %v2551_v41 = vmax.f32 %v2549_v43, %v2550_v26  ;;  %v5204_v43 = vld [vmem:[#allocation3] sm:$0xff]   ;;  %v5207_v26 = vld [vmem:[#allocation3 + $0x18] sm:$0xff]  }
 0xb55   :  { %v2552_v3 = vsub.f32 %v2531_v38, %v2551_v41  ;;  %v2553_v27 = vsub.f32 %v2532_v28, %v2551_v41  ;;  %v2554_v13 = vsub.f32 %v2533_v60, %v2551_v41  ;;  %v2555_v18 = vsub.f32 %v2534_v14, %v2551_v41 }
 0xb56   :  { %v2556_v53 = vsub.f32 %v2535_v61, %v2551_v41  ;;  %v2557_v63 = vsub.f32 %v2536_v19, %v2551_v41  ;;  %v2558_v44 = vsub.f32 %v2537_v6, %v2551_v41  ;;  %v2559_v34 = vsub.f32 %v2538_v7, %v2551_v41  ;;  %v4884_v41 = vld [vmem:[#allocation10 + $0x120] ss:$8 sps:$4 sm:$0xff]  }
 0xb57   :  { %v2560_v30 = vmul.f32 1.442695, %v2552_v3  ;;  %v2562_v31 = vmul.f32 1.442695, %v2553_v27  ;;  %v2564_v25 = vmul.f32 1.442695, %v2554_v13 }
 0xb58   :  { %v2566_v39 = vmul.f32 1.442695, %v2555_v18  ;;  %v2568_v50 = vmul.f32 1.442695, %v2556_v53  ;;  %v2570_v56 = vmul.f32 1.442695, %v2557_v63 }
 0xb59   :  { %5070 = vpow2.f32 %v2560_v30  ;;  %v2572_v48 = vmul.f32 1.442695, %v2558_v44  ;;  %v2574_v46 = vmul.f32 1.442695, %v2559_v34  ;;  %v4886_v3 = vld [vmem:[#allocation10 + $0x124] ss:$8 sps:$4 sm:$0xff]  }
 0xb5a   :  { %5072 = vpow2.f32 %v2562_v31  ;;  %v4889_v27 = vld [vmem:[#allocation10 + $0x134] ss:$8 sps:$4 sm:$0xff]   ;;  %v4887_v13 = vld [vmem:[#allocation10 + $0x130] ss:$8 sps:$4 sm:$0xff]   ;;  %v4892_v18 = vld [vmem:[#allocation10 + $0x144] ss:$8 sps:$4 sm:$0xff]  }
 0xb5b   :  { %5074 = vpow2.f32 %v2564_v25  ;;  %v4890_v53 = vld [vmem:[#allocation10 + $0x140] ss:$8 sps:$4 sm:$0xff]   ;;  %v4895_v63 = vld [vmem:[#allocation10 + $0x154] ss:$8 sps:$4 sm:$0xff]   ;;  %v4893_v30 = vld [vmem:[#allocation10 + $0x150] ss:$8 sps:$4 sm:$0xff]  }
 0xb5c   :  { %5076 = vpow2.f32 %v2566_v39  ;;  %v4898_v31 = vld [vmem:[#allocation10 + $0x164] ss:$8 sps:$4 sm:$0xff]   ;;  %v4896_v25 = vld [vmem:[#allocation10 + $0x160] ss:$8 sps:$4 sm:$0xff]   ;;  %v4901_v39 = vld [vmem:[#allocation10 + $0x174] ss:$8 sps:$4 sm:$0xff]  }
 0xb5d   :  { %5078 = vpow2.f32 %v2568_v50  ;;  %v4899_v50 = vld [vmem:[#allocation10 + $0x170] ss:$8 sps:$4 sm:$0xff]  }
 0xb5e   :  { %5080 = vpow2.f32 %v2570_v56 }
 0xb5f   :  { %5082 = vpow2.f32 %v2572_v48 }
 0xb60   :  { %5084 = vpow2.f32 %v2574_v46 }
 0xb63   :  { %v5071_v59 = vpop.eup %5070 }
 0xb64   :  { %v5073_v32 = vpop.eup %5072  ;;  %v2576_v62 = vmul.f32 %v5071_v59, %v2522_v52 }
 0xb65   :  { %v5075_v10 = vpop.eup %5074  ;;  %v2588_v19 = vpack.c.bf16 %v5073_v32, %v5071_v59  ;;  %v2577_v28 = vmul.f32 %v5073_v32, %v2523_v57 }
 0xb66   :  { %v5077_v61 = vpop.eup %5076  ;;  %v2578_v60 = vmul.f32 %v5075_v10, %v6353_v4 }
 0xb67   :  { %v5079_v38 = vpop.eup %5078  ;;  %2592 = vmatprep.subr.bf16.mxu1 %v2588_v19  ;;  %v2584_v6 = vpack.c.bf16 %v2577_v28, %v2576_v62  ;;  %v2579_v14 = vmul.f32 %v5077_v61, %v6355_v58  ;;  %v2589_v0 = vpack.c.bf16 %v5077_v61, %v5075_v10 }
 0xb68   :  { %v5081_v7 = vpop.eup %5080  ;;  %v2580_v55 = vmul.f32 %v5079_v38, %v6347_v51  ;;  %v4883_v51 = vld [vmem:[#allocation10 + $0x114] ss:$8 sps:$4 sm:$0xff]  }
 0xb69   :  { %2593 = vmatpush1.bf16.msra.mxu1 %v2584_v6  ;;  %v5083_v35 = vpop.eup %5082  ;;  %v2585_v12 = vpack.c.bf16 %v2579_v14, %v2578_v60  ;;  %v2581_v52 = vmul.f32 %v5081_v7, %v6342_v45  ;;  %v2590_v57 = vpack.c.bf16 %v5081_v7, %v5079_v38  ;;  %v4881_v45 = vld [vmem:[#allocation10 + $0x110] ss:$8 sps:$4 sm:$0xff]  }
 0xb6a   :  { %2594 = vmatprep.subr.bf16.mxu1 %v2589_v0  ;;  %v5085_v42 = vpop.eup %5084  ;;  %v2582_v23 = vmul.f32 %v5083_v35, %v6360_v8  ;;  %v5205_v8 = vld [vmem:[#allocation3 + $0x8] sm:$0xff]  }
 0xb6b   :  { %v2586_v49 = vpack.c.bf16 %v2581_v52, %v2580_v55  ;;  %v2583_v4 = vmul.f32 %v5085_v42, %v6363_v47  ;;  %v2591_v58 = vpack.c.bf16 %v5085_v42, %v5083_v35  ;;  %v5206_v47 = vld [vmem:[#allocation3 + $0x10] sm:$0xff]  }
 0xb6d   :  { %2595 = vmatpush1.bf16.msra.mxu1 %v2585_v12  ;;  %v2587_v54 = vpack.c.bf16 %v2583_v4, %v2582_v23 }
 0xb6e   :  { %2596 = vmatprep.subr.bf16.mxu1 %v2590_v57 }
 0xb71   :  { %2597 = vmatpush1.bf16.msra.mxu1 %v2586_v49 }
 0xb72   :  { %2598 = vmatprep.subr.bf16.mxu1 %v2591_v58 }
 0xb75   :  { %2599 = vmatpush1.bf16.msra.mxu1 %v2587_v54 }
 0xb76   :  { %2835 = vmatprep.subr.bf16.mxu1 %v4880_v20 }
 0xb78   :  { %4303 = vmatmul.mubr.msk.bf16.vlgmr.msra.gmra.mrb[72].mxu1 %vm240_vm0, %v5204_v43 }
 0xb79   :  { %2634 = vmatprep.mubr.bf16.mxu1 %v5447_v17  ;;  %2836 = vmatpush1.bf16.msra.mxu1 %v4878_v21 }
 0xb7a   :  { %2837 = vmatprep.subr.bf16.mxu1 %v4883_v51 }
 0xb7d   :  { %2838 = vmatpush1.bf16.msra.mxu1 %v4881_v45 }
 0xb7e   :  { %2839 = vmatprep.subr.bf16.mxu1 %v4886_v3 }
 0xb80   :  { %4304 = vmatmul.mubr.msk.bf16.gmra.mrb[76].mxu1 %vm240_vm0, %v5205_v8 }
 0xb81   :  { %2644 = vmatprep.mubr.bf16.mxu1 %v5447_v17  ;;  %2840 = vmatpush1.bf16.msra.mxu1 %v4884_v41 }
 0xb82   :  { %2841 = vmatprep.subr.bf16.mxu1 %v4889_v27 }
 0xb85   :  { %2842 = vmatpush1.bf16.msra.mxu1 %v4887_v13 }
 0xb86   :  { %2843 = vmatprep.subr.bf16.mxu1 %v4892_v18 }
 0xb88   :  { %4305 = vmatmul.mubr.msk.bf16.gmra.mrb[80].mxu1 %vm240_vm0, %v5206_v47 }
 0xb89   :  { %2654 = vmatprep.mubr.bf16.mxu1 %v5447_v17  ;;  %2844 = vmatpush1.bf16.msra.mxu1 %v4890_v53 }
 0xb8a   :  { %2845 = vmatprep.subr.bf16.mxu1 %v4895_v63 }
 0xb8d   :  { %2846 = vmatpush1.bf16.msra.mxu1 %v4893_v30 }
 0xb8e   :  { %2847 = vmatprep.subr.bf16.mxu1 %v4898_v31 }
 0xb90   :  { %4306 = vmatmul.mubr.msk.bf16.gmra.mrb[84].mxu1 %vm240_vm0, %v5207_v26 }
 0xb91   :  { %2867 = vmatprep.mubr.bf16.mxu1 %v5447_v17  ;;  %2848 = vmatpush1.bf16.msra.mxu1 %v4896_v25 }
 0xb92   :  { %2849 = vmatprep.subr.bf16.mxu1 %v4901_v39 }
 0xb95   :  { %2850 = vmatpush1.bf16.msra.mxu1 %v4899_v50 }
 0xc4b   :  { %v2626_v44 = vpop.f32.mrb[72].mxu1 }
 0xc4c   :  { %v2628_v56 = vpop.f32.mrb[73].mxu1 }
 0xc4d   :  { %vm2665_vm2 = vcmp.gt.f32.partialorder %v2628_v56, 0.0  ;;  %v2630_v34 = vpop.f32.mrb[74].mxu1 }
 0xc4e   :  { %v2673_v48 = vsel %vm2665_vm2, %v2628_v56, 1.0  ;;  %v2632_v46 = vpop.f32.mrb[75].mxu1 }
 0xc4f   :  { %5086 = vrcp.f32 %v2673_v48  ;;  %vm2666_vm3 = vcmp.gt.f32.partialorder %v2632_v46, 0.0 }
 0xc50   :  { %v2674_v59 = vsel %vm2666_vm3, %v2632_v46, 1.0 }
 0xc51   :  { %5088 = vrcp.f32 %v2674_v59 }
 0xc53   :  { %v2636_v32 = vpop.f32.mrb[76].mxu1 }
 0xc54   :  { %v2638_v62 = vpop.f32.mrb[77].mxu1 }
 0xc55   :  { %vm2667_vm4 = vcmp.gt.f32.partialorder %v2638_v62, 0.0  ;;  %v2640_v10 = vpop.f32.mrb[78].mxu1 }
 0xc56   :  { %v2675_v19 = vsel %vm2667_vm4, %v2638_v62, 1.0  ;;  %v2642_v28 = vpop.f32.mrb[79].mxu1 }
 0xc57   :  { %5090 = vrcp.f32 %v2675_v19  ;;  %vm2668_vm5 = vcmp.gt.f32.partialorder %v2642_v28, 0.0 }
 0xc58   :  { %v2676_v61 = vsel %vm2668_vm5, %v2642_v28, 1.0 }
 0xc59   :  { %v5087_v38 = vpop.eup %5086  ;;  %5092 = vrcp.f32 %v2676_v61  ;;  %v6415_v61 = vld [vmem:[%s6763_s6 + $0x10] sm:$0x77]  ;;  %s5400_s6 = scalar_lea.vmem %s4178_s2, 32 }
 0xc5a   :  { %v2689_v6 = vmul.f32 %v5087_v38, %v2626_v44  ;;  %v2740_v38 = vrot.slane %v6415_v61, %v5799_v22 }
 0xc5b   :  { %v5089_v60 = vpop.eup %5088  ;;  %v2646_v14 = vpop.f32.mrb[80].mxu1 }
 0xc5c   :  { %v2697_v7 = vsel %vm2665_vm2, %v2689_v6, 0.0  ;;  %v2690_v0 = vmul.f32 %v5089_v60, %v2630_v34  ;;  %v2648_v35 = vpop.f32.mrb[81].mxu1  ;;  %v2744_v6 = vrot.slane %v6415_v61, %v5807_v24  ;;  %v2750_v60 = vrot.slane %v2740_v38, %v5799_v22 }
 0xc5d   :  { %vm2669_vm6 = vcmp.gt.f32.partialorder %v2648_v35, 0.0  ;;  %v2650_v12 = vpop.f32.mrb[82].mxu1  ;;  %v2705_v57 = vadd.f32 %v2697_v7, %v6298_v33 }
 0xc5e   :  { %v2698_v55 = vsel %vm2666_vm3, %v2690_v0, 0.0  ;;  %v2677_v52 = vsel %vm2669_vm6, %v2648_v35, 1.0  ;;  %v2652_v42 = vpop.f32.mrb[83].mxu1 }
 0xc5f   :  { %v2706_v49 = vadd.f32 %v2698_v55, %v6301_v40  ;;  %5094 = vrcp.f32 %v2677_v52  ;;  %vm2670_vm7 = vcmp.gt.f32.partialorder %v2652_v42, 0.0 }
 0xc60   :  { %v2678_v23 = vsel %vm2670_vm7, %v2652_v42, 1.0 }
 0xc61   :  { %v5091_v4 = vpop.eup %5090  ;;  %v2732_v58 = vpack.c.bf16 %v2706_v49, %v2705_v57  ;;  %5096 = vrcp.f32 %v2678_v23 }
 0xc62   :  { %v2691_v20 = vmul.f32 %v5091_v4, %v2636_v32 }
 0xc63   :  { %v5093_v54 = vpop.eup %5092  ;;  %v2656_v21 = vpop.f32.mrb[84].mxu1  ;;  %2868 = vmatmul.mubr.bf16.vlgmr.msra.gmra.mrb[88].mxu1 %v2732_v58 }
 0xc64   :  { %v2699_v51 = vsel %vm2667_vm4, %v2691_v20, 0.0  ;;  %v2692_v43 = vmul.f32 %v5093_v54, %v2640_v10  ;;  %v2658_v45 = vpop.f32.mrb[85].mxu1  ;;  %2877 = vmatprep.mubr.bf16.mxu1 %v5447_v17 }
 0xc65   :  { %vm2671_vm8 = vcmp.gt.f32.partialorder %v2658_v45, 0.0  ;;  %v2660_v8 = vpop.f32.mrb[86].mxu1  ;;  %v2707_v3 = vadd.f32 %v2699_v51, %v6310_v5 }
 0xc66   :  { %v2700_v47 = vsel %vm2668_vm5, %v2692_v43, 0.0  ;;  %v2679_v26 = vsel %vm2671_vm8, %v2658_v45, 1.0  ;;  %v2662_v41 = vpop.f32.mrb[87].mxu1 }
 0xc67   :  { %v2708_v27 = vadd.f32 %v2700_v47, %v6313_v36  ;;  %5098 = vrcp.f32 %v2679_v26  ;;  %vm2672_vm9 = vcmp.gt.f32.partialorder %v2662_v41, 0.0 }
 0xc68   :  { %v2680_v13 = vsel %vm2672_vm9, %v2662_v41, 1.0 }
 0xc69   :  { %v5095_v18 = vpop.eup %5094  ;;  %5100 = vrcp.f32 %v2680_v13  ;;  %v2733_v53 = vpack.c.bf16 %v2708_v27, %v2707_v3 }
 0xc6a   :  { %v2693_v63 = vmul.f32 %v5095_v18, %v2646_v14  ;;  %v2754_v14 = vrot.slane %v2744_v6, %v5799_v22 }
 0xc6b   :  { %v5097_v30 = vpop.eup %5096  ;;  %2878 = vmatmul.mubr.bf16.gmra.mrb[92].mxu1 %v2733_v53 }
 0xc6c   :  { %v2701_v31 = vsel %vm2669_vm6, %v2693_v63, 0.0  ;;  %v2694_v25 = vmul.f32 %v5097_v30, %v2650_v12  ;;  %2887 = vmatprep.mubr.bf16.mxu1 %v5447_v17 }
 0xc6d   :  { %v2709_v50 = vadd.f32 %v2701_v31, %v6326_v2 }
 0xc6e   :  { %v2702_v39 = vsel %vm2670_vm7, %v2694_v25, 0.0 }
 0xc6f   :  { %v2710_v44 = vadd.f32 %v2702_v39, %v6329_v37 }
 0xc71   :  { %v5099_v56 = vpop.eup %5098  ;;  %v2734_v34 = vpack.c.bf16 %v2710_v44, %v2709_v50 }
 0xc72   :  { %v2695_v48 = vmul.f32 %v5099_v56, %v2656_v21 }
 0xc73   :  { %v5101_v46 = vpop.eup %5100  ;;  %2888 = vmatmul.mubr.bf16.gmra.mrb[96].mxu1 %v2734_v34 }
 0xc74   :  { %v2703_v59 = vsel %vm2671_vm8, %v2695_v48, 0.0  ;;  %v2696_v32 = vmul.f32 %v5101_v46, %v2660_v8  ;;  %2897 = vmatprep.mubr.bf16.mxu1 %v5447_v17 }
 0xc75   :  { %v2711_v10 = vadd.f32 %v2703_v59, %v6345_v9 }
 0xc76   :  { %v2704_v62 = vsel %vm2672_vm9, %v2696_v32, 0.0  ;;  %v4902_v32 = vld [vmem:[#allocation12 + $0x140] sm:$0xff]  }
 0xc77   :  { %v2712_v19 = vadd.f32 %v2704_v62, %v6350_v29  ;;  %v4903_v62 = vld [vmem:[#allocation12 + $0x100] sm:$0xff]   ;;  %4508 = vmatprep.subr.bf16.mxu0 %v4902_v32 }
 0xc78   :  { %4509 = vmatpush3.bf16.msra.mxu0 %v4903_v62 }
 0xc79   :  { %v2735_v28 = vpack.c.bf16 %v2712_v19, %v2711_v10 }
 0xc7b   :  { %2898 = vmatmul.mubr.bf16.gmra.mrb[100].mxu1 %v2735_v28 }
 0xc7c   :  { %3764 = vmatprep.mubr.bf16.mxu1 %v5447_v17 }
 0xd36   :  { %v2869_v7 = vpop.f32.mrb[88].mxu1 }
 0xd37   :  { %v2870_v0 = vadd.f32 %v2869_v7, %v2750_v60  ;;  %v2871_v35 = vpop.f32.mrb[89].mxu1 }
 0xd38   :  { %v2872_v12 = vadd.f32 %v2871_v35, %v2754_v14  ;;  %v2873_v55 = vpop.f32.mrb[90].mxu1 }
 0xd39   :  { %v2874_v52 = vadd.f32 %v2873_v55, %v2750_v60  ;;  %v2875_v42 = vpop.f32.mrb[91].mxu1 }
 0xd3a   :  { %v2876_v57 = vadd.f32 %v2875_v42, %v2754_v14  ;;  %v2908_v49 = vadd.f32 %v2872_v12, %v2870_v0 }
 0xd3c   :  { %2909 = vadd.xlane.f32.xlu0 %v2908_v49  ;;  %v2911_v23 = vadd.f32 %v2876_v57, %v2874_v52 }
 0xd3e   :  { %v2879_v4 = vpop.f32.mrb[92].mxu1  ;;  %2912 = vadd.xlane.f32.xlu1 %v2911_v23 }
 0xd3f   :  { %v2880_v58 = vadd.f32 %v2879_v4, %v2750_v60  ;;  %v2881_v20 = vpop.f32.mrb[93].mxu1 }
 0xd40   :  { %v2882_v24 = vadd.f32 %v2881_v20, %v2754_v14  ;;  %v2883_v54 = vpop.f32.mrb[94].mxu1 }
 0xd41   :  { %v2884_v21 = vadd.f32 %v2883_v54, %v2750_v60  ;;  %v2885_v51 = vpop.f32.mrb[95].mxu1 }
 0xd42   :  { %v2886_v43 = vadd.f32 %v2885_v51, %v2754_v14  ;;  %v2914_v45 = vadd.f32 %v2882_v24, %v2880_v58 }
 0xd44   :  { %2915 = vadd.xlane.f32.xlu0 %v2914_v45  ;;  %v2917_v8 = vadd.f32 %v2886_v43, %v2884_v21 }
 0xd46   :  { %v2889_v47 = vpop.f32.mrb[96].mxu1  ;;  %2918 = vadd.xlane.f32.xlu1 %v2917_v8 }
 0xd47   :  { %v2890_v26 = vadd.f32 %v2889_v47, %v2750_v60  ;;  %v2891_v41 = vpop.f32.mrb[97].mxu1 }
 0xd48   :  { %v2892_v3 = vadd.f32 %v2891_v41, %v2754_v14  ;;  %v2893_v27 = vpop.f32.mrb[98].mxu1 }
 0xd49   :  { %v2894_v13 = vadd.f32 %v2893_v27, %v2750_v60  ;;  %v2895_v18 = vpop.f32.mrb[99].mxu1 }
 0xd4a   :  { %v2896_v53 = vadd.f32 %v2895_v18, %v2754_v14  ;;  %v2920_v63 = vadd.f32 %v2892_v3, %v2890_v26 }
 0xd4c   :  { %2921 = vadd.xlane.f32.xlu0 %v2920_v63  ;;  %v2923_v30 = vadd.f32 %v2896_v53, %v2894_v13 }
 0xd4e   :  { %2924 = vadd.xlane.f32.xlu1 %v2923_v30  ;;  %v2899_v31 = vpop.f32.mrb[100].mxu1 }
 0xd4f   :  { %v6423_v25 = vadd.f32 %v2899_v31, %v2750_v60  ;;  %v2901_v39 = vpop.f32.mrb[101].mxu1 }
 0xd50   :  { %v6425_v50 = vadd.f32 %v2901_v39, %v2754_v14  ;;  %v2903_v44 = vpop.f32.mrb[102].mxu1 }
 0xd51   :  { %v6427_v56 = vadd.f32 %v2903_v44, %v2750_v60  ;;  %v2905_v34 = vpop.f32.mrb[103].mxu1 }
 0xd52   :  { %v6429_v48 = vadd.f32 %v2905_v34, %v2754_v14  ;;  %v2926_v46 = vadd.f32 %v6425_v50, %v6423_v25 }
 0xd54   :  { %2927 = vadd.xlane.f32.xlu0 %v2926_v46  ;;  %v2929_v59 = vadd.f32 %v6429_v48, %v6427_v56 }
 0xd56   :  { %2930 = vadd.xlane.f32.xlu1 %v2929_v59 }
 0xdc9   :  { %v2910_v10 = vpop.xlane.xlu0 %2909 }
 0xdca   :  { %v2932_v19 = vmul.f32 0.00390625, %v2910_v10 }
 0xdcb   :  { %v2913_v28 = vpop.xlane.xlu1 %2912 }
 0xdcc   :  { %v6435_v38 = vsub.f32 %v2870_v0, %v2932_v19  ;;  %v6437_v6 = vsub.f32 %v2872_v12, %v2932_v19  ;;  %v2933_v60 = vmul.f32 0.00390625, %v2913_v28 }
 0xdce   :  { %v6439_v14 = vsub.f32 %v2874_v52, %v2933_v60  ;;  %v6441_v7 = vsub.f32 %v2876_v57, %v2933_v60  ;;  %v2956_v35 = vmul.f32 %v6435_v38, %v6435_v38  ;;  %v2957_v55 = vmul.f32 %v6437_v6, %v6437_v6  ;;  %v4904_v60 = vld [vmem:[#allocation12 + $0x148] sm:$0xff]  }
 0xdcf   :  { %4510 = vmatprep.subr.bf16.mxu0 %v4904_v60  ;;  %v3077_v60 = vrot.slane %v6415_v61, %v5902_v15 }
 0xdd0   :  { %v2972_v42 = vadd.f32 %v2957_v55, %v2956_v35  ;;  %v2958_v49 = vmul.f32 %v6439_v14, %v6439_v14  ;;  %v2959_v0 = vmul.f32 %v6441_v7, %v6441_v7  ;;  %v4905_v35 = vld [vmem:[#allocation12 + $0x108] sm:$0xff]  }
 0xdd1   :  { %v2916_v12 = vpop.xlane.xlu0 %2915  ;;  %4511 = vmatpush3.bf16.msra.mxu0 %v4905_v35  ;;  %v3073_v35 = vrot.slane %v6415_v61, %v5905_v16  ;;  %v6520_v15 = vrot.slane %v3077_v60, %v5905_v16 }
 0xdd2   :  { %v2934_v23 = vmul.f32 0.00390625, %v2916_v12  ;;  %2973 = vadd.xlane.f32.xlu0 %v2972_v42  ;;  %v2975_v52 = vadd.f32 %v2959_v0, %v2958_v49 }
 0xdd3   :  { %v2919_v4 = vpop.xlane.xlu1 %2918 }
 0xdd4   :  { %v6451_v57 = vsub.f32 %v2880_v58, %v2934_v23  ;;  %v6453_v20 = vsub.f32 %v2882_v24, %v2934_v23  ;;  %v2935_v54 = vmul.f32 0.00390625, %v2919_v4  ;;  %2976 = vadd.xlane.f32.xlu1 %v2975_v52  ;;  %v4907_v23 = vld [vmem:[#allocation12 + $0x110] sm:$0xff]   ;;  %v4908_v52 = vld [vmem:[#allocation12 + $0x158] sm:$0xff]  }
 0xdd5   :  { %v4909_v4 = vld [vmem:[#allocation12 + $0x118] sm:$0xff]  }
 0xdd6   :  { %v6455_v51 = vsub.f32 %v2884_v21, %v2935_v54  ;;  %v6457_v45 = vsub.f32 %v2886_v43, %v2935_v54  ;;  %v2960_v8 = vmul.f32 %v6451_v57, %v6451_v57  ;;  %v2961_v47 = vmul.f32 %v6453_v20, %v6453_v20  ;;  %v4910_v54 = vld [vmem:[#allocation12 + $0x160] sm:$0xff]  }
 0xdd8   :  { %v2978_v41 = vadd.f32 %v2961_v47, %v2960_v8  ;;  %v2962_v27 = vmul.f32 %v6455_v51, %v6455_v51  ;;  %v2963_v58 = vmul.f32 %v6457_v45, %v6457_v45  ;;  %v4911_v8 = vld [vmem:[#allocation12 + $0x120] sm:$0xff]   ;;  %v4912_v47 = vld [vmem:[#allocation12 + $0x168] sm:$0xff]  }
 0xdd9   :  { %v2922_v24 = vpop.xlane.xlu0 %2921 }
 0xdda   :  { %v2936_v18 = vmul.f32 0.00390625, %v2922_v24  ;;  %2979 = vadd.xlane.f32.xlu0 %v2978_v41  ;;  %v2981_v21 = vadd.f32 %v2963_v58, %v2962_v27  ;;  %v4913_v41 = vld [vmem:[#allocation12 + $0x128] sm:$0xff]   ;;  %v4914_v27 = vld [vmem:[#allocation12 + $0x170] sm:$0xff]   ;;  %v4916_v24 = vld [vmem:[#allocation12 + $0x178] sm:$0xff]  }
 0xddb   :  { %v2925_v63 = vpop.xlane.xlu1 %2924  ;;  %v4915_v58 = vld [vmem:[#allocation12 + $0x130] sm:$0xff]  }
 0xddc   :  { %v6467_v43 = vsub.f32 %v2890_v26, %v2936_v18  ;;  %v6469_v30 = vsub.f32 %v2892_v3, %v2936_v18  ;;  %v2937_v31 = vmul.f32 0.00390625, %v2925_v63  ;;  %2982 = vadd.xlane.f32.xlu1 %v2981_v21  ;;  %v4917_v18 = vld [vmem:[#allocation12 + $0x138] sm:$0xff]  }
 0xdde   :  { %v6471_v39 = vsub.f32 %v2894_v13, %v2937_v31  ;;  %v6473_v44 = vsub.f32 %v2896_v53, %v2937_v31  ;;  %v2964_v34 = vmul.f32 %v6467_v43, %v6467_v43  ;;  %v2965_v46 = vmul.f32 %v6469_v30, %v6469_v30 }
 0xde0   :  { %v2984_v59 = vadd.f32 %v2965_v46, %v2964_v34  ;;  %v2966_v32 = vmul.f32 %v6471_v39, %v6471_v39  ;;  %v2967_v26 = vmul.f32 %v6473_v44, %v6473_v44 }
 0xde1   :  { %v2928_v3 = vpop.xlane.xlu0 %2927 }
 0xde2   :  { %v2938_v62 = vmul.f32 0.00390625, %v2928_v3  ;;  %2985 = vadd.xlane.f32.xlu0 %v2984_v59  ;;  %v2987_v13 = vadd.f32 %v2967_v26, %v2966_v32  ;;  %v3039_v3 = vrot.slane %v6415_v61, %v5896_v1 }
 0xde3   :  { %v2931_v10 = vpop.xlane.xlu1 %2930 }
 0xde4   :  { %v6484_v53 = vsub.f32 %v6423_v25, %v2938_v62  ;;  %v6487_v19 = vsub.f32 %v6425_v50, %v2938_v62  ;;  %v2939_v28 = vmul.f32 0.00390625, %v2931_v10  ;;  %2988 = vadd.xlane.f32.xlu1 %v2987_v13  ;;  %v3043_v13 = vrot.slane %v6415_v61, %v5899_v11 }
 0xde5   :  { %v6523_v61 = vrot.slane %v3073_v35, %v5905_v16 }
 0xde6   :  { %v6490_v55 = vsub.f32 %v6427_v56, %v2939_v28  ;;  %v6493_v42 = vsub.f32 %v6429_v48, %v2939_v28  ;;  %v2968_v49 = vmul.f32 %v6484_v53, %v6484_v53  ;;  %v2969_v25 = vmul.f32 %v6487_v19, %v6487_v19  ;;  %v4906_v56 = vld [vmem:[#allocation12 + $0x150] sm:$0xff]  }
 0xde7   :  { %4512 = vmatprep.subr.bf16.mxu0 %v4906_v56 }
 0xde8   :  { %v2990_v50 = vadd.f32 %v2969_v25, %v2968_v49  ;;  %v2970_v0 = vmul.f32 %v6490_v55, %v6490_v55  ;;  %v2971_v12 = vmul.f32 %v6493_v42, %v6493_v42  ;;  %4513 = vmatpush3.bf16.msra.mxu0 %v4907_v23  ;;  %v6512_v25 = vrot.slane %v3039_v3, %v5896_v1 }
 0xde9   :  { %4514 = vmatprep.subr.bf16.mxu0 %v4908_v52 }
 0xdea   :  { %2991 = vadd.xlane.f32.xlu0 %v2990_v50  ;;  %v2993_v48 = vadd.f32 %v2971_v12, %v2970_v0  ;;  %v6515_v50 = vrot.slane %v3043_v13, %v5896_v1 }
 0xdec   :  { %2994 = vadd.xlane.f32.xlu1 %v2993_v48  ;;  %4515 = vmatpush3.bf16.msra.mxu0 %v4909_v4 }
 0xded   :  { %4516 = vmatprep.subr.bf16.mxu0 %v4910_v54 }
 0xdf0   :  { %4517 = vmatpush3.bf16.msra.mxu0 %v4911_v8 }
 0xdf1   :  { %4518 = vmatprep.subr.bf16.mxu0 %v4912_v47 }
 0xdf4   :  { %4519 = vmatpush3.bf16.msra.mxu0 %v4913_v41 }
 0xdf5   :  { %4520 = vmatprep.subr.bf16.mxu0 %v4914_v27 }
 0xdf8   :  { %4521 = vmatpush3.bf16.msra.mxu0 %v4915_v58 }
 0xdf9   :  { %4522 = vmatprep.subr.bf16.mxu0 %v4916_v24 }
 0xdfc   :  { %4523 = vmatpush3.bf16.msra.mxu0 %v4917_v18 }
 0xe5f   :  { %v2974_v21 = vpop.xlane.xlu0 %2973 }
 0xe60   :  { %v2996_v63 = vmul.f32 0.00390625, %v2974_v21 }
 0xe61   :  { %v2977_v31 = vpop.xlane.xlu1 %2976 }
 0xe62   :  { %v3004_v34 = vadd.f32 1e-05, %v2996_v63  ;;  %v2997_v46 = vmul.f32 0.00390625, %v2977_v31 }
 0xe64   :  { %5102 = vrsqrt.f32 %v3004_v34  ;;  %v3005_v59 = vadd.f32 1e-05, %v2997_v46 }
 0xe66   :  { %5104 = vrsqrt.f32 %v3005_v59 }
 0xe67   :  { %v2980_v32 = vpop.xlane.xlu0 %2979 }
 0xe68   :  { %v2998_v26 = vmul.f32 0.00390625, %v2980_v32 }
 0xe69   :  { %v2983_v62 = vpop.xlane.xlu1 %2982 }
 0xe6a   :  { %v3006_v10 = vadd.f32 1e-05, %v2998_v26  ;;  %v2999_v28 = vmul.f32 0.00390625, %v2983_v62 }
 0xe6c   :  { %5106 = vrsqrt.f32 %v3006_v10  ;;  %v3007_v49 = vadd.f32 1e-05, %v2999_v28 }
 0xe6e   :  { %v5103_v0 = vpop.eup %5102  ;;  %5108 = vrsqrt.f32 %v3007_v49 }
 0xe6f   :  { %v3020_v11 = vmul.f32 %v5103_v0, %v6435_v38  ;;  %v2986_v12 = vpop.xlane.xlu0 %2985  ;;  %v3021_v56 = vmul.f32 %v5103_v0, %v6437_v6 }
 0xe70   :  { %v5105_v23 = vpop.eup %5104  ;;  %v3000_v48 = vmul.f32 0.00390625, %v2986_v12 }
 0xe71   :  { %v3054_v52 = vmul.f32 %v6512_v25, %v3020_v11  ;;  %v3022_v4 = vmul.f32 %v5105_v23, %v6439_v14  ;;  %v2989_v54 = vpop.xlane.xlu1 %2988  ;;  %v3023_v8 = vmul.f32 %v5105_v23, %v6441_v7  ;;  %v3055_v38 = vmul.f32 %v6515_v50, %v3021_v56 }
 0xe72   :  { %v3008_v47 = vadd.f32 1e-05, %v3000_v48  ;;  %v3001_v41 = vmul.f32 0.00390625, %v2989_v54 }
 0xe73   :  { %v3056_v6 = vmul.f32 %v6512_v25, %v3022_v4  ;;  %v3057_v27 = vmul.f32 %v6515_v50, %v3023_v8  ;;  %v3089_v58 = vadd.f32 %v6520_v15, %v3055_v38  ;;  %v3088_v24 = vadd.f32 %v6523_v61, %v3054_v52 }
 0xe74   :  { %5110 = vrsqrt.f32 %v3008_v47  ;;  %v3009_v18 = vadd.f32 1e-05, %v3001_v41 }
 0xe75   :  { %v3091_v21 = vadd.f32 %v6520_v15, %v3057_v27  ;;  %v3090_v14 = vadd.f32 %v6523_v61, %v3056_v6  ;;  %v3105_v7 = vmax.f32 %v3089_v58, 0.0  ;;  %v3104_v31 = vmax.f32 %v3088_v24, 0.0 }
 0xe76   :  { %v5107_v63 = vpop.eup %5106  ;;  %5112 = vrsqrt.f32 %v3009_v18 }
 0xe77   :  { %v2992_v34 = vpop.xlane.xlu0 %2991  ;;  %v3107_v46 = vmax.f32 %v3091_v21, 0.0  ;;  %v3106_v59 = vmax.f32 %v3090_v14, 0.0  ;;  %v3025_v32 = vmul.f32 %v5107_v63, %v6453_v20  ;;  %v3024_v26 = vmul.f32 %v5107_v63, %v6451_v57 }
 0xe78   :  { %v5109_v3 = vpop.eup %5108  ;;  %v3002_v62 = vmul.f32 0.00390625, %v2992_v34 }
 0xe79   :  { %v2995_v13 = vpop.xlane.xlu1 %2994  ;;  %v3154_v10 = vpack.c.bf16 %v3107_v46, %v3105_v7  ;;  %v3153_v28 = vpack.c.bf16 %v3106_v59, %v3104_v31  ;;  %v3027_v60 = vmul.f32 %v5109_v3, %v6457_v45  ;;  %v3059_v35 = vmul.f32 %v6515_v50, %v3025_v32 }
 0xe7a   :  { %v3010_v49 = vadd.f32 1e-05, %v3002_v62  ;;  %v3003_v0 = vmul.f32 0.00390625, %v2995_v13  ;;  %v3026_v11 = vmul.f32 %v5109_v3, %v6455_v51  ;;  %v3058_v12 = vmul.f32 %v6512_v25, %v3024_v26 }
 0xe7b   :  { %3295 = vmatprep.mubr.bf16.mxu0 %v3154_v10  ;;  %v3061_v20 = vmul.f32 %v6515_v50, %v3027_v60  ;;  %v3093_v57 = vadd.f32 %v6520_v15, %v3059_v35 }
 0xe7c   :  { %5114 = vrsqrt.f32 %v3010_v49  ;;  %v3011_v56 = vadd.f32 1e-05, %v3003_v0  ;;  %3296 = vmatmul.mubr.bf16.vlgmr.msra.gmra.mrb[40].mxu0 %v3153_v28  ;;  %v3060_v23 = vmul.f32 %v6512_v25, %v3026_v11  ;;  %v3092_v45 = vadd.f32 %v6523_v61, %v3058_v12 }
 0xe7d   :  { %v3095_v48 = vadd.f32 %v6520_v15, %v3061_v20  ;;  %v3109_v4 = vmax.f32 %v3093_v57, 0.0 }
 0xe7e   :  { %v5111_v52 = vpop.eup %5110  ;;  %5116 = vrsqrt.f32 %v3011_v56  ;;  %v3094_v51 = vadd.f32 %v6523_v61, %v3060_v23  ;;  %v3108_v41 = vmax.f32 %v3092_v45, 0.0 }
 0xe7f   :  { %v3111_v54 = vmax.f32 %v3095_v48, 0.0  ;;  %v3029_v8 = vmul.f32 %v5111_v52, %v6469_v30  ;;  %v3028_v38 = vmul.f32 %v5111_v52, %v6467_v43 }
 0xe80   :  { %v5113_v47 = vpop.eup %5112  ;;  %v3110_v6 = vmax.f32 %v3094_v51, 0.0 }
 0xe81   :  { %v3156_v27 = vpack.c.bf16 %v3111_v54, %v3109_v4  ;;  %v3031_v58 = vmul.f32 %v5113_v47, %v6473_v44  ;;  %v3063_v24 = vmul.f32 %v6515_v50, %v3029_v8  ;;  %v3030_v18 = vmul.f32 %v5113_v47, %v6471_v39 }
 0xe82   :  { %v3155_v21 = vpack.c.bf16 %v3110_v6, %v3108_v41  ;;  %v3062_v14 = vmul.f32 %v6512_v25, %v3028_v38 }
 0xe83   :  { %3303 = vmatprep.mubr.bf16.mxu0 %v3156_v27  ;;  %v3065_v63 = vmul.f32 %v6515_v50, %v3031_v58  ;;  %v3097_v30 = vadd.f32 %v6520_v15, %v3063_v24  ;;  %v3064_v43 = vmul.f32 %v6512_v25, %v3030_v18 }
 0xe84   :  { %3304 = vmatmul.mubr.bf16.gmra.mrb[44].mxu0 %v3155_v21  ;;  %v3096_v7 = vadd.f32 %v6523_v61, %v3062_v14 }
 0xe85   :  { %v3099_v31 = vadd.f32 %v6520_v15, %v3065_v63  ;;  %v3098_v44 = vadd.f32 %v6523_v61, %v3064_v43  ;;  %v3113_v46 = vmax.f32 %v3097_v30, 0.0 }
 0xe86   :  { %v5115_v34 = vpop.eup %5114  ;;  %v3112_v39 = vmax.f32 %v3096_v7, 0.0 }
 0xe87   :  { %v3115_v59 = vmax.f32 %v3099_v31, 0.0  ;;  %v3114_v32 = vmax.f32 %v3098_v44, 0.0  ;;  %v3033_v26 = vmul.f32 %v5115_v34, %v6487_v19  ;;  %v3032_v3 = vmul.f32 %v5115_v34, %v6484_v53 }
 0xe88   :  { %v5117_v62 = vpop.eup %5116 }
 0xe89   :  { %v3158_v13 = vpack.c.bf16 %v3115_v59, %v3113_v46  ;;  %v3157_v10 = vpack.c.bf16 %v3114_v32, %v3112_v39  ;;  %v3035_v28 = vmul.f32 %v5117_v62, %v6493_v42  ;;  %v3067_v60 = vmul.f32 %v6515_v50, %v3033_v26 }
 0xe8a   :  { %v3034_v35 = vmul.f32 %v5117_v62, %v6490_v55  ;;  %v3066_v49 = vmul.f32 %v6512_v25, %v3032_v3 }
 0xe8b   :  { %3311 = vmatprep.mubr.bf16.mxu0 %v3158_v13  ;;  %v3069_v0 = vmul.f32 %v6515_v50, %v3035_v28  ;;  %v3101_v11 = vadd.f32 %v6520_v15, %v3067_v60  ;;  %v6571_v50 = vld [vmem:[#allocation13 + $0x8] sm:$0x7] }
 0xe8c   :  { %3312 = vmatmul.mubr.bf16.gmra.mrb[48].mxu0 %v3157_v10  ;;  %v3068_v19 = vmul.f32 %v6512_v25, %v3034_v35  ;;  %v3100_v53 = vadd.f32 %v6523_v61, %v3066_v49  ;;  %v3166_v25 = vrot.slane %v6571_v50, %v5799_v22 }
 0xe8d   :  { %v3103_v12 = vadd.f32 %v6520_v15, %v3069_v0  ;;  %v3117_v20 = vmax.f32 %v3101_v11, 0.0 }
 0xe8e   :  { %v3102_v42 = vadd.f32 %v6523_v61, %v3068_v19  ;;  %v3116_v56 = vmax.f32 %v3100_v53, 0.0 }
 0xe8f   :  { %v3119_v57 = vmax.f32 %v3103_v12, 0.0 }
 0xe90   :  { %v3118_v55 = vmax.f32 %v3102_v42, 0.0 }
 0xe91   :  { %v3160_v23 = vpack.c.bf16 %v3119_v57, %v3117_v20 }
 0xe92   :  { %v3159_v45 = vpack.c.bf16 %v3118_v55, %v3116_v56 }
 0xe93   :  { %3319 = vmatprep.mubr.bf16.mxu0 %v3160_v23 }
 0xe94   :  { %3320 = vmatmul.mubr.bf16.gmra.mrb[52].mxu0 %v3159_v45 }
 0xf4f   :  { %v4524_v48 = vpop.f32.mrb[40].mxu0 }
 0xf50   :  { %v4525_v52 = vpop.f32.mrb[41].mxu0 }
 0xf51   :  { %v4526_v51 = vadd.f32 %v4525_v52, %v4524_v48  ;;  %v4527_v4 = vpop.f32.mrb[42].mxu0 }
 0xf52   :  { %v4528_v15 = vpop.f32.mrb[43].mxu0 }
 0xf53   :  { %v4529_v54 = vadd.f32 %v4528_v15, %v4527_v4  ;;  %v3298_v61 = vadd.f32 %v4526_v51, %v3166_v25 }
 0xf55   :  { %3328 = vadd.xlane.f32.xlu0 %v3298_v61  ;;  %v3301_v8 = vadd.f32 %v4529_v54, %v3166_v25 }
 0xf57   :  { %v4530_v38 = vpop.f32.mrb[44].mxu0  ;;  %3330 = vadd.xlane.f32.xlu1 %v3301_v8 }
 0xf58   :  { %v4531_v47 = vpop.f32.mrb[45].mxu0 }
 0xf59   :  { %v4532_v41 = vadd.f32 %v4531_v47, %v4530_v38  ;;  %v4533_v6 = vpop.f32.mrb[46].mxu0 }
 0xf5a   :  { %v4534_v27 = vpop.f32.mrb[47].mxu0 }
 0xf5b   :  { %v4535_v58 = vadd.f32 %v4534_v27, %v4533_v6  ;;  %v3306_v24 = vadd.f32 %v4532_v41, %v3166_v25  ;;  %v4918_v41 = vld [vmem:[#allocation16 + $0xc0] sm:$0xff]  }
 0xf5c   :  { %4662 = vmatprep.subr.bf16.mxu0 %v4918_v41 }
 0xf5d   :  { %3332 = vadd.xlane.f32.xlu0 %v3306_v24  ;;  %v3309_v18 = vadd.f32 %v4535_v58, %v3166_v25  ;;  %4663 = vmatpush3.bf16.msra.mxu0 %v4918_v41 }
 0xf5f   :  { %v4536_v21 = vpop.f32.mrb[48].mxu0  ;;  %3334 = vadd.xlane.f32.xlu1 %v3309_v18 }
 0xf60   :  { %v4537_v14 = vpop.f32.mrb[49].mxu0 }
 0xf61   :  { %v4538_v63 = vadd.f32 %v4537_v14, %v4536_v21  ;;  %v4539_v30 = vpop.f32.mrb[50].mxu0  ;;  %v4921_v21 = vld [vmem:[#allocation16 + $0xd8] sm:$0xff]   ;;  %v4922_v14 = vld [vmem:[#allocation16 + $0xe0] sm:$0xff]  }
 0xf62   :  { %v4540_v43 = vpop.f32.mrb[51].mxu0 }
 0xf63   :  { %v4541_v7 = vadd.f32 %v4540_v43, %v4539_v30  ;;  %v3314_v31 = vadd.f32 %v4538_v63, %v3166_v25  ;;  %v4923_v63 = vld [vmem:[#allocation16 + $0xe8] sm:$0xff]   ;;  %v4924_v30 = vld [vmem:[#allocation16 + $0xf0] sm:$0xff]   ;;  %v4925_v43 = vld [vmem:[#allocation16 + $0xf8] sm:$0xff]  }
 0xf65   :  { %3336 = vadd.xlane.f32.xlu0 %v3314_v31  ;;  %v3317_v44 = vadd.f32 %v4541_v7, %v3166_v25  ;;  %v4926_v7 = vld [vmem:[#allocation17] ss:$8 sps:$4 sm:$0xff]  }
 0xf67   :  { %v4542_v34 = vpop.f32.mrb[52].mxu0  ;;  %3338 = vadd.xlane.f32.xlu1 %v3317_v44 }
 0xf68   :  { %v4543_v46 = vpop.f32.mrb[53].mxu0 }
 0xf69   :  { %v4544_v39 = vadd.f32 %v4543_v46, %v4542_v34  ;;  %v4545_v59 = vpop.f32.mrb[54].mxu0  ;;  %v4929_v34 = vld [vmem:[#allocation17 + $0x10] ss:$8 sps:$4 sm:$0xff]   ;;  %v4934_v46 = vld [vmem:[#allocation17 + $0x24] ss:$8 sps:$4 sm:$0xff]  }
 0xf6a   :  { %v4546_v32 = vpop.f32.mrb[55].mxu0 }
 0xf6b   :  { %v4547_v26 = vadd.f32 %v4546_v32, %v4545_v59  ;;  %v3322_v3 = vadd.f32 %v4544_v39, %v3166_v25  ;;  %v4932_v39 = vld [vmem:[#allocation17 + $0x20] ss:$8 sps:$4 sm:$0xff]   ;;  %v4937_v59 = vld [vmem:[#allocation17 + $0x34] ss:$8 sps:$4 sm:$0xff]   ;;  %v4935_v32 = vld [vmem:[#allocation17 + $0x30] ss:$8 sps:$4 sm:$0xff]  }
 0xf6d   :  { %3340 = vadd.xlane.f32.xlu0 %v3322_v3  ;;  %v3325_v62 = vadd.f32 %v4547_v26, %v3166_v25  ;;  %v4940_v26 = vld [vmem:[#allocation17 + $0x44] ss:$8 sps:$4 sm:$0xff]  }
 0xf6f   :  { %3342 = vadd.xlane.f32.xlu1 %v3325_v62 }
 0xfe2   :  { %v3329_v13 = vpop.xlane.xlu0 %3328 }
 0xfe3   :  { %v3344_v10 = vmul.f32 0.0078125, %v3329_v13  ;;  %v4941_v13 = vld [vmem:[#allocation17 + $0x50] ss:$8 sps:$4 sm:$0xff]  }
 0xfe4   :  { %v3331_v28 = vpop.xlane.xlu1 %3330 }
 0xfe5   :  { %v6575_v60 = vsub.f32 %v3298_v61, %v3344_v10  ;;  %v3345_v35 = vmul.f32 0.0078125, %v3331_v28 }
 0xfe7   :  { %v6577_v49 = vsub.f32 %v3301_v8, %v3345_v35  ;;  %v3360_v0 = vmul.f32 %v6575_v60, %v6575_v60 }
 0xfe9   :  { %3368 = vadd.xlane.f32.xlu0 %v3360_v0  ;;  %v3361_v11 = vmul.f32 %v6577_v49, %v6577_v49 }
 0xfea   :  { %v3333_v19 = vpop.xlane.xlu0 %3332 }
 0xfeb   :  { %v3346_v53 = vmul.f32 0.0078125, %v3333_v19  ;;  %3370 = vadd.xlane.f32.xlu1 %v3361_v11 }
 0xfec   :  { %v3335_v12 = vpop.xlane.xlu1 %3334 }
 0xfed   :  { %v6583_v42 = vsub.f32 %v3306_v24, %v3346_v53  ;;  %v3347_v20 = vmul.f32 0.0078125, %v3335_v12  ;;  %v4919_v24 = vld [vmem:[#allocation16 + $0xc8] sm:$0xff]  }
 0xfee   :  { %4664 = vmatprep.subr.bf16.mxu0 %v4919_v24 }
 0xfef   :  { %v6585_v57 = vsub.f32 %v3309_v18, %v3347_v20  ;;  %v3362_v56 = vmul.f32 %v6583_v42, %v6583_v42  ;;  %4665 = vmatpush3.bf16.msra.mxu0 %v4919_v24  ;;  %v4920_v18 = vld [vmem:[#allocation16 + $0xd0] sm:$0xff]  }
 0xff0   :  { %4666 = vmatprep.subr.bf16.mxu0 %v4920_v18 }
 0xff1   :  { %3372 = vadd.xlane.f32.xlu0 %v3362_v56  ;;  %v3363_v55 = vmul.f32 %v6585_v57, %v6585_v57 }
 0xff2   :  { %v3337_v23 = vpop.xlane.xlu0 %3336 }
 0xff3   :  { %v3348_v45 = vmul.f32 0.0078125, %v3337_v23  ;;  %3374 = vadd.xlane.f32.xlu1 %v3363_v55  ;;  %4667 = vmatpush3.bf16.msra.mxu0 %v4920_v18 }
 0xff4   :  { %v3339_v48 = vpop.xlane.xlu1 %3338  ;;  %4668 = vmatprep.subr.bf16.mxu0 %v4921_v21 }
 0xff5   :  { %v6591_v25 = vsub.f32 %v3314_v31, %v3348_v45  ;;  %v3349_v52 = vmul.f32 0.0078125, %v3339_v48  ;;  %v4928_v31 = vld [vmem:[#allocation17 + $0x4] ss:$8 sps:$4 sm:$0xff]   ;;  %v6609_v45 = vrot.slane %v6571_v50, %v5896_v1 }
 0xff6   :  { %3732 = vmatprep.subr.bf16.mxu1 %v4928_v31 }
 0xff7   :  { %v6593_v51 = vsub.f32 %v3317_v44, %v3349_v52  ;;  %v3364_v4 = vmul.f32 %v6591_v25, %v6591_v25  ;;  %4669 = vmatpush3.bf16.msra.mxu0 %v4921_v21  ;;  %v4931_v44 = vld [vmem:[#allocation17 + $0x14] ss:$8 sps:$4 sm:$0xff]   ;;  %3733 = vmatpush1.bf16.msra.mxu1 %v4926_v7  ;;  %v6613_v52 = vrot.slane %v6571_v50, %v5905_v16 }
 0xff8   :  { %4670 = vmatprep.subr.bf16.mxu0 %v4922_v14  ;;  %3734 = vmatprep.subr.bf16.mxu1 %v4931_v44 }
 0xff9   :  { %3376 = vadd.xlane.f32.xlu0 %v3364_v4  ;;  %v3365_v15 = vmul.f32 %v6593_v51, %v6593_v51 }
 0xffa   :  { %v3341_v54 = vpop.xlane.xlu0 %3340 }
 0xffb   :  { %v3350_v61 = vmul.f32 0.0078125, %v3341_v54  ;;  %3378 = vadd.xlane.f32.xlu1 %v3365_v15  ;;  %4671 = vmatpush3.bf16.msra.mxu0 %v4922_v14 }
 0xffc   :  { %v3343_v8 = vpop.xlane.xlu1 %3342  ;;  %4672 = vmatprep.subr.bf16.mxu0 %v4923_v63  ;;  %3735 = vmatpush1.bf16.msra.mxu1 %v4929_v34 }
 0xffd   :  { %v6599_v38 = vsub.f32 %v3322_v3, %v3350_v61  ;;  %v3351_v47 = vmul.f32 0.0078125, %v3343_v8  ;;  %3736 = vmatprep.subr.bf16.mxu1 %v4934_v46  ;;  %v4938_v3 = vld [vmem:[#allocation17 + $0x40] ss:$8 sps:$4 sm:$0xff]  }
 0xfff   :  { %v6601_v6 = vsub.f32 %v3325_v62, %v3351_v47  ;;  %v3366_v27 = vmul.f32 %v6599_v38, %v6599_v38  ;;  %4673 = vmatpush3.bf16.msra.mxu0 %v4923_v63  ;;  %v4943_v62 = vld [vmem:[#allocation17 + $0x54] ss:$8 sps:$4 sm:$0xff]  }
0x1000   :  { %4674 = vmatprep.subr.bf16.mxu0 %v4924_v30  ;;  %3737 = vmatpush1.bf16.msra.mxu1 %v4932_v39 }
0x1001   :  { %3380 = vadd.xlane.f32.xlu0 %v3366_v27  ;;  %v3367_v58 = vmul.f32 %v6601_v6, %v6601_v6  ;;  %3738 = vmatprep.subr.bf16.mxu1 %v4937_v59 }
0x1003   :  { %3382 = vadd.xlane.f32.xlu1 %v3367_v58  ;;  %4675 = vmatpush3.bf16.msra.mxu0 %v4924_v30 }
0x1004   :  { %4676 = vmatprep.subr.bf16.mxu0 %v4925_v43  ;;  %3739 = vmatpush1.bf16.msra.mxu1 %v4935_v32 }
0x1005   :  { %3740 = vmatprep.subr.bf16.mxu1 %v4940_v26 }
0x1007   :  { %4677 = vmatpush3.bf16.msra.mxu0 %v4925_v43 }
0x1008   :  { %3741 = vmatpush1.bf16.msra.mxu1 %v4938_v3 }
0x1009   :  { %3742 = vmatprep.subr.bf16.mxu1 %v4943_v62 }
0x100c   :  { %3743 = vmatpush1.bf16.msra.mxu1 %v4941_v13 }
0x1076   :  { %v3369_v10 = vpop.xlane.xlu0 %3368 }
0x1077   :  { %v3384_v28 = vmul.f32 0.0078125, %v3369_v10 }
0x1078   :  { %v3371_v35 = vpop.xlane.xlu1 %3370 }
0x1079   :  { %v3392_v0 = vadd.f32 1e-05, %v3384_v28  ;;  %v3385_v11 = vmul.f32 0.0078125, %v3371_v35 }
0x107b   :  { %5118 = vrsqrt.f32 %v3392_v0  ;;  %v3393_v19 = vadd.f32 1e-05, %v3385_v11 }
0x107d   :  { %5120 = vrsqrt.f32 %v3393_v19 }
0x107e   :  { %v3373_v53 = vpop.xlane.xlu0 %3372 }
0x107f   :  { %v3386_v12 = vmul.f32 0.0078125, %v3373_v53 }
0x1080   :  { %v3375_v20 = vpop.xlane.xlu1 %3374 }
0x1081   :  { %v3394_v56 = vadd.f32 1e-05, %v3386_v12  ;;  %v3387_v55 = vmul.f32 0.0078125, %v3375_v20 }
0x1083   :  { %5122 = vrsqrt.f32 %v3394_v56  ;;  %v3395_v23 = vadd.f32 1e-05, %v3387_v55 }
0x1085   :  { %v5119_v48 = vpop.eup %5118  ;;  %5124 = vrsqrt.f32 %v3395_v23 }
0x1086   :  { %v3377_v4 = vpop.xlane.xlu0 %3376  ;;  %v3408_v15 = vmul.f32 %v5119_v48, %v6575_v60 }
0x1087   :  { %v5121_v54 = vpop.eup %5120  ;;  %v3388_v61 = vmul.f32 0.0078125, %v3377_v4 }
0x1088   :  { %v3379_v8 = vpop.xlane.xlu1 %3378  ;;  %v3409_v47 = vmul.f32 %v5121_v54, %v6577_v49  ;;  %v3420_v41 = vmul.f32 %v6609_v45, %v3408_v15 }
0x1089   :  { %v3396_v27 = vadd.f32 1e-05, %v3388_v61  ;;  %v3389_v58 = vmul.f32 0.0078125, %v3379_v8 }
0x108a   :  { %v3421_v24 = vmul.f32 %v6609_v45, %v3409_v47  ;;  %v3432_v18 = vadd.f32 %v6613_v52, %v3420_v41 }
0x108b   :  { %5126 = vrsqrt.f32 %v3396_v27  ;;  %v3397_v21 = vadd.f32 1e-05, %v3389_v58  ;;  %v4949_v58 = vld [vmem:[#allocation17 + $0x74] ss:$8 sps:$4 sm:$0xff]  }
0x108c   :  { %v3433_v16 = vadd.f32 %v6613_v52, %v3421_v24  ;;  %v3440_v50 = vmax.f32 %v3432_v18, 0.0  ;;  %v4947_v24 = vld [vmem:[#allocation17 + $0x70] ss:$8 sps:$4 sm:$0xff]  }
0x108d   :  { %v5123_v14 = vpop.eup %5122  ;;  %5128 = vrsqrt.f32 %v3397_v21 }
0x108e   :  { %v3410_v60 = vmul.f32 %v5123_v14, %v6583_v42  ;;  %v3381_v63 = vpop.xlane.xlu0 %3380  ;;  %v3441_v30 = vmax.f32 %v3433_v16, 0.0  ;;  %v3448_v34 = vadd.f32 %v3440_v50, %v6298_v33 }
0x108f   :  { %v5125_v49 = vpop.eup %5124  ;;  %v3390_v43 = vmul.f32 0.0078125, %v3381_v63 }
0x1090   :  { %v3422_v7 = vmul.f32 %v6609_v45, %v3410_v60  ;;  %v3411_v31 = vmul.f32 %v5125_v49, %v6585_v57  ;;  %v3383_v44 = vpop.xlane.xlu1 %3382  ;;  %v3449_v46 = vadd.f32 %v3441_v30, %v6301_v40 }
0x1091   :  { %v3398_v39 = vadd.f32 1e-05, %v3390_v43  ;;  %v3391_v59 = vmul.f32 0.0078125, %v3383_v44 }
0x1092   :  { %v3423_v32 = vmul.f32 %v6609_v45, %v3411_v31  ;;  %v3472_v26 = vpack.c.bf16 %v3449_v46, %v3448_v34  ;;  %v3434_v42 = vadd.f32 %v6613_v52, %v3422_v7 }
0x1093   :  { %5130 = vrsqrt.f32 %v3398_v39  ;;  %v3399_v3 = vadd.f32 1e-05, %v3391_v59 }
0x1094   :  { %4678 = vmatprep.mubr.bf16.mxu0 %v3472_v26  ;;  %v3435_v62 = vadd.f32 %v6613_v52, %v3423_v32  ;;  %v3442_v13 = vmax.f32 %v3434_v42, 0.0 }
0x1095   :  { %v5127_v10 = vpop.eup %5126  ;;  %5132 = vrsqrt.f32 %v3399_v3 }
0x1096   :  { %v3443_v57 = vmax.f32 %v3435_v62, 0.0  ;;  %v3412_v33 = vmul.f32 %v5127_v10, %v6591_v25  ;;  %v3450_v40 = vadd.f32 %v3442_v13, %v6310_v5 }
0x1097   :  { %v5129_v28 = vpop.eup %5128 }
0x1098   :  { %v3451_v35 = vadd.f32 %v3443_v57, %v6313_v36  ;;  %v3413_v0 = vmul.f32 %v5129_v28, %v6593_v51  ;;  %v3424_v11 = vmul.f32 %v6609_v45, %v3412_v33  ;;  %v3640_v33 = vld [vmem:[%s6769_s12] sm:$0x3] }
0x1099   :  { %v3649_v28 = vrot.slane %v3640_v33, %v5896_v1 }
0x109a   :  { %v3473_v19 = vpack.c.bf16 %v3451_v35, %v3450_v40  ;;  %v3425_v53 = vmul.f32 %v6609_v45, %v3413_v0  ;;  %v3436_v12 = vadd.f32 %v6613_v52, %v3424_v11 }
0x109c   :  { %4679 = vmatmul.mubr.bf16.vlgmr.msra.gmra.mrb[16].mxu0 %v3473_v19  ;;  %v3437_v20 = vadd.f32 %v6613_v52, %v3425_v53  ;;  %v3444_v56 = vmax.f32 %v3436_v12, 0.0 }
0x109d   :  { %v5131_v55 = vpop.eup %5130 }
0x109e   :  { %v3445_v25 = vmax.f32 %v3437_v20, 0.0  ;;  %v3414_v23 = vmul.f32 %v5131_v55, %v6599_v38  ;;  %v3452_v36 = vadd.f32 %v3444_v56, %v6326_v2  ;;  %v6670_v55 = vrot.slane %v3640_v33, %v5799_v22 }
0x109f   :  { %v5133_v5 = vpop.eup %5132 }
0x10a0   :  { %v3453_v51 = vadd.f32 %v3445_v25, %v6329_v37  ;;  %v3415_v48 = vmul.f32 %v5133_v5, %v6601_v6  ;;  %v3426_v4 = vmul.f32 %v6609_v45, %v3414_v23  ;;  %v4946_v37 = vld [vmem:[#allocation17 + $0x64] ss:$8 sps:$4 sm:$0xff]   ;;  %v4944_v6 = vld [vmem:[#allocation17 + $0x60] ss:$8 sps:$4 sm:$0xff]  }
0x10a1   :  { %3744 = vmatprep.subr.bf16.mxu1 %v4946_v37 }
0x10a2   :  { %v3474_v15 = vpack.c.bf16 %v3453_v51, %v3452_v36  ;;  %v3427_v54 = vmul.f32 %v6609_v45, %v3415_v48  ;;  %v3438_v61 = vadd.f32 %v6613_v52, %v3426_v4  ;;  %3745 = vmatpush1.bf16.msra.mxu1 %v4944_v6  ;;  %v4348_v45 = vld [vmem:[%s6767_s10] ss:$0 sm:$0xff] }
0x10a3   :  { %3746 = vmatprep.subr.bf16.mxu1 %v4949_v58 }
0x10a4   :  { %4682 = vmatprep.mubr.bf16.mxu0 %v3474_v15  ;;  %v3439_v8 = vadd.f32 %v6613_v52, %v3427_v54  ;;  %v3446_v47 = vmax.f32 %v3438_v61, 0.0 }
0x10a6   :  { %v3447_v41 = vmax.f32 %v3439_v8, 0.0  ;;  %v3454_v38 = vadd.f32 %v3446_v47, %v6345_v9  ;;  %3747 = vmatpush1.bf16.msra.mxu1 %v4947_v24 }
0x10a8   :  { %v3455_v2 = vadd.f32 %v3447_v41, %v6350_v29 }
0x10aa   :  { %v3475_v27 = vpack.c.bf16 %v3455_v2, %v3454_v38 }
0x10ac   :  { %4683 = vmatmul.mubr.bf16.gmra.mrb[20].mxu0 %v3475_v27 }
0x116f   :  { %v4680_v52 = vpop.f32.mrb[16].mxu0 }
0x1170   :  { %v3606_v18 = vadd.f32 %v4680_v52, %v4348_v45  ;;  %v3558_v21 = vpop.f32.mrb[17].mxu0 }
0x1171   :  { %v3604_v9 = vadd.f32 %v4348_v45, %v3558_v21  ;;  %v4681_v16 = vpop.f32.mrb[18].mxu0 }
0x1172   :  { %v3607_v29 = vadd.f32 %v4681_v16, %v4348_v45  ;;  %v3561_v50 = vpop.f32.mrb[19].mxu0  ;;  %v3614_v60 = vmax.f32 %v3606_v18, 0.0 }
0x1173   :  { %v3605_v14 = vadd.f32 %v4348_v45, %v3561_v50  ;;  %v3612_v30 = vmax.f32 %v3604_v9, 0.0 }
0x1174   :  { %v3615_v63 = vmax.f32 %v3607_v29, 0.0 }
0x1175   :  { %v3613_v49 = vmax.f32 %v3605_v14, 0.0 }
0x1176   :  { %v6650_v43 = vpack.c.bf16 %v3615_v63, %v3614_v60 }
0x1177   :  { %v6652_v7 = vpack.c.bf16 %v3613_v49, %v3612_v30 }
0x1179   :  { %3765 = vmatmul.mubr.bf16.vlgmr.msra.gmra.mrb[104].mxu1 %v6652_v7 }
0x117a   :  { %3774 = vmatprep.mubr.bf16.mxu1 %v5447_v17 }
0x117f   :  { %v4684_v31 = vpop.f32.mrb[20].mxu0 }
0x1180   :  { %v3610_v44 = vadd.f32 %v4684_v31, %v4348_v45  ;;  %v3574_v34 = vpop.f32.mrb[21].mxu0  ;;  %v4373_v31 = vld [vmem:[%s6770_s13] ss:$0 sm:$0xff] }
0x1181   :  { %v3608_v46 = vadd.f32 %v4348_v45, %v3574_v34  ;;  %v4685_v39 = vpop.f32.mrb[22].mxu0  ;;  %3775 = vmatmul.mubr.bf16.gmra.mrb[108].mxu1 %v6650_v43 }
0x1182   :  { %v3611_v59 = vadd.f32 %v4685_v39, %v4348_v45  ;;  %v3577_v32 = vpop.f32.mrb[23].mxu0  ;;  %3784 = vmatprep.mubr.bf16.mxu1 %v5447_v17  ;;  %v3618_v42 = vmax.f32 %v3610_v44, 0.0 }
0x1183   :  { %v3609_v26 = vadd.f32 %v4348_v45, %v3577_v32  ;;  %v3616_v62 = vmax.f32 %v3608_v46, 0.0 }
0x1184   :  { %v3619_v3 = vmax.f32 %v3611_v59, 0.0 }
0x1185   :  { %v3617_v13 = vmax.f32 %v3609_v26, 0.0 }
0x1186   :  { %v6658_v10 = vpack.c.bf16 %v3619_v3, %v3618_v42 }
0x1187   :  { %v6660_v57 = vpack.c.bf16 %v3617_v13, %v3616_v62 }
0x1189   :  { %3785 = vmatmul.mubr.bf16.gmra.mrb[112].mxu1 %v6660_v57 }
0x118a   :  { %3794 = vmatprep.mubr.bf16.mxu1 %v5447_v17 }
0x1191   :  { %3795 = vmatmul.mubr.bf16.gmra.mrb[116].mxu1 %v6658_v10 }
0x124c   :  { %v3766_v40 = vpop.f32.mrb[104].mxu1 }
0x124d   :  { %v3768_v35 = vpop.f32.mrb[105].mxu1  ;;  %v3767_v51 = vadd.f32 %v3766_v40, %v6670_v55 }
0x124e   :  { %v3769_v0 = vadd.f32 %v3768_v35, %v3649_v28  ;;  %v3770_v11 = vpop.f32.mrb[106].mxu1 }
0x124f   :  { %v3772_v19 = vpop.f32.mrb[107].mxu1  ;;  %v3771_v15 = vadd.f32 %v3770_v11, %v6670_v55 }
0x1250   :  { %v4365_v53 = vmul.f32 -1.442695, %v3769_v0  ;;  %v3773_v12 = vadd.f32 %v3772_v19, %v3649_v28 }
0x1252   :  { %5134 = vpow2.f32 %v4365_v53  ;;  %v4366_v20 = vmul.f32 -1.442695, %v3773_v12 }
0x1254   :  { %5136 = vpow2.f32 %v4366_v20  ;;  %v3776_v56 = vpop.f32.mrb[108].mxu1 }
0x1255   :  { %v3778_v17 = vpop.f32.mrb[109].mxu1  ;;  %v3777_v6 = vadd.f32 %v3776_v56, %v6670_v55 }
0x1256   :  { %v3779_v25 = vadd.f32 %v3778_v17, %v3649_v28  ;;  %v3780_v23 = vpop.f32.mrb[110].mxu1 }
0x1257   :  { %v3782_v5 = vpop.f32.mrb[111].mxu1  ;;  %v3781_v45 = vadd.f32 %v3780_v23, %v6670_v55 }
0x1258   :  { %v4367_v36 = vmul.f32 -1.442695, %v3779_v25  ;;  %v3783_v1 = vadd.f32 %v3782_v5, %v3649_v28 }
0x125a   :  { %5138 = vpow2.f32 %v4367_v36  ;;  %v4368_v48 = vmul.f32 -1.442695, %v3783_v1 }
0x125c   :  { %v5135_v4 = vpop.eup %5134  ;;  %5140 = vpow2.f32 %v4368_v48  ;;  %v3786_v54 = vpop.f32.mrb[112].mxu1 }
0x125d   :  { %v3837_v61 = vadd.f32 1.0, %v5135_v4  ;;  %v3788_v8 = vpop.f32.mrb[113].mxu1  ;;  %5142 = vtanh.f32 %v3767_v51  ;;  %v3787_v34 = vadd.f32 %v3786_v54, %v6670_v55 }
0x125e   :  { %v5137_v47 = vpop.eup %5136  ;;  %v3789_v22 = vadd.f32 %v3788_v8, %v3649_v28  ;;  %v3790_v41 = vpop.f32.mrb[114].mxu1 }
0x125f   :  { %5144 = vrcp.f32 %v3837_v61  ;;  %v3838_v38 = vadd.f32 1.0, %v5137_v47  ;;  %v3792_v2 = vpop.f32.mrb[115].mxu1  ;;  %v3791_v26 = vadd.f32 %v3790_v41, %v6670_v55 }
0x1260   :  { %5146 = vtanh.f32 %v3771_v15  ;;  %v4369_v27 = vmul.f32 -1.442695, %v3789_v22  ;;  %v3793_v37 = vadd.f32 %v3792_v2, %v3649_v28 }
0x1261   :  { %5148 = vrcp.f32 %v3838_v38 }
0x1262   :  { %5150 = vpow2.f32 %v4369_v27  ;;  %v4370_v58 = vmul.f32 -1.442695, %v3793_v37 }
0x1264   :  { %v5139_v24 = vpop.eup %5138  ;;  %5152 = vpow2.f32 %v4370_v58  ;;  %v3796_v52 = vpop.f32.mrb[116].mxu1 }
0x1265   :  { %v3839_v18 = vadd.f32 1.0, %v5139_v24  ;;  %v3798_v21 = vpop.f32.mrb[117].mxu1  ;;  %5154 = vtanh.f32 %v3777_v6  ;;  %v3797_v11 = vadd.f32 %v3796_v52, %v6670_v55 }
0x1266   :  { %v5141_v9 = vpop.eup %5140  ;;  %v3799_v16 = vadd.f32 %v3798_v21, %v3649_v28  ;;  %v3800_v29 = vpop.f32.mrb[118].mxu1 }
0x1267   :  { %5156 = vrcp.f32 %v3839_v18  ;;  %v3840_v50 = vadd.f32 1.0, %v5141_v9  ;;  %v3802_v14 = vpop.f32.mrb[119].mxu1  ;;  %v5143_v60 = vpop.eup %5142  ;;  %v3801_v20 = vadd.f32 %v3800_v29, %v6670_v55  ;;  %v4374_v18 = vld [vmem:[#allocation2] ss:$0 sm:$0xff] }
0x1268   :  { %5158 = vtanh.f32 %v3781_v45  ;;  %v4371_v63 = vmul.f32 -1.442695, %v3799_v16  ;;  %v3803_v30 = vadd.f32 %v3802_v14, %v3649_v28 }
0x1269   :  { %v5145_v49 = vpop.eup %5144  ;;  %5160 = vrcp.f32 %v3840_v50 }
0x126a   :  { %v5147_v44 = vpop.eup %5146  ;;  %5162 = vpow2.f32 %v4371_v63  ;;  %v4372_v46 = vmul.f32 -1.442695, %v3803_v30  ;;  %v3861_v39 = vmul.f32 %v5145_v49, %v5143_v60 }
0x126b   :  { %v5149_v59 = vpop.eup %5148 }
0x126c   :  { %v5151_v32 = vpop.eup %5150  ;;  %5164 = vpow2.f32 %v4372_v46  ;;  %v3876_v42 = vmul.f32 %v4373_v31, %v3861_v39  ;;  %v3862_v3 = vmul.f32 %v5149_v59, %v5147_v44 }
0x126d   :  { %v3841_v62 = vadd.f32 1.0, %v5151_v32  ;;  %5166 = vtanh.f32 %v3787_v34 }
0x126e   :  { %v5153_v13 = vpop.eup %5152  ;;  %3884 = vadd.xlane.f32.xlu0 %v3876_v42  ;;  %v3877_v33 = vmul.f32 %v4373_v31, %v3862_v3 }
0x126f   :  { %5168 = vrcp.f32 %v3841_v62  ;;  %v3842_v28 = vadd.f32 1.0, %v5153_v13  ;;  %v5155_v40 = vpop.eup %5154 }
0x1270   :  { %5170 = vtanh.f32 %v3791_v26  ;;  %3886 = vadd.xlane.f32.xlu1 %v3877_v33 }
0x1271   :  { %v5157_v35 = vpop.eup %5156  ;;  %5172 = vrcp.f32 %v3842_v28 }
0x1272   :  { %v5159_v0 = vpop.eup %5158  ;;  %v3863_v19 = vmul.f32 %v5157_v35, %v5155_v40  ;;  %5174 = vtanh.f32 %v3797_v11 }
0x1273   :  { %v5161_v53 = vpop.eup %5160 }
0x1274   :  { %v5163_v12 = vpop.eup %5162  ;;  %v3878_v56 = vmul.f32 %v4373_v31, %v3863_v19  ;;  %v3864_v17 = vmul.f32 %v5161_v53, %v5159_v0 }
0x1275   :  { %v3843_v25 = vadd.f32 1.0, %v5163_v12 }
0x1276   :  { %v5165_v23 = vpop.eup %5164  ;;  %3888 = vadd.xlane.f32.xlu0 %v3878_v56  ;;  %v3879_v5 = vmul.f32 %v4373_v31, %v3864_v17 }
0x1277   :  { %5176 = vrcp.f32 %v3843_v25  ;;  %v3844_v36 = vadd.f32 1.0, %v5165_v23  ;;  %v5167_v1 = vpop.eup %5166 }
0x1278   :  { %5178 = vtanh.f32 %v3801_v20  ;;  %3890 = vadd.xlane.f32.xlu1 %v3879_v5 }
0x1279   :  { %v5169_v51 = vpop.eup %5168  ;;  %5180 = vrcp.f32 %v3844_v36 }
0x127a   :  { %v5171_v48 = vpop.eup %5170  ;;  %v3865_v4 = vmul.f32 %v5169_v51, %v5167_v1 }
0x127b   :  { %v5173_v15 = vpop.eup %5172 }
0x127c   :  { %v3880_v54 = vmul.f32 %v4373_v31, %v3865_v4  ;;  %v3866_v61 = vmul.f32 %v5173_v15, %v5171_v48  ;;  %v5175_v8 = vpop.eup %5174 }
0x127e   :  { %3892 = vadd.xlane.f32.xlu0 %v3880_v54  ;;  %v3881_v55 = vmul.f32 %v4373_v31, %v3866_v61 }
0x1280   :  { %3894 = vadd.xlane.f32.xlu1 %v3881_v55 }
0x1281   :  { %v5177_v47 = vpop.eup %5176 }
0x1282   :  { %v5179_v22 = vpop.eup %5178  ;;  %v3867_v41 = vmul.f32 %v5177_v47, %v5175_v8 }
0x1283   :  { %v5181_v38 = vpop.eup %5180 }
0x1284   :  { %v3882_v2 = vmul.f32 %v4373_v31, %v3867_v41  ;;  %v3868_v27 = vmul.f32 %v5181_v38, %v5179_v22 }
0x1286   :  { %3896 = vadd.xlane.f32.xlu0 %v3882_v2  ;;  %v3883_v37 = vmul.f32 %v4373_v31, %v3868_v27 }
0x1288   :  { %3898 = vadd.xlane.f32.xlu1 %v3883_v37 }
0x12fb   :  { %v3885_v58 = vpop.xlane.xlu0 %3884 }
0x12fc   :  { %v3907_v50 = vadd.f32 %v4374_v18, %v3885_v58 }
0x12fd   :  { %v3887_v6 = vpop.xlane.xlu1 %3886 }
0x12fe   :  { %v3908_v16 = vadd.f32 %v4374_v18, %v3887_v6  ;;  %v3916_v32 = vsel %vm3915_vm10, %v3907_v50, -inf }
0x1300   :  { %v3917_v44 = vsel %vm3915_vm10, %v3908_v16, -inf }
0x1303   :  { %v3889_v45 = vpop.xlane.xlu0 %3888 }
0x1304   :  { %v3909_v60 = vadd.f32 %v4374_v18, %v3889_v45 }
0x1305   :  { %v3891_v24 = vpop.xlane.xlu1 %3890 }
0x1306   :  { %v3910_v63 = vadd.f32 %v4374_v18, %v3891_v24  ;;  %v3918_v26 = vsel %vm3915_vm10, %v3909_v60, -inf }
0x1308   :  { %v3919_v42 = vsel %vm3915_vm10, %v3910_v63, -inf }
0x130b   :  { %v3893_v21 = vpop.xlane.xlu0 %3892 }
0x130c   :  { %v3911_v29 = vadd.f32 %v4374_v18, %v3893_v21 }
0x130d   :  { %v3895_v52 = vpop.xlane.xlu1 %3894 }
0x130e   :  { %v3912_v9 = vadd.f32 %v4374_v18, %v3895_v52  ;;  %v3920_v34 = vsel %vm3915_vm10, %v3911_v29, -inf  ;;  %v5448_v52 = vmov 0.0  }
0x130f   :  { %v3921_v62 = vmax.f32 %v3916_v32, %v3920_v34  ;;  %4686 = vmatprep.subr.bf16.mxu1 %v5448_v52  ;;  %4698 = vmatprep.subr.bf16.mxu0 %v5448_v52 }
0x1310   :  { %v3922_v30 = vsel %vm3915_vm10, %v3912_v9, -inf  ;;  %4694 = vmatprep.mubr.msk.bf16.mxu1 %vm5449_vm11, %v5448_v52  ;;  %4714 = vmatprep.mubr.msk.bf16.mxu0 %vm5449_vm11, %v5448_v52 }
0x1311   :  { %v3923_v59 = vmax.f32 %v3917_v44, %v3922_v30 }
0x1313   :  { %v3897_v14 = vpop.xlane.xlu0 %3896  ;;  %v3928_v28 = vmax.f32 %v3921_v62, %v3923_v59 }
0x1314   :  { %v3913_v49 = vadd.f32 %v4374_v18, %v3897_v14 }
0x1315   :  { %v3899_v31 = vpop.xlane.xlu1 %3898 }
0x1316   :  { %v3924_v46 = vsel %vm3915_vm10, %v3913_v49, -inf  ;;  %v3914_v39 = vadd.f32 %v4374_v18, %v3899_v31 }
0x1317   :  { %v3925_v13 = vmax.f32 %v3918_v26, %v3924_v46 }
0x1318   :  { %v3926_v3 = vsel %vm3915_vm10, %v3914_v39, -inf }
0x1319   :  { %v3927_v33 = vmax.f32 %v3919_v42, %v3926_v3  ;;  %v4950_v42 = vld [vmem:[%s6772_s15] sm:$0xff]   ;;  %v4951_v3 = vld [vmem:[%s6772_s15 + $0x8] sm:$0xff]  }
0x131a   :  { %4699 = vmatpush3.bf16.msra.mxu0 %v4950_v42 }
0x131b   :  { %v3929_v40 = vmax.f32 %v3925_v13, %v3927_v33  ;;  %4700 = vmatprep.subr.bf16.mxu0 %v5448_v52  ;;  %v4952_v13 = vld [vmem:[%s6772_s15 + $0x10] sm:$0xff]  }
0x131d   :  { %v3930_v35 = vmax.f32 %v3928_v28, %v3929_v40 }
0x131e   :  { %4701 = vmatpush3.bf16.msra.mxu0 %v4951_v3 }
0x131f   :  { %3931 = vmax.xlane.f32.xlu0 %v3930_v35  ;;  %4702 = vmatprep.subr.bf16.mxu0 %v5448_v52  ;;  %v4953_v35 = vld [vmem:[%s6772_s15 + $0x18] sm:$0xff]  }
0x1322   :  { %4703 = vmatpush3.bf16.msra.mxu0 %v4952_v13 }
0x1323   :  { %4704 = vmatprep.subr.bf16.mxu0 %v5448_v52 }
0x1326   :  { %4705 = vmatpush3.bf16.msra.mxu0 %v4953_v35 }
0x1327   :  { %4706 = vmatprep.subr.bf16.mxu0 %v5448_v52 }
0x13ac   :  { %v3932_v0 = vpop.xlane.xlu0 %3931 }
0x13ad   :  { %v3933_v11 = vrot.slane %v3932_v0, 4 }
0x13af   :  { %v3934_v19 = vmax.f32 %v3932_v0, %v3933_v11 }
0x13b1   :  { %v3935_v53 = vrot.slane %v3934_v19, 2 }
0x13b3   :  { %v3936_v12 = vmax.f32 %v3934_v19, %v3935_v53 }
0x13b5   :  { %v3937_v20 = vrot.slane %v3936_v12, 1 }
0x13b7   :  { %v3938_v56 = vmax.f32 %v3936_v12, %v3937_v20  ;;  %v5450_v12 = vmov 1065369472  }
0x13b9   :  { %4742 = vpush %v3938_v56 }
0x13ea   :  { %s4743_s13 = spop %4742 }
0x13eb   :  { %v3940_v17 = vstv %s4743_s13 }
0x13ec   :  { %v3943_v25 = vsub.f32 %v3909_v60, %v3940_v17  ;;  %v3944_v23 = vsub.f32 %v3910_v63, %v3940_v17  ;;  %v3941_v5 = vsub.f32 %v3907_v50, %v3940_v17  ;;  %v3942_v36 = vsub.f32 %v3908_v16, %v3940_v17 }
0x13ed   :  { %v3945_v1 = vsub.f32 %v3911_v29, %v3940_v17  ;;  %v3946_v51 = vsub.f32 %v3912_v9, %v3940_v17  ;;  %v3947_v55 = vsub.f32 %v3913_v49, %v3940_v17  ;;  %v3948_v47 = vsub.f32 %v3914_v39, %v3940_v17 }
0x13ee   :  { %v3953_v48 = vmul.f32 1.442695, %v3943_v25  ;;  %v3955_v4 = vmul.f32 1.442695, %v3944_v23  ;;  %v3949_v15 = vmul.f32 1.442695, %v3941_v5 }
0x13ef   :  { %v3951_v54 = vmul.f32 1.442695, %v3942_v36  ;;  %v3957_v61 = vmul.f32 1.442695, %v3945_v1  ;;  %v3959_v8 = vmul.f32 1.442695, %v3946_v51 }
0x13f0   :  { %5182 = vpow2.f32 %v3953_v48  ;;  %v3961_v22 = vmul.f32 1.442695, %v3947_v55  ;;  %v3963_v41 = vmul.f32 1.442695, %v3948_v47  ;;  %v4957_v36 = vld [vmem:[%s6772_s15 + $0x38] sm:$0xff]  }
0x13f1   :  { %5184 = vpow2.f32 %v3955_v4 }
0x13f2   :  { %5186 = vpow2.f32 %v3949_v15 }
0x13f3   :  { %5188 = vpow2.f32 %v3951_v54 }
0x13f4   :  { %5190 = vpow2.f32 %v3957_v61 }
0x13f5   :  { %5192 = vpow2.f32 %v3959_v8  ;;  %v4080_v8 = vld [vmem:[%s6773_s16] sm:$0x1] }
0x13f6   :  { %5194 = vpow2.f32 %v3961_v22 }
0x13f7   :  { %5196 = vpow2.f32 %v3963_v41 }
0x13fa   :  { %v5183_v38 = vpop.eup %5182 }
0x13fb   :  { %v5185_v2 = vpop.eup %5184  ;;  %v3968_v60 = vsel %vm3915_vm10, %v5183_v38, 0.0 }
0x13fc   :  { %v5187_v27 = vpop.eup %5186  ;;  %v3990_v37 = vpack.c.bf16 %v5185_v2, %v5183_v38  ;;  %v3970_v30 = vsel %vm3915_vm10, %v5185_v2, 0.0 }
0x13fd   :  { %v5189_v6 = vpop.eup %5188  ;;  %v3965_v29 = vsel %vm3915_vm10, %v5187_v27, 0.0 }
0x13fe   :  { %v5191_v58 = vpop.eup %5190  ;;  %4000 = vperm.xlu0 %4765, %v3990_v37   ;;  %v3989_v24 = vpack.c.bf16 %v5189_v6, %v5187_v27  ;;  %v3966_v50 = vsel %vm3915_vm10, %v5189_v6, 0.0 }
0x13ff   :  { %v5193_v45 = vpop.eup %5192  ;;  %v3967_v14 = vadd.f32 %v3966_v50, %v3965_v29  ;;  %v3972_v31 = vsel %vm3915_vm10, %v5191_v58, 0.0 }
0x1400   :  { %3995 = vperm.xlu1 %4764, %v3989_v24   ;;  %v5195_v18 = vpop.eup %5194  ;;  %v3991_v21 = vpack.c.bf16 %v5193_v45, %v5191_v58  ;;  %v3974_v34 = vsel %vm3915_vm10, %v5193_v45, 0.0 }
0x1401   :  { %v5197_v9 = vpop.eup %5196  ;;  %v3969_v63 = vadd.f32 %v3968_v60, %v3967_v14  ;;  %v3976_v39 = vsel %vm3915_vm10, %v5195_v18, 0.0 }
0x1402   :  { %v3992_v16 = vpack.c.bf16 %v5197_v9, %v5195_v18  ;;  %v3978_v32 = vsel %vm3915_vm10, %v5197_v9, 0.0 }
0x1403   :  { %v3971_v49 = vadd.f32 %v3970_v30, %v3969_v63 }
0x1404   :  { %4005 = vperm.xlu1 %4764, %v3991_v21  }
0x1405   :  { %v3973_v44 = vadd.f32 %v3972_v31, %v3971_v49 }
0x1407   :  { %v3975_v46 = vadd.f32 %v3974_v34, %v3973_v44 }
0x1408   :  { %4010 = vperm.xlu1 %4764, %v3992_v16  }
0x1409   :  { %v3977_v59 = vadd.f32 %v3976_v39, %v3975_v46 }
0x140b   :  { %v3979_v26 = vadd.f32 %v3978_v32, %v3977_v59 }
0x142c   :  { %3980 = vadd.xlane.f32.xlu1 %v3979_v26 }
0x147d   :  { %v4001_v28 = vpop.permute.xlu0 %4000 }
0x147e   :  { %v4014_v0 = vmul.bf16 %v4001_v28, %v6650_v43  ;;  %v4955_v43 = vld [vmem:[%s6772_s15 + $0x28] sm:$0xff]  }
0x147f   :  { %v3996_v62 = vpop.permute.xlu1 %3995 }
0x1480   :  { %v4013_v33 = vmul.bf16 %v3996_v62, %v6652_v7  ;;  %v4954_v7 = vld [vmem:[%s6772_s15 + $0x20] sm:$0xff]  }
0x1481   :  { %4707 = vmatpush3.bf16.msra.mxu0 %v4954_v7 }
0x1482   :  { %4687 = vmatpush3.bf16.msra.mxu1 %v4013_v33  ;;  %4708 = vmatprep.subr.bf16.mxu0 %v5448_v52 }
0x1483   :  { %v4006_v40 = vpop.permute.xlu1 %4005  ;;  %4688 = vmatprep.subr.bf16.mxu1 %v5448_v52 }
0x1484   :  { %v4015_v11 = vmul.bf16 %v4006_v40, %v6660_v57  ;;  %v4956_v57 = vld [vmem:[%s6772_s15 + $0x30] sm:$0xff]   ;;  %s5396_s15 = scalar_lea.vmem %s4178_s2, 16 }
0x1485   :  { %4709 = vmatpush3.bf16.msra.mxu0 %v4955_v43  ;;  %p5397_p13 = scmp.ne.s32.totalorder %s4178_s2, %s5396_s15  ;;  %p5402_p1 = scmp.lt.s32.totalorder %s5400_s6, %s5396_s15 }
0x1486   :  { %4689 = vmatpush3.bf16.msra.mxu1 %v4014_v0  ;;  %4710 = vmatprep.subr.bf16.mxu0 %v5448_v52 }
0x1487   :  { %4690 = vmatprep.subr.bf16.mxu1 %v5448_v52  ;;  %v4011_v19 = vpop.permute.xlu1 %4010  ;;  %p5403_p2 = por %p5402_p1, %p5401_p0 }
0x1488   :  { %v4016_v53 = vmul.bf16 %v4011_v19, %v6658_v10 }
0x1489   :  { %4711 = vmatpush3.bf16.msra.mxu0 %v4956_v57  ;;  %p5404_p3 = pnand %p5403_p2, %p5397_p13 }
0x148a   :  { %4691 = vmatpush3.bf16.msra.mxu1 %v4015_v11  ;;  %4712 = vmatprep.subr.bf16.mxu0 %v5448_v52 }
0x148b   :  { %4692 = vmatprep.subr.bf16.mxu1 %v5448_v52 }
0x148d   :  { %4713 = vmatpush3.bf16.msra.mxu0 %v4957_v36 }
0x148e   :  { %4693 = vmatpush3.bf16.msra.mxu1 %v4016_v53 }
0x1491   :  { %4695 = vmatmul.mubr.msk.bf16.vlgmr.msra.gmra.mrb[120].mxu1 %vm240_vm0, %v5450_v12  ;;  %vm4169_vm0 = vcmask 24576  }
0x14b9   :  { %v3981_v20 = vpop.xlane.xlu1 %3980 }
0x14ba   :  { %v3982_v56 = vrot.slane %v3981_v20, 4 }
0x14bc   :  { %v3983_v17 = vadd.f32 %v3982_v56, %v3981_v20 }
0x14be   :  { %v3984_v10 = vrot.slane %v3983_v17, 2 }
0x14c0   :  { %v3985_v25 = vadd.f32 %v3984_v10, %v3983_v17 }
0x14c2   :  { %v3986_v23 = vrot.slane %v3985_v25, 1 }
0x14c4   :  { %v3987_v5 = vadd.f32 %v3986_v23, %v3985_v25 }
0x14c6   :  { %4744 = vpush %v3987_v5 }
0x14f7   :  { %s4745_s24 = spop %4744 }
0x14f8   :  { %v4060_v1 = vstv %s4745_s24 }
0x14f9   :  { %5198 = vrcp.f32 %v4060_v1 }
0x1503   :  { %v5199_v51 = vpop.eup %5198 }
0x1564   :  { %v4054_v48 = vpop.f32.mrb[120].mxu1 }
0x1565   :  { %v4062_v4 = vmul.f32 %v5199_v51, %v4054_v48  ;;  %v4696_v15 = vpop.f32.mrb[121].mxu1 }
0x1566   :  { %v4057_v54 = vpop.f32.mrb[122].mxu1 }
0x1567   :  { %v4079_v61 = vpack.c.bf16 %v4062_v4, %v4062_v4  ;;  %v4697_v55 = vpop.f32.mrb[123].mxu1 }
0x1569   :  { %4715 = vmatmul.mubr.bf16.vlgmr.msra.gmra.mrb[56].mxu0 %v4079_v61 }
0x163c   :  { %v4163_v47 = vpop.f32.mrb[56].mxu0 }
0x163d   :  { %v4164_v22 = vadd.f32 %v4163_v47, %v4080_v8  ;;  %v4716_v41 = vpop.f32.mrb[57].mxu0 }
0x163e   :  { %v4166_v38 = vpop.f32.mrb[58].mxu0 }
0x163f   :  { %v4717_v2 = vpop.f32.mrb[59].mxu0  ;;  %4170 = vst.msk [vmem:[#allocation19] sm:$0x1] %vm4169_vm0, %v4164_v22 }
0x1640   :  { %5407 = shalt.err (!%p5404_p3)
}
0x1641   :  { %s5408_s10 = scalar_lea.hbm %s6774_s17, 16 }
0x1642   :  { %p5409_p4 = scmp.ne.s32.totalorder %s6774_s17, %s5408_s10  ;;  %p5412_p5 = scmp.lt.u32.totalorder %s5408_s10, %s6774_s17 }
0x1644   :  { %p5414_p6 = pnand %p5412_p5, %p5409_p4 }
0x1646   :  { %5417 = shalt.err (!%p5414_p6)
}
0x1647   :  { %4180 = dma.vmem_to_hbm [thread:$0]  %s4178_s2, 16, %s6774_s17, [#allocation5]  }
0x1648   :  { %5432 = dma.done.wait [#allocation5], 16  }
0x1649   :  { %5433 = vsyncadd [#allocation5], 4294967280 }
0x164a   :  { %4184 = vsyncpa [#allocation4], 1 }
0x164b   :  { %4185 = vsyncpa [#allocation8], 1 }
0x164c   :  { %4186 = vsyncpa [#allocation11], 1 }
0x164d   :  { %4187 = vsyncpa [#allocation14], 1 }
0x164e   :  { %4188 = vsyncpa [#allocation18], 1 }
0x164f   :  { %4189 = vsyncpa [#allocation5], 1 }
0x1650   :  { %4190 = vsyncpa [#allocation6], 1 }

</bundles_post_ra>
